<compile_context>
chip_gen: v7x
topology: tpu7x:2x2x1
jax: 0.10.0
libtpu: 0.0.40
codegen_flags: <defaults>
</compile_context>

<pallas_src>
import functools

import jax
import jax.numpy as jnp
import numpy as np
from jax import lax
from jax.experimental import pallas as pl
from jax.experimental.pallas import tpu as pltpu


# ----------------------------------------------------------------------------
# Host-side builders for the structured matrices that encode the convolutions
# in the (B*H, W*C) layout.  These are one-time parameter transforms.
# ----------------------------------------------------------------------------
def _row_shift(B, H, dh):
    """(B*H, B*H) matrix R with (R @ F)[b*H+h] = F[b*H+h+dh] (0 outside image)."""
    return np.kron(np.eye(B), np.eye(H, k=dh)).astype(np.float32)


def _row_select_strided(B, Hi, Ho, stride, kh):
    """(B*Ho, B*Hi) matrix S with (S @ F)[b*Ho+ho] = F[b*Hi + stride*ho + kh]."""
    sub = np.zeros((Ho, Hi), np.float32)
    sub[np.arange(Ho), stride * np.arange(Ho) + kh] = 1.0
    return np.kron(np.eye(B), sub).astype(np.float32)


def _col_mix_same3(w_oihw, dh, W):
    """Column-mixing matrix (W*Ci, W*Co) of a 3x3 'same' conv for row offset dh."""
    Co, Ci = w_oihw.shape[0], w_oihw.shape[1]
    M = np.zeros((W * Ci, W * Co), np.float32)
    for wo in range(W):
        for dw in (-1, 0, 1):
            wi = wo + dw
            if 0 <= wi < W:
                M[wi * Ci:(wi + 1) * Ci, wo * Co:(wo + 1) * Co] = \
                    w_oihw[:, :, dh + 1, dw + 1].T
    return M


def _col_mix_strided(w_oihw, kh, Wi, Wo, stride):
    """Column-mixing matrix (Wi*Ci, Wo*Co) of a valid strided conv, row tap kh."""
    Co, Ci, _, KW = w_oihw.shape
    M = np.zeros((Wi * Ci, Wo * Co), np.float32)
    for wo in range(Wo):
        for kw in range(KW):
            wi = stride * wo + kw
            M[wi * Ci:(wi + 1) * Ci, wo * Co:(wo + 1) * Co] = w_oihw[:, :, kh, kw].T
    return M


def _col_mix_1x1(w_oihw, W):
    """Block-diagonal (W*Ci, W*Co) matrix of a 1x1 conv."""
    Co, Ci = w_oihw.shape[0], w_oihw.shape[1]
    M = np.zeros((W * Ci, W * Co), np.float32)
    for w in range(W):
        M[w * Ci:(w + 1) * Ci, w * Co:(w + 1) * Co] = w_oihw[:, :, 0, 0].T
    return M


# ----------------------------------------------------------------------------
# Fused Pallas kernel: entire CondAffineCoupling forward.
# Layout: F[b*H + h, w*C + c] = X[b, c, h, w].
# ----------------------------------------------------------------------------
def _coupling_kernel(x_ref, z1_ref, z2_ref,
                     rxR_ref, m1_ref, b1_ref,
                     s2_ref, n2_ref,
                     ryR_ref, m3_ref,
                     mf1x_ref, mf1z_ref,
                     p2_ref, mf3_ref,
                     rows_f_ref, rows_y_ref, bsum_ref,
                     z2o_ref, dlog_ref,
                     *, n_kh2, reverse):
    f32 = jnp.float32

    def dot(a, b):
        return jnp.dot(a, b, preferred_element_type=f32)

    def shifted(F, R_ref):
        # dh = -1, 0, +1 row-shifted copies (zero padded at image boundaries).
        return (dot(R_ref[0], F), F, dot(R_ref[1], F))

    def mix(Fs, M_ref, base=0):
        # sum_dh Fs[dh] @ M[base+dh]; M carries the kw taps and the ci->co mix.
        return (dot(Fs[0], M_ref[base + 0]) +
                dot(Fs[1], M_ref[base + 1]) +
                dot(Fs[2], M_ref[base + 2]))

    def relu(t):
        return jnp.maximum(t, 0.0)

    # ----- resize_x: Conv2dZeros(3x3) -> ReLU -> Conv2dResize -> ReLU
    #                 -> Conv2dZeros(3x3) -> ReLU -----
    x_F = x_ref[...]                                            # (B*Hx, Wx*Cx)
    h = relu(mix(shifted(x_F, rxR_ref), m1_ref) + b1_ref[...])  # (B*Hx, Wx*16)
    acc = dot(dot(s2_ref[0], h), n2_ref[0])                     # resize conv (valid, strided)
    for kh in range(1, n_kh2):
        acc = acc + dot(dot(s2_ref[kh], h), n2_ref[kh])
    h = relu(acc + rows_y_ref[0:1, :])                          # (B*Hy, Wy*Ch)
    x_res = relu(mix(shifted(h, ryR_ref), m3_ref) + rows_y_ref[1:2, :])

    # ----- f: Conv2dNormy(3x3, cat(x_res, z1)) + actnorm + ReLU -----
    z1_F = z1_ref[...]
    g = (mix(shifted(x_res, ryR_ref), mf1x_ref) +
         mix(shifted(z1_F, ryR_ref), mf1z_ref))
    g = relu((g + rows_f_ref[0:1, :]) * rows_f_ref[1:2, :])

    # ----- f: Conv2dNormy(1x1) + actnorm + ReLU -----
    g = dot(g, p2_ref[...])
    g = relu((g + rows_f_ref[2:3, :]) * rows_f_ref[3:4, :])

    # ----- f: Conv2dZerosy(3x3) + Tanh, 'cross' split into shift / scale -----
    gs = shifted(g, ryR_ref)
    shift = jnp.tanh((mix(gs, mf3_ref, 0) + rows_y_ref[2:3, :]) * rows_y_ref[3:4, :])
    scale_t = jnp.tanh((mix(gs, mf3_ref, 3) + rows_y_ref[4:5, :]) * rows_y_ref[5:6, :])
    scale = 1.0 / (1.0 + jnp.exp(-(scale_t + 2.0)))             # sigmoid(. + 2)

    # ----- affine coupling of z2 and per-sample logdet -----
    z2_F = z2_ref[...]
    if not reverse:
        z2o_ref[...] = (z2_F + shift) * scale
    else:
        z2o_ref[...] = z2_F / scale - shift

    dlog = jnp.sum(dot(bsum_ref[...], jnp.log(scale)), axis=-1, keepdims=True)
    if reverse:
        dlog = -dlog
    dlog_ref[...] = dlog                                        # (B, 1)


# ----------------------------------------------------------------------------
# One-time parameter preparation (PyTorch layout -> kernel layout).
# ----------------------------------------------------------------------------
def prepare_params(params, batch, x_size, y_size, hidden_channels):
    Cx, Hx, Wx = x_size
    Ch, Hy, Wy = y_size
    B = batch
    g = lambda k: np.asarray(params[k], np.float32)

    w1 = g("rx1_w")
    w2 = g("rx2_w")
    w3 = g("rx3_w")
    wf1, wf2, wf3 = g("f1_w"), g("f2_w"), g("f3_w")
    KH2, KW2 = int(w2.shape[2]), int(w2.shape[3])
    sh, sw = Hx // Hy, Wx // Wy
    assert (Hy - 1) * sh + KH2 == Hx and (Wy - 1) * sw + KW2 == Wx

    rxR = np.stack([_row_shift(B, Hx, d) for d in (-1, 1)])
    m1 = np.stack([_col_mix_same3(w1, d, Wx) for d in (-1, 0, 1)])
    b1 = np.tile(g("rx1_b"), Wx)[None, :]

    s2 = np.stack([_row_select_strided(B, Hx, Hy, sh, kh) for kh in range(KH2)])
    n2 = np.stack([_col_mix_strided(w2, kh, Wx, Wy, sw) for kh in range(KH2)])

    ryR = np.stack([_row_shift(B, Hy, d) for d in (-1, 1)])
    m3 = np.stack([_col_mix_same3(w3, d, Wy) for d in (-1, 0, 1)])

    # f conv1: input channels 0..Ch-1 come from x_res, Ch..2Ch-1 from z1 (cat order).
    mf1x = np.stack([_col_mix_same3(wf1[:, :Ch], d, Wy) for d in (-1, 0, 1)])
    mf1z = np.stack([_col_mix_same3(wf1[:, Ch:], d, Wy) for d in (-1, 0, 1)])

    p2 = _col_mix_1x1(wf2, Wy)

    # f conv3: 'cross' split baked into the weights (even out-ch -> shift, odd -> scale).
    mf3 = np.concatenate(
        [np.stack([_col_mix_same3(wf3[0::2], d, Wy) for d in (-1, 0, 1)]),
         np.stack([_col_mix_same3(wf3[1::2], d, Wy) for d in (-1, 0, 1)])], axis=0)

    rows_f = np.stack([
        np.tile(g("f1_anb"), Wy),
        np.tile(np.exp(g("f1_anl")), Wy),
        np.tile(g("f2_anb"), Wy),
        np.tile(np.exp(g("f2_anl")), Wy),
    ])
    add3 = g("f3_b") + g("f3_nb")
    mul3 = np.exp(3.0 * g("f3_logs"))
    rows_y = np.stack([
        np.tile(g("rx2_b"), Wy),
        np.tile(g("rx3_b"), Wy),
        np.tile(add3[0::2], Wy), np.tile(mul3[0::2], Wy),   # shift branch
        np.tile(add3[1::2], Wy), np.tile(mul3[1::2], Wy),   # scale branch
    ])
    bsum = np.kron(np.eye(B, dtype=np.float32), np.ones((1, Hy), np.float32))

    jf = lambda a: jnp.asarray(a, jnp.float32)
    return {
        "rxR": jf(rxR), "m1": jf(m1), "b1": jf(b1),
        "s2": jf(s2), "n2": jf(n2),
        "ryR": jf(ryR), "m3": jf(m3),
        "mf1x": jf(mf1x), "mf1z": jf(mf1z),
        "p2": jf(p2), "mf3": jf(mf3),
        "rows_f": jf(rows_f), "rows_y": jf(rows_y), "bsum": jf(bsum),
        "n_kh2": KH2,
    }


# ----------------------------------------------------------------------------
# Forward wrapper: one fused pallas_call, only tiny layout ops outside.
# ----------------------------------------------------------------------------
def cond_affine_coupling_forward(kp, x, y, logdet=None, reverse=False):
    B, Cy, Hy, Wy = y.shape
    Ch = Cy // 2
    _, Cx, Hx, Wx = x.shape

    to_flat = lambda t, H, W, C: jnp.transpose(t, (0, 2, 3, 1)).reshape(B * H, W * C)
    x_F = to_flat(x, Hx, Wx, Cx).astype(jnp.float32)
    z1 = y[:, :Ch]
    z2 = y[:, Ch:]
    z1_F = to_flat(z1, Hy, Wy, Ch).astype(jnp.float32)
    z2_F = to_flat(z2, Hy, Wy, Ch).astype(jnp.float32)

    kern = functools.partial(_coupling_kernel, n_kh2=kp["n_kh2"], reverse=reverse)
    z2n_F, dlog = pl.pallas_call(
        kern,
        out_shape=(jax.ShapeDtypeStruct((B * Hy, Wy * Ch), jnp.float32),
                   jax.ShapeDtypeStruct((B, 1), jnp.float32)),
        compiler_params=pltpu.CompilerParams(vmem_limit_bytes=64 * 1024 * 1024),
    )(x_F, z1_F, z2_F,
      kp["rxR"], kp["m1"], kp["b1"],
      kp["s2"], kp["n2"],
      kp["ryR"], kp["m3"],
      kp["mf1x"], kp["mf1z"],
      kp["p2"], kp["mf3"],
      kp["rows_f"], kp["rows_y"], kp["bsum"])

    z2n = z2n_F.reshape(B, Hy, Wy, Ch).transpose(0, 3, 1, 2)
    z = jnp.concatenate([z1, z2n], axis=1)
    if logdet is not None:
        logdet = logdet + dlog[:, 0]   # kernel already applies the reverse sign
    return z, logdet


# ----------------------------------------------------------------------------
# Pure-JAX reference (for correctness check).
# ----------------------------------------------------------------------------
def reference_forward(params, x, y, logdet=None, reverse=False):
    dn = ("NCHW", "OIHW", "NCHW")
    relu = lambda t: jnp.maximum(t, 0.0)
    bb = lambda v: v[None, :, None, None]
    B, Cy, Hy, Wy = y.shape
    Ch = Cy // 2
    _, Cx, Hx, Wx = x.shape
    sh, sw = Hx // Hy, Wx // Wy

    def conv(h, w, stride, pad):
        return lax.conv_general_dilated(h, w, stride, pad, dimension_numbers=dn)

    h = relu(conv(x, params["rx1_w"], (1, 1), ((1, 1), (1, 1))) + bb(params["rx1_b"]))
    h = relu(conv(h, params["rx2_w"], (sh, sw), ((0, 0), (0, 0))) + bb(params["rx2_b"]))
    x_res = relu(conv(h, params["rx3_w"], (1, 1), ((1, 1), (1, 1))) + bb(params["rx3_b"]))

    z1, z2 = y[:, :Ch], y[:, Ch:]
    g = conv(jnp.concatenate([x_res, z1], axis=1), params["f1_w"], (1, 1), ((1, 1), (1, 1)))
    g = relu((g + bb(params["f1_anb"])) * jnp.exp(bb(params["f1_anl"])))
    g = conv(g, params["f2_w"], (1, 1), ((0, 0), (0, 0)))
    g = relu((g + bb(params["f2_anb"])) * jnp.exp(bb(params["f2_anl"])))
    g = conv(g, params["f3_w"], (1, 1), ((1, 1), (1, 1))) + bb(params["f3_b"])
    g = jnp.tanh((g + bb(params["f3_nb"])) * jnp.exp(3.0 * bb(params["f3_logs"])))

    shift, scale_t = g[:, 0::2], g[:, 1::2]
    scale = jax.nn.sigmoid(scale_t + 2.0)
    if not reverse:
        z2n = (z2 + shift) * scale
        dl = jnp.sum(jnp.log(scale), axis=(1, 2, 3))
    else:
        z2n = z2 / scale - shift
        dl = -jnp.sum(jnp.log(scale), axis=(1, 2, 3))
    z = jnp.concatenate([z1, z2n], axis=1)
    if logdet is not None:
        logdet = logdet + dl
    return z, logdet


# ----------------------------------------------------------------------------
# Deterministic parameter construction (shapes follow the module's __init__).
# NOTE: several weights (Conv2dResize / Conv2dZerosy) are zero-initialized in
# PyTorch; small random normals are used here so the compute path is non-trivial.
# ----------------------------------------------------------------------------
def make_params(key, x_size, y_size, hidden_channels):
    Cx, Hx, Wx = x_size
    Ch, Hy, Wy = y_size
    hid = hidden_channels
    sh, sw = Hx // Hy, Wx // Wy
    kh2, kw2 = Hx - (Hy - 1) * sh, Wx - (Wy - 1) * sw
    ks = jax.random.split(key, 16)
    n = jax.random.normal
    return {
        "rx1_w": 0.10 * n(ks[0], (16, Cx, 3, 3), jnp.float32),
        "rx1_b": 0.10 * n(ks[1], (16,), jnp.float32),
        "rx2_w": 0.15 * n(ks[2], (Ch, 16, kh2, kw2), jnp.float32),
        "rx2_b": 0.10 * n(ks[3], (Ch,), jnp.float32),
        "rx3_w": 0.15 * n(ks[4], (Ch, Ch, 3, 3), jnp.float32),
        "rx3_b": 0.10 * n(ks[5], (Ch,), jnp.float32),
        "f1_w": 0.10 * n(ks[6], (hid, 2 * Ch, 3, 3), jnp.float32),
        "f1_anb": 0.05 * n(ks[7], (hid,), jnp.float32),
        "f1_anl": 0.05 * n(ks[8], (hid,), jnp.float32),
        "f2_w": 0.10 * n(ks[9], (hid, hid, 1, 1), jnp.float32),
        "f2_anb": 0.05 * n(ks[10], (hid,), jnp.float32),
        "f2_anl": 0.05 * n(ks[11], (hid,), jnp.float32),
        "f3_w": 0.10 * n(ks[12], (2 * Ch, hid, 3, 3), jnp.float32),
        "f3_b": 0.10 * n(ks[13], (2 * Ch,), jnp.float32),
        "f3_nb": 0.10 * n(ks[14], (2 * Ch,), jnp.float32),
        "f3_logs": 0.05 * n(ks[15], (2 * Ch,), jnp.float32),
    }


if __name__ == "__main__":
    key = jax.random.PRNGKey(0)
    k_p, k_x, k_y = jax.random.split(key, 3)

    B = 2
    x_size = (4, 16, 16)        # conditioning image x: (C_x, H_x, W_x)
    y_size = (2, 8, 8)          # = (C_y // 2, H_y, W_y), as the module expects
    hidden_channels = 32
    Cy = 2 * y_size[0]

    params = make_params(k_p, x_size, y_size, hidden_channels)
    kp = prepare_params(params, B, x_size, y_size, hidden_channels)

    x = jax.random.normal(k_x, (B,) + x_size, jnp.float32)
    y = jax.random.normal(k_y, (B, Cy, y_size[1], y_size[2]), jnp.float32)
    logdet0 = jnp.zeros((B,), jnp.float32)

    # Forward (fused kernel) vs pure-JAX reference.
    z, logdet = cond_affine_coupling_forward(kp, x, y, logdet=logdet0, reverse=False)
    z = jax.block_until_ready(z)
    logdet = jax.block_until_ready(logdet)

    z_ref, logdet_ref = reference_forward(params, x, y, logdet=logdet0, reverse=False)
    # Tolerances account for MXU default (reduced) f32 matmul precision.
    np.testing.assert_allclose(np.asarray(z), np.asarray(z_ref), rtol=2e-2, atol=2e-2)
    np.testing.assert_allclose(np.asarray(logdet), np.asarray(logdet_ref),
                               rtol=2e-2, atol=2e-1)

    # Invertibility round-trip through the same kernel (exercises the reverse path).
    y_rec, logdet_rt = cond_affine_coupling_forward(kp, x, z, logdet=logdet, reverse=True)
    y_rec = jax.block_until_ready(y_rec)
    np.testing.assert_allclose(np.asarray(y_rec), np.asarray(y), rtol=1e-4, atol=1e-4)
    np.testing.assert_allclose(np.asarray(logdet_rt), np.zeros((B,), np.float32),
                               atol=1e-3)

    print("KERNEL_OK")
</pallas_src>

<mosaic_0001>
module attributes {stable_mosaic.version = 11 : i64} {
  func.func @_coupling_kernel(%arg0: memref<32x64xf32, #tpu.memory_space<vmem>>, %arg1: memref<16x16xf32, #tpu.memory_space<vmem>>, %arg2: memref<16x16xf32, #tpu.memory_space<vmem>>, %arg3: memref<2x32x32xf32, #tpu.memory_space<vmem>>, %arg4: memref<3x64x256xf32, #tpu.memory_space<vmem>>, %arg5: memref<1x256xf32, #tpu.memory_space<vmem>>, %arg6: memref<2x16x32xf32, #tpu.memory_space<vmem>>, %arg7: memref<2x256x16xf32, #tpu.memory_space<vmem>>, %arg8: memref<2x16x16xf32, #tpu.memory_space<vmem>>, %arg9: memref<3x16x16xf32, #tpu.memory_space<vmem>>, %arg10: memref<3x16x256xf32, #tpu.memory_space<vmem>>, %arg11: memref<3x16x256xf32, #tpu.memory_space<vmem>>, %arg12: memref<256x256xf32, #tpu.memory_space<vmem>>, %arg13: memref<6x256x16xf32, #tpu.memory_space<vmem>>, %arg14: memref<4x256xf32, #tpu.memory_space<vmem>>, %arg15: memref<6x16xf32, #tpu.memory_space<vmem>>, %arg16: memref<2x16xf32, #tpu.memory_space<vmem>>, %arg17: memref<16x16xf32, #tpu.memory_space<vmem>>, %arg18: memref<2x1xf32, #tpu.memory_space<vmem>>) attributes {dimension_semantics = [], scalar_prefetch = 0 : i64, scratch_operands = 0 : i64, tpu.core_type = #tpu.core_type<tc>} {
    %c0 = arith.constant 0 : index
    %c0_0 = arith.constant 0 : index
    %0 = vector.load %arg0[%c0, %c0_0] : memref<32x64xf32, #tpu.memory_space<vmem>>, vector<32x64xf32>
    %c0_1 = arith.constant 0 : index
    %c0_2 = arith.constant 0 : index
    %c0_3 = arith.constant 0 : index
    %1 = vector.load %arg3[%c0_1, %c0_2, %c0_3] : memref<2x32x32xf32, #tpu.memory_space<vmem>>, vector<1x32x32xf32>
    %2 = vector.shape_cast %1 : vector<1x32x32xf32> to vector<32x32xf32>
    %cst = arith.constant dense<0.000000e+00> : vector<32x64xf32>
    %3 = tpu.matmul %2, %0, %cst {dimension_numbers = #tpu.dot_dimension_numbers<[1], [0], [0], [1], [0, 0, 1, 1], [], []>} : vector<32x32xf32>, vector<32x64xf32>, vector<32x64xf32> -> vector<32x64xf32>
    %c1 = arith.constant 1 : index
    %c0_4 = arith.constant 0 : index
    %c0_5 = arith.constant 0 : index
    %4 = vector.load %arg3[%c1, %c0_4, %c0_5] : memref<2x32x32xf32, #tpu.memory_space<vmem>>, vector<1x32x32xf32>
    %5 = vector.shape_cast %4 : vector<1x32x32xf32> to vector<32x32xf32>
    %cst_6 = arith.constant dense<0.000000e+00> : vector<32x64xf32>
    %6 = tpu.matmul %5, %0, %cst_6 {dimension_numbers = #tpu.dot_dimension_numbers<[1], [0], [0], [1], [0, 0, 1, 1], [], []>} : vector<32x32xf32>, vector<32x64xf32>, vector<32x64xf32> -> vector<32x64xf32>
    %c0_7 = arith.constant 0 : index
    %c0_8 = arith.constant 0 : index
    %c0_9 = arith.constant 0 : index
    %7 = vector.load %arg4[%c0_7, %c0_8, %c0_9] : memref<3x64x256xf32, #tpu.memory_space<vmem>>, vector<1x64x256xf32>
    %8 = vector.shape_cast %7 : vector<1x64x256xf32> to vector<64x256xf32>
    %cst_10 = arith.constant dense<0.000000e+00> : vector<32x256xf32>
    %9 = tpu.matmul %3, %8, %cst_10 {dimension_numbers = #tpu.dot_dimension_numbers<[1], [0], [0], [1], [0, 0, 1, 1], [], []>} : vector<32x64xf32>, vector<64x256xf32>, vector<32x256xf32> -> vector<32x256xf32>
    %c1_11 = arith.constant 1 : index
    %c0_12 = arith.constant 0 : index
    %c0_13 = arith.constant 0 : index
    %10 = vector.load %arg4[%c1_11, %c0_12, %c0_13] : memref<3x64x256xf32, #tpu.memory_space<vmem>>, vector<1x64x256xf32>
    %11 = vector.shape_cast %10 : vector<1x64x256xf32> to vector<64x256xf32>
    %cst_14 = arith.constant dense<0.000000e+00> : vector<32x256xf32>
    %12 = tpu.matmul %0, %11, %cst_14 {dimension_numbers = #tpu.dot_dimension_numbers<[1], [0], [0], [1], [0, 0, 1, 1], [], []>} : vector<32x64xf32>, vector<64x256xf32>, vector<32x256xf32> -> vector<32x256xf32>
    %13 = arith.addf %9, %12 : vector<32x256xf32>
    %c2 = arith.constant 2 : index
    %c0_15 = arith.constant 0 : index
    %c0_16 = arith.constant 0 : index
    %14 = vector.load %arg4[%c2, %c0_15, %c0_16] : memref<3x64x256xf32, #tpu.memory_space<vmem>>, vector<1x64x256xf32>
    %15 = vector.shape_cast %14 : vector<1x64x256xf32> to vector<64x256xf32>
    %cst_17 = arith.constant dense<0.000000e+00> : vector<32x256xf32>
    %16 = tpu.matmul %6, %15, %cst_17 {dimension_numbers = #tpu.dot_dimension_numbers<[1], [0], [0], [1], [0, 0, 1, 1], [], []>} : vector<32x64xf32>, vector<64x256xf32>, vector<32x256xf32> -> vector<32x256xf32>
    %17 = arith.addf %13, %16 : vector<32x256xf32>
    %c0_18 = arith.constant 0 : index
    %c0_19 = arith.constant 0 : index
    %18 = vector.load %arg5[%c0_18, %c0_19] : memref<1x256xf32, #tpu.memory_space<vmem>>, vector<1x256xf32>
    %19 = vector.broadcast %18 : vector<1x256xf32> to vector<32x256xf32>
    %20 = arith.addf %17, %19 : vector<32x256xf32>
    %cst_20 = arith.constant 0.000000e+00 : f32
    %21 = vector.broadcast %cst_20 : f32 to vector<32x256xf32>
    %22 = arith.maximumf %20, %21 : vector<32x256xf32>
    %c0_21 = arith.constant 0 : index
    %c0_22 = arith.constant 0 : index
    %c0_23 = arith.constant 0 : index
    %23 = vector.load %arg6[%c0_21, %c0_22, %c0_23] : memref<2x16x32xf32, #tpu.memory_space<vmem>>, vector<1x16x32xf32>
    %24 = vector.shape_cast %23 : vector<1x16x32xf32> to vector<16x32xf32>
    %cst_24 = arith.constant dense<0.000000e+00> : vector<16x256xf32>
    %25 = tpu.matmul %24, %22, %cst_24 {dimension_numbers = #tpu.dot_dimension_numbers<[1], [0], [0], [1], [0, 0, 1, 1], [], []>} : vector<16x32xf32>, vector<32x256xf32>, vector<16x256xf32> -> vector<16x256xf32>
    %c0_25 = arith.constant 0 : index
    %c0_26 = arith.constant 0 : index
    %c0_27 = arith.constant 0 : index
    %26 = vector.load %arg7[%c0_25, %c0_26, %c0_27] : memref<2x256x16xf32, #tpu.memory_space<vmem>>, vector<1x256x16xf32>
    %27 = vector.shape_cast %26 : vector<1x256x16xf32> to vector<256x16xf32>
    %cst_28 = arith.constant dense<0.000000e+00> : vector<16x16xf32>
    %28 = tpu.matmul %25, %27, %cst_28 {dimension_numbers = #tpu.dot_dimension_numbers<[1], [0], [0], [1], [0, 0, 1, 1], [], []>} : vector<16x256xf32>, vector<256x16xf32>, vector<16x16xf32> -> vector<16x16xf32>
    %c1_29 = arith.constant 1 : index
    %c0_30 = arith.constant 0 : index
    %c0_31 = arith.constant 0 : index
    %29 = vector.load %arg6[%c1_29, %c0_30, %c0_31] : memref<2x16x32xf32, #tpu.memory_space<vmem>>, vector<1x16x32xf32>
    %30 = vector.shape_cast %29 : vector<1x16x32xf32> to vector<16x32xf32>
    %cst_32 = arith.constant dense<0.000000e+00> : vector<16x256xf32>
    %31 = tpu.matmul %30, %22, %cst_32 {dimension_numbers = #tpu.dot_dimension_numbers<[1], [0], [0], [1], [0, 0, 1, 1], [], []>} : vector<16x32xf32>, vector<32x256xf32>, vector<16x256xf32> -> vector<16x256xf32>
    %c1_33 = arith.constant 1 : index
    %c0_34 = arith.constant 0 : index
    %c0_35 = arith.constant 0 : index
    %32 = vector.load %arg7[%c1_33, %c0_34, %c0_35] : memref<2x256x16xf32, #tpu.memory_space<vmem>>, vector<1x256x16xf32>
    %33 = vector.shape_cast %32 : vector<1x256x16xf32> to vector<256x16xf32>
    %cst_36 = arith.constant dense<0.000000e+00> : vector<16x16xf32>
    %34 = tpu.matmul %31, %33, %cst_36 {dimension_numbers = #tpu.dot_dimension_numbers<[1], [0], [0], [1], [0, 0, 1, 1], [], []>} : vector<16x256xf32>, vector<256x16xf32>, vector<16x16xf32> -> vector<16x16xf32>
    %35 = arith.addf %28, %34 : vector<16x16xf32>
    %c0_37 = arith.constant 0 : index
    %c0_38 = arith.constant 0 : index
    %36 = vector.load %arg15[%c0_37, %c0_38] : memref<6x16xf32, #tpu.memory_space<vmem>>, vector<1x16xf32>
    %37 = vector.broadcast %36 : vector<1x16xf32> to vector<16x16xf32>
    %38 = arith.addf %35, %37 : vector<16x16xf32>
    %cst_39 = arith.constant 0.000000e+00 : f32
    %39 = vector.broadcast %cst_39 : f32 to vector<16x16xf32>
    %40 = arith.maximumf %38, %39 : vector<16x16xf32>
    %c0_40 = arith.constant 0 : index
    %c0_41 = arith.constant 0 : index
    %c0_42 = arith.constant 0 : index
    %41 = vector.load %arg8[%c0_40, %c0_41, %c0_42] : memref<2x16x16xf32, #tpu.memory_space<vmem>>, vector<1x16x16xf32>
    %42 = vector.shape_cast %41 : vector<1x16x16xf32> to vector<16x16xf32>
    %cst_43 = arith.constant dense<0.000000e+00> : vector<16x16xf32>
    %43 = tpu.matmul %42, %40, %cst_43 {dimension_numbers = #tpu.dot_dimension_numbers<[1], [0], [0], [1], [0, 0, 1, 1], [], []>} : vector<16x16xf32>, vector<16x16xf32>, vector<16x16xf32> -> vector<16x16xf32>
    %c1_44 = arith.constant 1 : index
    %c0_45 = arith.constant 0 : index
    %c0_46 = arith.constant 0 : index
    %44 = vector.load %arg8[%c1_44, %c0_45, %c0_46] : memref<2x16x16xf32, #tpu.memory_space<vmem>>, vector<1x16x16xf32>
    %45 = vector.shape_cast %44 : vector<1x16x16xf32> to vector<16x16xf32>
    %cst_47 = arith.constant dense<0.000000e+00> : vector<16x16xf32>
    %46 = tpu.matmul %45, %40, %cst_47 {dimension_numbers = #tpu.dot_dimension_numbers<[1], [0], [0], [1], [0, 0, 1, 1], [], []>} : vector<16x16xf32>, vector<16x16xf32>, vector<16x16xf32> -> vector<16x16xf32>
    %c0_48 = arith.constant 0 : index
    %c0_49 = arith.constant 0 : index
    %c0_50 = arith.constant 0 : index
    %47 = vector.load %arg9[%c0_48, %c0_49, %c0_50] : memref<3x16x16xf32, #tpu.memory_space<vmem>>, vector<1x16x16xf32>
    %48 = vector.shape_cast %47 : vector<1x16x16xf32> to vector<16x16xf32>
    %cst_51 = arith.constant dense<0.000000e+00> : vector<16x16xf32>
    %49 = tpu.matmul %43, %48, %cst_51 {dimension_numbers = #tpu.dot_dimension_numbers<[1], [0], [0], [1], [0, 0, 1, 1], [], []>} : vector<16x16xf32>, vector<16x16xf32>, vector<16x16xf32> -> vector<16x16xf32>
    %c1_52 = arith.constant 1 : index
    %c0_53 = arith.constant 0 : index
    %c0_54 = arith.constant 0 : index
    %50 = vector.load %arg9[%c1_52, %c0_53, %c0_54] : memref<3x16x16xf32, #tpu.memory_space<vmem>>, vector<1x16x16xf32>
    %51 = vector.shape_cast %50 : vector<1x16x16xf32> to vector<16x16xf32>
    %cst_55 = arith.constant dense<0.000000e+00> : vector<16x16xf32>
    %52 = tpu.matmul %40, %51, %cst_55 {dimension_numbers = #tpu.dot_dimension_numbers<[1], [0], [0], [1], [0, 0, 1, 1], [], []>} : vector<16x16xf32>, vector<16x16xf32>, vector<16x16xf32> -> vector<16x16xf32>
    %53 = arith.addf %49, %52 : vector<16x16xf32>
    %c2_56 = arith.constant 2 : index
    %c0_57 = arith.constant 0 : index
    %c0_58 = arith.constant 0 : index
    %54 = vector.load %arg9[%c2_56, %c0_57, %c0_58] : memref<3x16x16xf32, #tpu.memory_space<vmem>>, vector<1x16x16xf32>
    %55 = vector.shape_cast %54 : vector<1x16x16xf32> to vector<16x16xf32>
    %cst_59 = arith.constant dense<0.000000e+00> : vector<16x16xf32>
    %56 = tpu.matmul %46, %55, %cst_59 {dimension_numbers = #tpu.dot_dimension_numbers<[1], [0], [0], [1], [0, 0, 1, 1], [], []>} : vector<16x16xf32>, vector<16x16xf32>, vector<16x16xf32> -> vector<16x16xf32>
    %57 = arith.addf %53, %56 : vector<16x16xf32>
    %c1_60 = arith.constant 1 : index
    %c0_61 = arith.constant 0 : index
    %58 = vector.load %arg15[%c1_60, %c0_61] : memref<6x16xf32, #tpu.memory_space<vmem>>, vector<1x16xf32>
    %59 = vector.broadcast %58 : vector<1x16xf32> to vector<16x16xf32>
    %60 = arith.addf %57, %59 : vector<16x16xf32>
    %cst_62 = arith.constant 0.000000e+00 : f32
    %61 = vector.broadcast %cst_62 : f32 to vector<16x16xf32>
    %62 = arith.maximumf %60, %61 : vector<16x16xf32>
    %c0_63 = arith.constant 0 : index
    %c0_64 = arith.constant 0 : index
    %63 = vector.load %arg1[%c0_63, %c0_64] : memref<16x16xf32, #tpu.memory_space<vmem>>, vector<16x16xf32>
    %c0_65 = arith.constant 0 : index
    %c0_66 = arith.constant 0 : index
    %c0_67 = arith.constant 0 : index
    %64 = vector.load %arg8[%c0_65, %c0_66, %c0_67] : memref<2x16x16xf32, #tpu.memory_space<vmem>>, vector<1x16x16xf32>
    %65 = vector.shape_cast %64 : vector<1x16x16xf32> to vector<16x16xf32>
    %cst_68 = arith.constant dense<0.000000e+00> : vector<16x16xf32>
    %66 = tpu.matmul %65, %62, %cst_68 {dimension_numbers = #tpu.dot_dimension_numbers<[1], [0], [0], [1], [0, 0, 1, 1], [], []>} : vector<16x16xf32>, vector<16x16xf32>, vector<16x16xf32> -> vector<16x16xf32>
    %c1_69 = arith.constant 1 : index
    %c0_70 = arith.constant 0 : index
    %c0_71 = arith.constant 0 : index
    %67 = vector.load %arg8[%c1_69, %c0_70, %c0_71] : memref<2x16x16xf32, #tpu.memory_space<vmem>>, vector<1x16x16xf32>
    %68 = vector.shape_cast %67 : vector<1x16x16xf32> to vector<16x16xf32>
    %cst_72 = arith.constant dense<0.000000e+00> : vector<16x16xf32>
    %69 = tpu.matmul %68, %62, %cst_72 {dimension_numbers = #tpu.dot_dimension_numbers<[1], [0], [0], [1], [0, 0, 1, 1], [], []>} : vector<16x16xf32>, vector<16x16xf32>, vector<16x16xf32> -> vector<16x16xf32>
    %c0_73 = arith.constant 0 : index
    %c0_74 = arith.constant 0 : index
    %c0_75 = arith.constant 0 : index
    %70 = vector.load %arg10[%c0_73, %c0_74, %c0_75] : memref<3x16x256xf32, #tpu.memory_space<vmem>>, vector<1x16x256xf32>
    %71 = vector.shape_cast %70 : vector<1x16x256xf32> to vector<16x256xf32>
    %cst_76 = arith.constant dense<0.000000e+00> : vector<16x256xf32>
    %72 = tpu.matmul %66, %71, %cst_76 {dimension_numbers = #tpu.dot_dimension_numbers<[1], [0], [0], [1], [0, 0, 1, 1], [], []>} : vector<16x16xf32>, vector<16x256xf32>, vector<16x256xf32> -> vector<16x256xf32>
    %c1_77 = arith.constant 1 : index
    %c0_78 = arith.constant 0 : index
    %c0_79 = arith.constant 0 : index
    %73 = vector.load %arg10[%c1_77, %c0_78, %c0_79] : memref<3x16x256xf32, #tpu.memory_space<vmem>>, vector<1x16x256xf32>
    %74 = vector.shape_cast %73 : vector<1x16x256xf32> to vector<16x256xf32>
    %cst_80 = arith.constant dense<0.000000e+00> : vector<16x256xf32>
    %75 = tpu.matmul %62, %74, %cst_80 {dimension_numbers = #tpu.dot_dimension_numbers<[1], [0], [0], [1], [0, 0, 1, 1], [], []>} : vector<16x16xf32>, vector<16x256xf32>, vector<16x256xf32> -> vector<16x256xf32>
    %76 = arith.addf %72, %75 : vector<16x256xf32>
    %c2_81 = arith.constant 2 : index
    %c0_82 = arith.constant 0 : index
    %c0_83 = arith.constant 0 : index
    %77 = vector.load %arg10[%c2_81, %c0_82, %c0_83] : memref<3x16x256xf32, #tpu.memory_space<vmem>>, vector<1x16x256xf32>
    %78 = vector.shape_cast %77 : vector<1x16x256xf32> to vector<16x256xf32>
    %cst_84 = arith.constant dense<0.000000e+00> : vector<16x256xf32>
    %79 = tpu.matmul %69, %78, %cst_84 {dimension_numbers = #tpu.dot_dimension_numbers<[1], [0], [0], [1], [0, 0, 1, 1], [], []>} : vector<16x16xf32>, vector<16x256xf32>, vector<16x256xf32> -> vector<16x256xf32>
    %80 = arith.addf %76, %79 : vector<16x256xf32>
    %c0_85 = arith.constant 0 : index
    %c0_86 = arith.constant 0 : index
    %c0_87 = arith.constant 0 : index
    %81 = vector.load %arg8[%c0_85, %c0_86, %c0_87] : memref<2x16x16xf32, #tpu.memory_space<vmem>>, vector<1x16x16xf32>
    %82 = vector.shape_cast %81 : vector<1x16x16xf32> to vector<16x16xf32>
    %cst_88 = arith.constant dense<0.000000e+00> : vector<16x16xf32>
    %83 = tpu.matmul %82, %63, %cst_88 {dimension_numbers = #tpu.dot_dimension_numbers<[1], [0], [0], [1], [0, 0, 1, 1], [], []>} : vector<16x16xf32>, vector<16x16xf32>, vector<16x16xf32> -> vector<16x16xf32>
    %c1_89 = arith.constant 1 : index
    %c0_90 = arith.constant 0 : index
    %c0_91 = arith.constant 0 : index
    %84 = vector.load %arg8[%c1_89, %c0_90, %c0_91] : memref<2x16x16xf32, #tpu.memory_space<vmem>>, vector<1x16x16xf32>
    %85 = vector.shape_cast %84 : vector<1x16x16xf32> to vector<16x16xf32>
    %cst_92 = arith.constant dense<0.000000e+00> : vector<16x16xf32>
    %86 = tpu.matmul %85, %63, %cst_92 {dimension_numbers = #tpu.dot_dimension_numbers<[1], [0], [0], [1], [0, 0, 1, 1], [], []>} : vector<16x16xf32>, vector<16x16xf32>, vector<16x16xf32> -> vector<16x16xf32>
    %c0_93 = arith.constant 0 : index
    %c0_94 = arith.constant 0 : index
    %c0_95 = arith.constant 0 : index
    %87 = vector.load %arg11[%c0_93, %c0_94, %c0_95] : memref<3x16x256xf32, #tpu.memory_space<vmem>>, vector<1x16x256xf32>
    %88 = vector.shape_cast %87 : vector<1x16x256xf32> to vector<16x256xf32>
    %cst_96 = arith.constant dense<0.000000e+00> : vector<16x256xf32>
    %89 = tpu.matmul %83, %88, %cst_96 {dimension_numbers = #tpu.dot_dimension_numbers<[1], [0], [0], [1], [0, 0, 1, 1], [], []>} : vector<16x16xf32>, vector<16x256xf32>, vector<16x256xf32> -> vector<16x256xf32>
    %c1_97 = arith.constant 1 : index
    %c0_98 = arith.constant 0 : index
    %c0_99 = arith.constant 0 : index
    %90 = vector.load %arg11[%c1_97, %c0_98, %c0_99] : memref<3x16x256xf32, #tpu.memory_space<vmem>>, vector<1x16x256xf32>
    %91 = vector.shape_cast %90 : vector<1x16x256xf32> to vector<16x256xf32>
    %cst_100 = arith.constant dense<0.000000e+00> : vector<16x256xf32>
    %92 = tpu.matmul %63, %91, %cst_100 {dimension_numbers = #tpu.dot_dimension_numbers<[1], [0], [0], [1], [0, 0, 1, 1], [], []>} : vector<16x16xf32>, vector<16x256xf32>, vector<16x256xf32> -> vector<16x256xf32>
    %93 = arith.addf %89, %92 : vector<16x256xf32>
    %c2_101 = arith.constant 2 : index
    %c0_102 = arith.constant 0 : index
    %c0_103 = arith.constant 0 : index
    %94 = vector.load %arg11[%c2_101, %c0_102, %c0_103] : memref<3x16x256xf32, #tpu.memory_space<vmem>>, vector<1x16x256xf32>
    %95 = vector.shape_cast %94 : vector<1x16x256xf32> to vector<16x256xf32>
    %cst_104 = arith.constant dense<0.000000e+00> : vector<16x256xf32>
    %96 = tpu.matmul %86, %95, %cst_104 {dimension_numbers = #tpu.dot_dimension_numbers<[1], [0], [0], [1], [0, 0, 1, 1], [], []>} : vector<16x16xf32>, vector<16x256xf32>, vector<16x256xf32> -> vector<16x256xf32>
    %97 = arith.addf %93, %96 : vector<16x256xf32>
    %98 = arith.addf %80, %97 : vector<16x256xf32>
    %c0_105 = arith.constant 0 : index
    %c0_106 = arith.constant 0 : index
    %99 = vector.load %arg14[%c0_105, %c0_106] : memref<4x256xf32, #tpu.memory_space<vmem>>, vector<1x256xf32>
    %100 = vector.broadcast %99 : vector<1x256xf32> to vector<16x256xf32>
    %101 = arith.addf %98, %100 : vector<16x256xf32>
    %c1_107 = arith.constant 1 : index
    %c0_108 = arith.constant 0 : index
    %102 = vector.load %arg14[%c1_107, %c0_108] : memref<4x256xf32, #tpu.memory_space<vmem>>, vector<1x256xf32>
    %103 = vector.broadcast %102 : vector<1x256xf32> to vector<16x256xf32>
    %104 = arith.mulf %101, %103 : vector<16x256xf32>
    %cst_109 = arith.constant 0.000000e+00 : f32
    %105 = vector.broadcast %cst_109 : f32 to vector<16x256xf32>
    %106 = arith.maximumf %104, %105 : vector<16x256xf32>
    %c0_110 = arith.constant 0 : index
    %c0_111 = arith.constant 0 : index
    %107 = vector.load %arg12[%c0_110, %c0_111] : memref<256x256xf32, #tpu.memory_space<vmem>>, vector<256x256xf32>
    %cst_112 = arith.constant dense<0.000000e+00> : vector<16x256xf32>
    %108 = tpu.matmul %106, %107, %cst_112 {dimension_numbers = #tpu.dot_dimension_numbers<[1], [0], [0], [1], [0, 0, 1, 1], [], []>} : vector<16x256xf32>, vector<256x256xf32>, vector<16x256xf32> -> vector<16x256xf32>
    %c2_113 = arith.constant 2 : index
    %c0_114 = arith.constant 0 : index
    %109 = vector.load %arg14[%c2_113, %c0_114] : memref<4x256xf32, #tpu.memory_space<vmem>>, vector<1x256xf32>
    %110 = vector.broadcast %109 : vector<1x256xf32> to vector<16x256xf32>
    %111 = arith.addf %108, %110 : vector<16x256xf32>
    %c3 = arith.constant 3 : index
    %c0_115 = arith.constant 0 : index
    %112 = vector.load %arg14[%c3, %c0_115] : memref<4x256xf32, #tpu.memory_space<vmem>>, vector<1x256xf32>
    %113 = vector.broadcast %112 : vector<1x256xf32> to vector<16x256xf32>
    %114 = arith.mulf %111, %113 : vector<16x256xf32>
    %cst_116 = arith.constant 0.000000e+00 : f32
    %115 = vector.broadcast %cst_116 : f32 to vector<16x256xf32>
    %116 = arith.maximumf %114, %115 : vector<16x256xf32>
    %c0_117 = arith.constant 0 : index
    %c0_118 = arith.constant 0 : index
    %c0_119 = arith.constant 0 : index
    %117 = vector.load %arg8[%c0_117, %c0_118, %c0_119] : memref<2x16x16xf32, #tpu.memory_space<vmem>>, vector<1x16x16xf32>
    %118 = vector.shape_cast %117 : vector<1x16x16xf32> to vector<16x16xf32>
    %cst_120 = arith.constant dense<0.000000e+00> : vector<16x256xf32>
    %119 = tpu.matmul %118, %116, %cst_120 {dimension_numbers = #tpu.dot_dimension_numbers<[1], [0], [0], [1], [0, 0, 1, 1], [], []>} : vector<16x16xf32>, vector<16x256xf32>, vector<16x256xf32> -> vector<16x256xf32>
    %c1_121 = arith.constant 1 : index
    %c0_122 = arith.constant 0 : index
    %c0_123 = arith.constant 0 : index
    %120 = vector.load %arg8[%c1_121, %c0_122, %c0_123] : memref<2x16x16xf32, #tpu.memory_space<vmem>>, vector<1x16x16xf32>
    %121 = vector.shape_cast %120 : vector<1x16x16xf32> to vector<16x16xf32>
    %cst_124 = arith.constant dense<0.000000e+00> : vector<16x256xf32>
    %122 = tpu.matmul %121, %116, %cst_124 {dimension_numbers = #tpu.dot_dimension_numbers<[1], [0], [0], [1], [0, 0, 1, 1], [], []>} : vector<16x16xf32>, vector<16x256xf32>, vector<16x256xf32> -> vector<16x256xf32>
    %c0_125 = arith.constant 0 : index
    %c0_126 = arith.constant 0 : index
    %c0_127 = arith.constant 0 : index
    %123 = vector.load %arg13[%c0_125, %c0_126, %c0_127] : memref<6x256x16xf32, #tpu.memory_space<vmem>>, vector<1x256x16xf32>
    %124 = vector.shape_cast %123 : vector<1x256x16xf32> to vector<256x16xf32>
    %cst_128 = arith.constant dense<0.000000e+00> : vector<16x16xf32>
    %125 = tpu.matmul %119, %124, %cst_128 {dimension_numbers = #tpu.dot_dimension_numbers<[1], [0], [0], [1], [0, 0, 1, 1], [], []>} : vector<16x256xf32>, vector<256x16xf32>, vector<16x16xf32> -> vector<16x16xf32>
    %c1_129 = arith.constant 1 : index
    %c0_130 = arith.constant 0 : index
    %c0_131 = arith.constant 0 : index
    %126 = vector.load %arg13[%c1_129, %c0_130, %c0_131] : memref<6x256x16xf32, #tpu.memory_space<vmem>>, vector<1x256x16xf32>
    %127 = vector.shape_cast %126 : vector<1x256x16xf32> to vector<256x16xf32>
    %cst_132 = arith.constant dense<0.000000e+00> : vector<16x16xf32>
    %128 = tpu.matmul %116, %127, %cst_132 {dimension_numbers = #tpu.dot_dimension_numbers<[1], [0], [0], [1], [0, 0, 1, 1], [], []>} : vector<16x256xf32>, vector<256x16xf32>, vector<16x16xf32> -> vector<16x16xf32>
    %129 = arith.addf %125, %128 : vector<16x16xf32>
    %c2_133 = arith.constant 2 : index
    %c0_134 = arith.constant 0 : index
    %c0_135 = arith.constant 0 : index
    %130 = vector.load %arg13[%c2_133, %c0_134, %c0_135] : memref<6x256x16xf32, #tpu.memory_space<vmem>>, vector<1x256x16xf32>
    %131 = vector.shape_cast %130 : vector<1x256x16xf32> to vector<256x16xf32>
    %cst_136 = arith.constant dense<0.000000e+00> : vector<16x16xf32>
    %132 = tpu.matmul %122, %131, %cst_136 {dimension_numbers = #tpu.dot_dimension_numbers<[1], [0], [0], [1], [0, 0, 1, 1], [], []>} : vector<16x256xf32>, vector<256x16xf32>, vector<16x16xf32> -> vector<16x16xf32>
    %133 = arith.addf %129, %132 : vector<16x16xf32>
    %c2_137 = arith.constant 2 : index
    %c0_138 = arith.constant 0 : index
    %134 = vector.load %arg15[%c2_137, %c0_138] : memref<6x16xf32, #tpu.memory_space<vmem>>, vector<1x16xf32>
    %135 = vector.broadcast %134 : vector<1x16xf32> to vector<16x16xf32>
    %136 = arith.addf %133, %135 : vector<16x16xf32>
    %c3_139 = arith.constant 3 : index
    %c0_140 = arith.constant 0 : index
    %137 = vector.load %arg15[%c3_139, %c0_140] : memref<6x16xf32, #tpu.memory_space<vmem>>, vector<1x16xf32>
    %138 = vector.broadcast %137 : vector<1x16xf32> to vector<16x16xf32>
    %139 = arith.mulf %136, %138 : vector<16x16xf32>
    %140 = math.tanh %139 : vector<16x16xf32>
    %c3_141 = arith.constant 3 : index
    %c0_142 = arith.constant 0 : index
    %c0_143 = arith.constant 0 : index
    %141 = vector.load %arg13[%c3_141, %c0_142, %c0_143] : memref<6x256x16xf32, #tpu.memory_space<vmem>>, vector<1x256x16xf32>
    %142 = vector.shape_cast %141 : vector<1x256x16xf32> to vector<256x16xf32>
    %cst_144 = arith.constant dense<0.000000e+00> : vector<16x16xf32>
    %143 = tpu.matmul %119, %142, %cst_144 {dimension_numbers = #tpu.dot_dimension_numbers<[1], [0], [0], [1], [0, 0, 1, 1], [], []>} : vector<16x256xf32>, vector<256x16xf32>, vector<16x16xf32> -> vector<16x16xf32>
    %c4 = arith.constant 4 : index
    %c0_145 = arith.constant 0 : index
    %c0_146 = arith.constant 0 : index
    %144 = vector.load %arg13[%c4, %c0_145, %c0_146] : memref<6x256x16xf32, #tpu.memory_space<vmem>>, vector<1x256x16xf32>
    %145 = vector.shape_cast %144 : vector<1x256x16xf32> to vector<256x16xf32>
    %cst_147 = arith.constant dense<0.000000e+00> : vector<16x16xf32>
    %146 = tpu.matmul %116, %145, %cst_147 {dimension_numbers = #tpu.dot_dimension_numbers<[1], [0], [0], [1], [0, 0, 1, 1], [], []>} : vector<16x256xf32>, vector<256x16xf32>, vector<16x16xf32> -> vector<16x16xf32>
    %147 = arith.addf %143, %146 : vector<16x16xf32>
    %c5 = arith.constant 5 : index
    %c0_148 = arith.constant 0 : index
    %c0_149 = arith.constant 0 : index
    %148 = vector.load %arg13[%c5, %c0_148, %c0_149] : memref<6x256x16xf32, #tpu.memory_space<vmem>>, vector<1x256x16xf32>
    %149 = vector.shape_cast %148 : vector<1x256x16xf32> to vector<256x16xf32>
    %cst_150 = arith.constant dense<0.000000e+00> : vector<16x16xf32>
    %150 = tpu.matmul %122, %149, %cst_150 {dimension_numbers = #tpu.dot_dimension_numbers<[1], [0], [0], [1], [0, 0, 1, 1], [], []>} : vector<16x256xf32>, vector<256x16xf32>, vector<16x16xf32> -> vector<16x16xf32>
    %151 = arith.addf %147, %150 : vector<16x16xf32>
    %c4_151 = arith.constant 4 : index
    %c0_152 = arith.constant 0 : index
    %152 = vector.load %arg15[%c4_151, %c0_152] : memref<6x16xf32, #tpu.memory_space<vmem>>, vector<1x16xf32>
    %153 = vector.broadcast %152 : vector<1x16xf32> to vector<16x16xf32>
    %154 = arith.addf %151, %153 : vector<16x16xf32>
    %c5_153 = arith.constant 5 : index
    %c0_154 = arith.constant 0 : index
    %155 = vector.load %arg15[%c5_153, %c0_154] : memref<6x16xf32, #tpu.memory_space<vmem>>, vector<1x16xf32>
    %156 = vector.broadcast %155 : vector<1x16xf32> to vector<16x16xf32>
    %157 = arith.mulf %154, %156 : vector<16x16xf32>
    %158 = math.tanh %157 : vector<16x16xf32>
    %cst_155 = arith.constant 2.000000e+00 : f32
    %159 = vector.broadcast %cst_155 : f32 to vector<16x16xf32>
    %160 = arith.addf %158, %159 : vector<16x16xf32>
    %cst_156 = arith.constant 0.000000e+00 : f32
    %161 = vector.broadcast %cst_156 : f32 to vector<16x16xf32>
    %162 = arith.subf %161, %160 : vector<16x16xf32>
    %163 = math.exp %162 : vector<16x16xf32>
    %cst_157 = arith.constant 1.000000e+00 : f32
    %164 = vector.broadcast %cst_157 : f32 to vector<16x16xf32>
    %165 = arith.addf %164, %163 : vector<16x16xf32>
    %cst_158 = arith.constant 1.000000e+00 : f32
    %166 = vector.broadcast %cst_158 : f32 to vector<16x16xf32>
    %167 = arith.divf %166, %165 : vector<16x16xf32>
    %c0_159 = arith.constant 0 : index
    %c0_160 = arith.constant 0 : index
    %168 = vector.load %arg2[%c0_159, %c0_160] : memref<16x16xf32, #tpu.memory_space<vmem>>, vector<16x16xf32>
    %169 = arith.addf %168, %140 : vector<16x16xf32>
    %170 = arith.mulf %169, %167 : vector<16x16xf32>
    %c0_161 = arith.constant 0 : index
    %c0_162 = arith.constant 0 : index
    %171 = vector.load %arg17[%c0_161, %c0_162] : memref<16x16xf32, #tpu.memory_space<vmem>>, vector<16x16xf32>
    tpu.vector_store %arg17[%c0_161, %c0_162], %170 {strides = array<i32>} : memref<16x16xf32, #tpu.memory_space<vmem>>, vector<16x16xf32>,
    %c0_163 = arith.constant 0 : index
    %c0_164 = arith.constant 0 : index
    %172 = vector.load %arg16[%c0_163, %c0_164] : memref<2x16xf32, #tpu.memory_space<vmem>>, vector<2x16xf32>
    %173 = math.log %167 : vector<16x16xf32>
    %cst_165 = arith.constant dense<0.000000e+00> : vector<2x16xf32>
    %174 = tpu.matmul %172, %173, %cst_165 {dimension_numbers = #tpu.dot_dimension_numbers<[1], [0], [0], [1], [0, 0, 1, 1], [], []>} : vector<2x16xf32>, vector<16x16xf32>, vector<2x16xf32> -> vector<2x16xf32>
    %cst_166 = arith.constant dense<0.000000e+00> : vector<2xf32>
    %175 = vector.multi_reduction <add>, %174, %cst_166 [1] : vector<2x16xf32> to vector<2xf32>
    %176 = vector.shape_cast %175 : vector<2xf32> to vector<2x1xf32>
    %c0_167 = arith.constant 0 : index
    %c0_168 = arith.constant 0 : index
    %177 = vector.load %arg18[%c0_167, %c0_168] : memref<2x1xf32, #tpu.memory_space<vmem>>, vector<2x1xf32>
    tpu.vector_store %arg18[%c0_167, %c0_168], %176 {strides = array<i32>} : memref<2x1xf32, #tpu.memory_space<vmem>>, vector<2x1xf32>,
    return
  }
}

</mosaic_0001>

<bundles_post_ra>
// kernel: tpu_custom_call.1
= control target key start
LH: loop header
LB: loop body
LE: loop exit
PB: predicated region body
PF: predicated region fallthrough
CT: control target
= control target key end

     0   :  { %s5883_s0 = inlined_call_operand.hbm [shape: f32[32,64], index: 0, kind: input, shape index: {}]   ;;  %s5884_s1 = inlined_call_operand.hbm [shape: f32[16,16], index: 1, kind: input, shape index: {}]   ;;  %s5885_s2 = inlined_call_operand.hbm [shape: f32[16,16], index: 2, kind: input, shape index: {}]   ;;  %s5886_s3 = inlined_call_operand.hbm [shape: f32[2,32,32], index: 3, kind: input, shape index: {}]   ;;  %s5887_s4 = inlined_call_operand.hbm [shape: f32[3,64,256], index: 4, kind: input, shape index: {}]   ;;  %s5888_s5 = inlined_call_operand.hbm [shape: f32[1,256], index: 5, kind: input, shape index: {}]   ;;  %s5889_s6 = inlined_call_operand.hbm [shape: f32[2,16,32], index: 6, kind: input, shape index: {}]   ;;  %s5890_s7 = inlined_call_operand.hbm [shape: f32[2,256,16], index: 7, kind: input, shape index: {}]   ;;  %s5891_s8 = inlined_call_operand.hbm [shape: f32[2,16,16], index: 8, kind: input, shape index: {}]   ;;  %s5892_s9 = inlined_call_operand.hbm [shape: f32[3,16,16], index: 9, kind: input, shape index: {}]   ;;  %s5893_s10 = inlined_call_operand.hbm [shape: f32[3,16,256], index: 10, kind: input, shape index: {}]   ;;  %s5894_s11 = inlined_call_operand.hbm [shape: f32[3,16,256], index: 11, kind: input, shape index: {}]   ;;  %s5895_s12 = inlined_call_operand.hbm [shape: f32[256,256], index: 12, kind: input, shape index: {}]   ;;  %s5896_s13 = inlined_call_operand.hbm [shape: f32[6,256,16], index: 13, kind: input, shape index: {}]   ;;  %s5897_s14 = inlined_call_operand.hbm [shape: f32[4,256], index: 14, kind: input, shape index: {}]   ;;  %s5898_s15 = inlined_call_operand.hbm [shape: f32[6,16], index: 15, kind: input, shape index: {}]   ;;  %s5899_s16 = inlined_call_operand.hbm [shape: f32[2,16], index: 16, kind: input, shape index: {}]   ;;  %s5900_s17 = inlined_call_operand.hbm [shape: f32[16,16], index: 17, kind: output, shape index: {0}]   ;;  %s5901_s18 = inlined_call_operand.hbm [shape: f32[2,1], index: 18, kind: output, shape index: {1}]  }
   0x1   :  { %5906 = sst [smem:[#allocation43_spill]] %s5883_s0 }
   0x2   :  { %5907 = sst [smem:[#allocation44_spill]] %s5884_s1 }
   0x3   :  { %5908 = sst [smem:[#allocation45_spill]] %s5885_s2 }
   0x4   :  { %5909 = sst [smem:[#allocation46_spill]] %s5901_s18 }
   0x5   :  { %24 = vsyncpa [#allocation3], 0 }
   0x6   :  { %25 = vsyncpa [#allocation6], 0 }
   0x7   :  { %26 = vsyncpa [#allocation9], 0 }
   0x8   :  { %27 = vsyncpa [#allocation12], 0 }
   0x9   :  { %28 = vsyncpa [#allocation15], 0 }
   0xa   :  { %29 = vsyncpa [#allocation18], 0 }
   0xb   :  { %30 = vsyncpa [#allocation21], 0 }
   0xc   :  { %31 = vsyncpa [#allocation24], 0 }
   0xd   :  { %32 = vsyncpa [#allocation27], 0 }
   0xe   :  { %33 = vsyncpa [#allocation4], 0 }
   0xf   :  { %34 = vsyncpa [#allocation31], 0  ;;  %s5258_s27 = smov [#allocation5]   ;;  %s5259_s29 = smov [#allocation8]  }
  0x10   :  { %s52_s28 = sshll.u32 %s5258_s27, 4  ;;  %s76_s30 = sshll.u32 %s5259_s29, 4  ;;  %s53_s28 = int_to_ptr.vmem [resolvable:$true] %s52_s28  ;;  %s5379_s30 = int_to_ptr.vmem [resolvable:$true] %s76_s30 }
  0x11   :  { %s5910_s1 = sld [smem:[#allocation44_spill]] }
  0x17   :  { %s4818_s20 = scalar_lea.hbm %s5910_s1, 256 }
  0x18   :  { %p4819_p0 = scmp.ne.s32.totalorder %s5910_s1, %s4818_s20  ;;  %p4822_p1 = scmp.lt.u32.totalorder %s4818_s20, %s5910_s1 }
  0x1a   :  { %p4824_p2 = pnand %p4822_p1, %p4819_p0 }
  0x1c   :  { %4827 = shalt.err (!%p4824_p2)
}
  0x1d   :  { %s4828_s24 = scalar_lea.vmem %s53_s28, 256  ;;  %p4833_p4 = scmp.lt.s32.totalorder %s53_s28, %s53_s28 }
  0x1e   :  { %p4829_p3 = scmp.ne.s32.totalorder %s53_s28, %s4828_s24  ;;  %p4834_p5 = scmp.lt.s32.totalorder %s4828_s24, %s4828_s24 }
  0x20   :  { %p4835_p6 = por %p4834_p5, %p4833_p4 }
  0x22   :  { %p4836_p7 = pnand %p4835_p6, %p4829_p3 }
  0x24   :  { %4839 = shalt.err (!%p4836_p7)
}
  0x25   :  { %s5260_s25 = smov 128   ;;  %s5261_s26 = smov 8  }
  0x26   :  { %58 = dma.hbm_to_vmem [thread:$0]  %s5910_s1, 256, %s53_s28, [#allocation6], %s5260_s25, %s5260_s25, %s5261_s26  }
  0x27   :  { %s4840_s20 = scalar_lea.hbm %s5886_s3, 1024 }
  0x28   :  { %p4841_p8 = scmp.ne.s32.totalorder %s5886_s3, %s4840_s20  ;;  %p4844_p9 = scmp.lt.u32.totalorder %s4840_s20, %s5886_s3 }
  0x2a   :  { %p4846_p10 = pnand %p4844_p9, %p4841_p8 }
  0x2c   :  { %4849 = shalt.err (!%p4846_p10)
}
  0x2d   :  { %s4850_s24 = scalar_lea.vmem %s5379_s30, 1024  ;;  %p4855_p12 = scmp.lt.s32.totalorder %s5379_s30, %s5379_s30 }
  0x2e   :  { %p4851_p11 = scmp.ne.s32.totalorder %s5379_s30, %s4850_s24  ;;  %p4856_p13 = scmp.lt.s32.totalorder %s4850_s24, %s4850_s24 }
  0x30   :  { %p4857_p0 = por %p4856_p13, %p4855_p12 }
  0x32   :  { %p4858_p1 = pnand %p4857_p0, %p4851_p11 }
  0x34   :  { %4861 = shalt.err (!%p4858_p1)
}
  0x35   :  { %82 = dma.hbm_to_vmem [thread:$0]  %s5886_s3, 1024, %s5379_s30, [#allocation9], %s5260_s25, %s5260_s25, %s5261_s26  }
  0x36   :  { %s5262_s27 = smov [#allocation11]   ;;  %s5263_s0 = smov [#allocation14]  }
  0x37   :  { %s101_s29 = sshll.u32 %s5262_s27, 4  ;;  %s122_s19 = sshll.u32 %s5263_s0, 4  ;;  %s102_s29 = int_to_ptr.vmem [resolvable:$true] %s101_s29  ;;  %s5416_s19 = int_to_ptr.vmem [resolvable:$true] %s122_s19 }
  0x38   :  { %s4862_s22 = scalar_lea.hbm %s5888_s5, 32 }
  0x39   :  { %p4863_p2 = scmp.ne.s32.totalorder %s5888_s5, %s4862_s22  ;;  %p4866_p3 = scmp.lt.u32.totalorder %s4862_s22, %s5888_s5 }
  0x3b   :  { %p4868_p4 = pnand %p4866_p3, %p4863_p2 }
  0x3d   :  { %4871 = shalt.err (!%p4868_p4)
}
  0x3e   :  { %s4872_s3 = scalar_lea.vmem %s102_s29, 32  ;;  %p4877_p6 = scmp.lt.s32.totalorder %s102_s29, %s102_s29 }
  0x3f   :  { %p4873_p5 = scmp.ne.s32.totalorder %s102_s29, %s4872_s3  ;;  %p4878_p7 = scmp.lt.s32.totalorder %s4872_s3, %s4872_s3 }
  0x41   :  { %p4879_p8 = por %p4878_p7, %p4877_p6 }
  0x43   :  { %p4880_p9 = pnand %p4879_p8, %p4873_p5 }
  0x45   :  { %4883 = shalt.err (!%p4880_p9)
}
  0x46   :  { %104 = dma.hbm_to_vmem [thread:$0]  %s5888_s5, 32, %s102_s29, [#allocation12]  }
  0x47   :  { %s4884_s0 = scalar_lea.hbm %s5890_s7, 8192 }
  0x48   :  { %p4885_p10 = scmp.ne.s32.totalorder %s5890_s7, %s4884_s0  ;;  %p4888_p11 = scmp.lt.u32.totalorder %s4884_s0, %s5890_s7 }
  0x4a   :  { %p4890_p12 = pnand %p4888_p11, %p4885_p10 }
  0x4c   :  { %4893 = shalt.err (!%p4890_p12)
}
  0x4d   :  { %s4894_s2 = scalar_lea.vmem %s5416_s19, 8192  ;;  %p4899_p0 = scmp.lt.s32.totalorder %s5416_s19, %s5416_s19 }
  0x4e   :  { %p4895_p13 = scmp.ne.s32.totalorder %s5416_s19, %s4894_s2  ;;  %p4900_p1 = scmp.lt.s32.totalorder %s4894_s2, %s4894_s2 }
  0x50   :  { %p4901_p2 = por %p4900_p1, %p4899_p0 }
  0x52   :  { %p4902_p3 = pnand %p4901_p2, %p4895_p13 }
  0x54   :  { %4905 = shalt.err (!%p4902_p3)
}
  0x55   :  { %128 = dma.hbm_to_vmem [thread:$0]  %s5890_s7, 8192, %s5416_s19, [#allocation15], %s5260_s25, %s5260_s25, %s5261_s26  }
  0x56   :  { %s5264_s23 = smov [#allocation17]   ;;  %s4906_s28 = scalar_lea.hbm %s5892_s9, 768 }
  0x57   :  { %s146_s24 = sshll.u32 %s5264_s23, 4  ;;  %p4907_p4 = scmp.ne.s32.totalorder %s5892_s9, %s4906_s28  ;;  %s147_s24 = int_to_ptr.vmem [resolvable:$true] %s146_s24 }
  0x58   :  { %p4910_p5 = scmp.lt.u32.totalorder %s4906_s28, %s5892_s9 }
  0x5a   :  { %p4912_p6 = pnand %p4910_p5, %p4907_p4 }
  0x5c   :  { %4915 = shalt.err (!%p4912_p6)
}
  0x5d   :  { %s4916_s18 = scalar_lea.vmem %s147_s24, 768  ;;  %p4921_p8 = scmp.lt.s32.totalorder %s147_s24, %s147_s24 }
  0x5e   :  { %p4917_p7 = scmp.ne.s32.totalorder %s147_s24, %s4916_s18  ;;  %p4922_p9 = scmp.lt.s32.totalorder %s4916_s18, %s4916_s18 }
  0x60   :  { %p4923_p10 = por %p4922_p9, %p4921_p8 }
  0x62   :  { %p4924_p11 = pnand %p4923_p10, %p4917_p7 }
  0x64   :  { %4927 = shalt.err (!%p4924_p11)
}
  0x65   :  { %152 = dma.hbm_to_vmem [thread:$0]  %s5892_s9, 768, %s147_s24, [#allocation18], %s5260_s25, %s5260_s25, %s5261_s26  }
  0x66   :  { %s5265_s21 = smov [#allocation20]   ;;  %s5266_s2 = smov [#allocation23]  }
  0x67   :  { %s170_s22 = sshll.u32 %s5265_s21, 4  ;;  %s194_s5 = sshll.u32 %s5266_s2, 4  ;;  %s171_s22 = int_to_ptr.vmem [resolvable:$true] %s170_s22  ;;  %s195_s5 = int_to_ptr.vmem [resolvable:$true] %s194_s5 }
  0x68   :  { %s4928_s3 = scalar_lea.hbm %s5894_s11, 1536 }
  0x69   :  { %p4929_p12 = scmp.ne.s32.totalorder %s5894_s11, %s4928_s3  ;;  %p4932_p13 = scmp.lt.u32.totalorder %s4928_s3, %s5894_s11 }
  0x6b   :  { %p4934_p0 = pnand %p4932_p13, %p4929_p12 }
  0x6d   :  { %4937 = shalt.err (!%p4934_p0)
}
  0x6e   :  { %s4938_s9 = scalar_lea.vmem %s171_s22, 1536  ;;  %p4943_p2 = scmp.lt.s32.totalorder %s171_s22, %s171_s22 }
  0x6f   :  { %p4939_p1 = scmp.ne.s32.totalorder %s171_s22, %s4938_s9  ;;  %p4944_p3 = scmp.lt.s32.totalorder %s4938_s9, %s4938_s9 }
  0x71   :  { %p4945_p4 = por %p4944_p3, %p4943_p2 }
  0x73   :  { %p4946_p5 = pnand %p4945_p4, %p4939_p1 }
  0x75   :  { %4949 = shalt.err (!%p4946_p5)
}
  0x76   :  { %s5267_s24 = smov 256   ;;  %s5268_s0 = smov 16  }
  0x77   :  { %176 = dma.hbm_to_vmem [thread:$0]  %s5894_s11, 1536, %s171_s22, [#allocation21], %s5267_s24, %s5267_s24, %s5268_s0  }
  0x78   :  { %s4950_s21 = scalar_lea.hbm %s5896_s13, 24576 }
  0x79   :  { %p4951_p6 = scmp.ne.s32.totalorder %s5896_s13, %s4950_s21  ;;  %p4954_p7 = scmp.lt.u32.totalorder %s4950_s21, %s5896_s13 }
  0x7b   :  { %p4956_p8 = pnand %p4954_p7, %p4951_p6 }
  0x7d   :  { %4959 = shalt.err (!%p4956_p8)
}
  0x7e   :  { %s4960_s30 = scalar_lea.vmem %s195_s5, 24576  ;;  %p4965_p10 = scmp.lt.s32.totalorder %s195_s5, %s195_s5 }
  0x7f   :  { %p4961_p9 = scmp.ne.s32.totalorder %s195_s5, %s4960_s30  ;;  %p4966_p11 = scmp.lt.s32.totalorder %s4960_s30, %s4960_s30 }
  0x81   :  { %p4967_p12 = por %p4966_p11, %p4965_p10 }
  0x83   :  { %p4968_p13 = pnand %p4967_p12, %p4961_p9 }
  0x85   :  { %4971 = shalt.err (!%p4968_p13)
}
  0x86   :  { %200 = dma.hbm_to_vmem [thread:$0]  %s5896_s13, 24576, %s195_s5, [#allocation24], %s5260_s25, %s5260_s25, %s5261_s26  }
  0x87   :  { %s5269_s28 = smov [#allocation26]   ;;  %s5270_s27 = smov [#allocation2]  }
  0x88   :  { %s217_s1 = sshll.u32 %s5269_s28, 4  ;;  %s40_s9 = sshll.u32 %s5270_s27, 4  ;;  %s218_s1 = int_to_ptr.vmem [resolvable:$true] %s217_s1  ;;  %s41_s9 = int_to_ptr.vmem [resolvable:$true] %s40_s9 }
  0x89   :  { %s4972_s7 = scalar_lea.hbm %s5898_s15, 128 }
  0x8a   :  { %p4973_p0 = scmp.ne.s32.totalorder %s5898_s15, %s4972_s7  ;;  %p4976_p1 = scmp.lt.u32.totalorder %s4972_s7, %s5898_s15 }
  0x8c   :  { %p4978_p2 = pnand %p4976_p1, %p4973_p0 }
  0x8e   :  { %4981 = shalt.err (!%p4978_p2)
}
  0x8f   :  { %s4982_s13 = scalar_lea.vmem %s218_s1, 128  ;;  %p4987_p4 = scmp.lt.s32.totalorder %s218_s1, %s218_s1 }
  0x90   :  { %p4983_p3 = scmp.ne.s32.totalorder %s218_s1, %s4982_s13  ;;  %p4988_p5 = scmp.lt.s32.totalorder %s4982_s13, %s4982_s13 }
  0x92   :  { %p4989_p6 = por %p4988_p5, %p4987_p4 }
  0x94   :  { %p4990_p7 = pnand %p4989_p6, %p4983_p3 }
  0x96   :  { %4993 = shalt.err (!%p4990_p7)
}
  0x97   :  { %220 = dma.hbm_to_vmem [thread:$0]  %s5898_s15, 128, %s218_s1, [#allocation27]  }
  0x98   :  { %s5911_s11 = sld [smem:[#allocation43_spill]] }
  0x9e   :  { %s4994_s22 = scalar_lea.hbm %s5911_s11, 512 }
  0x9f   :  { %p4995_p8 = scmp.ne.s32.totalorder %s5911_s11, %s4994_s22  ;;  %p4998_p9 = scmp.lt.u32.totalorder %s4994_s22, %s5911_s11 }
  0xa1   :  { %p5000_p10 = pnand %p4998_p9, %p4995_p8 }
  0xa3   :  { %5003 = shalt.err (!%p5000_p10)
}
  0xa4   :  { %s5004_s7 = scalar_lea.vmem %s41_s9, 512  ;;  %p5009_p12 = scmp.lt.s32.totalorder %s41_s9, %s41_s9 }
  0xa5   :  { %p5005_p11 = scmp.ne.s32.totalorder %s41_s9, %s5004_s7  ;;  %p5010_p13 = scmp.lt.s32.totalorder %s5004_s7, %s5004_s7 }
  0xa7   :  { %p5011_p0 = por %p5010_p13, %p5009_p12 }
  0xa9   :  { %p5012_p1 = pnand %p5011_p0, %p5005_p11 }
  0xab   :  { %5015 = shalt.err (!%p5012_p1)
}
  0xac   :  { %46 = dma.hbm_to_vmem [thread:$0]  %s5911_s11, 512, %s41_s9, [#allocation3], %s5260_s25, %s5260_s25, %s5261_s26  }
  0xad   :  { %s5271_s19 = smov [#allocation7]   ;;  %s5272_s2 = smov [#allocation10]  }
  0xae   :  { %s64_s21 = sshll.u32 %s5271_s19, 4  ;;  %s88_s29 = sshll.u32 %s5272_s2, 4  ;;  %s65_s21 = int_to_ptr.vmem [resolvable:$true] %s64_s21  ;;  %s89_s29 = int_to_ptr.vmem [resolvable:$true] %s88_s29 }
  0xaf   :  { %s5912_s23 = sld [smem:[#allocation45_spill]] }
  0xb5   :  { %s5016_s3 = scalar_lea.hbm %s5912_s23, 256 }
  0xb6   :  { %p5017_p2 = scmp.ne.s32.totalorder %s5912_s23, %s5016_s3  ;;  %p5020_p3 = scmp.lt.u32.totalorder %s5016_s3, %s5912_s23 }
  0xb8   :  { %p5022_p4 = pnand %p5020_p3, %p5017_p2 }
  0xba   :  { %5025 = shalt.err (!%p5022_p4)
}
  0xbb   :  { %s5026_s9 = scalar_lea.vmem %s65_s21, 256  ;;  %p5031_p6 = scmp.lt.s32.totalorder %s65_s21, %s65_s21 }
  0xbc   :  { %p5027_p5 = scmp.ne.s32.totalorder %s65_s21, %s5026_s9  ;;  %p5032_p7 = scmp.lt.s32.totalorder %s5026_s9, %s5026_s9 }
  0xbe   :  { %p5033_p8 = por %p5032_p7, %p5031_p6 }
  0xc0   :  { %p5034_p9 = pnand %p5033_p8, %p5027_p5 }
  0xc2   :  { %5037 = shalt.err (!%p5034_p9)
}
  0xc3   :  { %70 = dma.hbm_to_vmem [thread:$0]  %s5912_s23, 256, %s65_s21, [#allocation6], %s5260_s25, %s5260_s25, %s5261_s26  }
  0xc4   :  { %s5038_s15 = scalar_lea.hbm %s5887_s4, 6144 }
  0xc5   :  { %p5039_p10 = scmp.ne.s32.totalorder %s5887_s4, %s5038_s15  ;;  %p5042_p11 = scmp.lt.u32.totalorder %s5038_s15, %s5887_s4 }
  0xc7   :  { %p5044_p12 = pnand %p5042_p11, %p5039_p10 }
  0xc9   :  { %5047 = shalt.err (!%p5044_p12)
}
  0xca   :  { %s5048_s5 = scalar_lea.vmem %s89_s29, 6144  ;;  %p5053_p0 = scmp.lt.s32.totalorder %s89_s29, %s89_s29 }
  0xcb   :  { %p5049_p13 = scmp.ne.s32.totalorder %s89_s29, %s5048_s5  ;;  %p5054_p1 = scmp.lt.s32.totalorder %s5048_s5, %s5048_s5 }
  0xcd   :  { %p5055_p2 = por %p5054_p1, %p5053_p0 }
  0xcf   :  { %p5056_p3 = pnand %p5055_p2, %p5049_p13 }
  0xd1   :  { %5059 = shalt.err (!%p5056_p3)
}
  0xd2   :  { %94 = dma.hbm_to_vmem [thread:$0]  %s5887_s4, 6144, %s89_s29, [#allocation9], %s5267_s24, %s5267_s24, %s5268_s0  }
  0xd3   :  { %s5273_s3 = smov [#allocation13]   ;;  %s5274_s22 = smov [#allocation16]  }
  0xd4   :  { %s110_s30 = sshll.u32 %s5273_s3, 4  ;;  %s134_s28 = sshll.u32 %s5274_s22, 4  ;;  %s111_s30 = int_to_ptr.vmem [resolvable:$true] %s110_s30  ;;  %s135_s28 = int_to_ptr.vmem [resolvable:$true] %s134_s28 }
  0xd5   :  { %s5060_s11 = scalar_lea.hbm %s5889_s6, 512 }
  0xd6   :  { %p5061_p4 = scmp.ne.s32.totalorder %s5889_s6, %s5060_s11  ;;  %p5064_p5 = scmp.lt.u32.totalorder %s5060_s11, %s5889_s6 }
  0xd8   :  { %p5066_p6 = pnand %p5064_p5, %p5061_p4 }
  0xda   :  { %5069 = shalt.err (!%p5066_p6)
}
  0xdb   :  { %s5070_s4 = scalar_lea.vmem %s111_s30, 512  ;;  %p5075_p8 = scmp.lt.s32.totalorder %s111_s30, %s111_s30 }
  0xdc   :  { %p5071_p7 = scmp.ne.s32.totalorder %s111_s30, %s5070_s4  ;;  %p5076_p9 = scmp.lt.s32.totalorder %s5070_s4, %s5070_s4 }
  0xde   :  { %p5077_p10 = por %p5076_p9, %p5075_p8 }
  0xe0   :  { %p5078_p11 = pnand %p5077_p10, %p5071_p7 }
  0xe2   :  { %5081 = shalt.err (!%p5078_p11)
}
  0xe3   :  { %116 = dma.hbm_to_vmem [thread:$0]  %s5889_s6, 512, %s111_s30, [#allocation12], %s5260_s25, %s5260_s25, %s5261_s26  }
  0xe4   :  { %s5082_s13 = scalar_lea.hbm %s5891_s8, 512 }
  0xe5   :  { %p5083_p12 = scmp.ne.s32.totalorder %s5891_s8, %s5082_s13  ;;  %p5086_p13 = scmp.lt.u32.totalorder %s5082_s13, %s5891_s8 }
  0xe7   :  { %p5088_p0 = pnand %p5086_p13, %p5083_p12 }
  0xe9   :  { %5091 = shalt.err (!%p5088_p0)
}
  0xea   :  { %s5092_s22 = scalar_lea.vmem %s135_s28, 512  ;;  %p5097_p2 = scmp.lt.s32.totalorder %s135_s28, %s135_s28 }
  0xeb   :  { %p5093_p1 = scmp.ne.s32.totalorder %s135_s28, %s5092_s22  ;;  %p5098_p3 = scmp.lt.s32.totalorder %s5092_s22, %s5092_s22 }
  0xed   :  { %p5099_p4 = por %p5098_p3, %p5097_p2 }
  0xef   :  { %p5100_p5 = pnand %p5099_p4, %p5093_p1 }
  0xf1   :  { %5103 = shalt.err (!%p5100_p5)
}
  0xf2   :  { %140 = dma.hbm_to_vmem [thread:$0]  %s5891_s8, 512, %s135_s28, [#allocation15], %s5260_s25, %s5260_s25, %s5261_s26  }
  0xf3   :  { %s5275_s27 = smov [#allocation19]   ;;  %s5276_s11 = smov [#allocation22]  }
  0xf4   :  { %s158_s9 = sshll.u32 %s5275_s27, 4  ;;  %s182_s20 = sshll.u32 %s5276_s11, 4  ;;  %s159_s9 = int_to_ptr.vmem [resolvable:$true] %s158_s9  ;;  %s183_s20 = int_to_ptr.vmem [resolvable:$true] %s182_s20 }
  0xf5   :  { %s5104_s15 = scalar_lea.hbm %s5893_s10, 1536 }
  0xf6   :  { %p5105_p6 = scmp.ne.s32.totalorder %s5893_s10, %s5104_s15  ;;  %p5108_p7 = scmp.lt.u32.totalorder %s5104_s15, %s5893_s10 }
  0xf8   :  { %p5110_p8 = pnand %p5108_p7, %p5105_p6 }
  0xfa   :  { %5113 = shalt.err (!%p5110_p8)
}
  0xfb   :  { %s5114_s8 = scalar_lea.vmem %s159_s9, 1536  ;;  %p5119_p10 = scmp.lt.s32.totalorder %s159_s9, %s159_s9 }
  0xfc   :  { %p5115_p9 = scmp.ne.s32.totalorder %s159_s9, %s5114_s8  ;;  %p5120_p11 = scmp.lt.s32.totalorder %s5114_s8, %s5114_s8 }
  0xfe   :  { %p5121_p12 = por %p5120_p11, %p5119_p10 }
 0x100   :  { %p5122_p13 = pnand %p5121_p12, %p5115_p9 }
 0x102   :  { %5125 = shalt.err (!%p5122_p13)
}
 0x103   :  { %164 = dma.hbm_to_vmem [thread:$0]  %s5893_s10, 1536, %s159_s9, [#allocation18], %s5267_s24, %s5267_s24, %s5268_s0  }
 0x104   :  { %s5126_s21 = scalar_lea.hbm %s5895_s12, 8192 }
 0x105   :  { %p5127_p0 = scmp.ne.s32.totalorder %s5895_s12, %s5126_s21  ;;  %p5130_p1 = scmp.lt.u32.totalorder %s5126_s21, %s5895_s12 }
 0x107   :  { %p5132_p2 = pnand %p5130_p1, %p5127_p0 }
 0x109   :  { %5135 = shalt.err (!%p5132_p2)
}
 0x10a   :  { %s5136_s30 = scalar_lea.vmem %s183_s20, 8192  ;;  %p5141_p4 = scmp.lt.s32.totalorder %s183_s20, %s183_s20 }
 0x10b   :  { %p5137_p3 = scmp.ne.s32.totalorder %s183_s20, %s5136_s30  ;;  %p5142_p5 = scmp.lt.s32.totalorder %s5136_s30, %s5136_s30 }
 0x10d   :  { %p5143_p6 = por %p5142_p5, %p5141_p4 }
 0x10f   :  { %p5144_p7 = pnand %p5143_p6, %p5137_p3 }
 0x111   :  { %5147 = shalt.err (!%p5144_p7)
}
 0x112   :  { %188 = dma.hbm_to_vmem [thread:$0]  %s5895_s12, 8192, %s183_s20, [#allocation21], %s5267_s24, %s5267_s24, %s5268_s0  }
 0x113   :  { %s5277_s9 = smov [#allocation25]   ;;  %s5278_s18 = smov [#allocation28]  }
 0x114   :  { %s207_s11 = sshll.u32 %s5277_s9, 4  ;;  %s227_s7 = sshll.u32 %s5278_s18, 4  ;;  %s208_s11 = int_to_ptr.vmem [resolvable:$true] %s207_s11  ;;  %s228_s7 = int_to_ptr.vmem [resolvable:$true] %s227_s7 }
 0x115   :  { %s5148_s29 = scalar_lea.hbm %s5897_s14, 128 }
 0x116   :  { %p5149_p8 = scmp.ne.s32.totalorder %s5897_s14, %s5148_s29  ;;  %p5152_p9 = scmp.lt.u32.totalorder %s5148_s29, %s5897_s14 }
 0x118   :  { %p5154_p10 = pnand %p5152_p9, %p5149_p8 }
 0x11a   :  { %5157 = shalt.err (!%p5154_p10)
}
 0x11b   :  { %s5158_s12 = scalar_lea.vmem %s208_s11, 128  ;;  %p5163_p12 = scmp.lt.s32.totalorder %s208_s11, %s208_s11 }
 0x11c   :  { %p5159_p11 = scmp.ne.s32.totalorder %s208_s11, %s5158_s12  ;;  %p5164_p13 = scmp.lt.s32.totalorder %s5158_s12, %s5158_s12 }
 0x11e   :  { %p5165_p0 = por %p5164_p13, %p5163_p12 }
 0x120   :  { %p5166_p1 = pnand %p5165_p0, %p5159_p11 }
 0x122   :  { %5169 = shalt.err (!%p5166_p1)
}
 0x123   :  { %210 = dma.hbm_to_vmem [thread:$0]  %s5897_s14, 128, %s208_s11, [#allocation24]  }
 0x124   :  { %s5170_s13 = scalar_lea.hbm %s5899_s16, 32 }
 0x125   :  { %p5171_p2 = scmp.ne.s32.totalorder %s5899_s16, %s5170_s13  ;;  %p5174_p3 = scmp.lt.u32.totalorder %s5170_s13, %s5899_s16 }
 0x127   :  { %p5176_p4 = pnand %p5174_p3, %p5171_p2 }
 0x129   :  { %5179 = shalt.err (!%p5176_p4)
}
 0x12a   :  { %s5180_s22 = scalar_lea.vmem %s228_s7, 32  ;;  %p5185_p6 = scmp.lt.s32.totalorder %s228_s7, %s228_s7 }
 0x12b   :  { %p5181_p5 = scmp.ne.s32.totalorder %s228_s7, %s5180_s22  ;;  %p5186_p7 = scmp.lt.s32.totalorder %s5180_s22, %s5180_s22 }
 0x12d   :  { %p5187_p8 = por %p5186_p7, %p5185_p6 }
 0x12f   :  { %p5188_p9 = pnand %p5187_p8, %p5181_p5 }
 0x131   :  { %5191 = shalt.err (!%p5188_p9)
}
 0x132   :  { %230 = dma.hbm_to_vmem [thread:$0]  %s5899_s16, 32, %s228_s7, [#allocation27]  }
 0x133   :  { %5236 = dma.done.wait [#allocation3], 512  }
 0x134   :  { %5237 = vsyncadd [#allocation3], 4294966784 }
 0x135   :  { %5238 = dma.done.wait [#allocation6], 512  }
 0x136   :  { %5239 = vsyncadd [#allocation6], 4294966784 }
 0x137   :  { %5240 = dma.done.wait [#allocation9], 7168  }
 0x138   :  { %5241 = vsyncadd [#allocation9], 4294960128 }
 0x139   :  { %5242 = dma.done.wait [#allocation12], 544  }
 0x13a   :  { %5243 = vsyncadd [#allocation12], 4294966752 }
 0x13b   :  { %5244 = dma.done.wait [#allocation15], 8704  }
 0x13c   :  { %5245 = vsyncadd [#allocation15], 4294958592 }
 0x13d   :  { %5246 = dma.done.wait [#allocation18], 2304  }
 0x13e   :  { %5247 = vsyncadd [#allocation18], 4294964992 }
 0x13f   :  { %5248 = dma.done.wait [#allocation21], 9728  }
 0x140   :  { %5249 = vsyncadd [#allocation21], 4294957568 }
 0x141   :  { %5250 = dma.done.wait [#allocation24], 24704  }
 0x142   :  { %5251 = vsyncadd [#allocation24], 4294942592 }
 0x143   :  { %5252 = dma.done.wait [#allocation27], 160  }
 0x144   :  { %5253 = vsyncadd [#allocation27], 4294967136  ;;  %v5279_v0 = vmov 0.0   ;;  %vm290_vm0 = vcmask 261120   ;;  %v5637_v1 = vld [vmem:[#allocation2] sm:$0xff]  ;;  %v5639_v2 = vld [vmem:[#allocation2 + $0x8] sm:$0xff] }
 0x145   :  { %600 = vmatprep.mubr.f32.mxu0 %v5279_v0  ;;  %v5641_v3 = vld [vmem:[#allocation2 + $0x10] sm:$0xff]  ;;  %v4261_v4 = vpack.c.bf16 %v5639_v2, %v5637_v1  ;;  %v5645_v5 = vld [vmem:[#allocation2 + $0x18] sm:$0xff]  ;;  %v286_v6 = vld [vmem:[#allocation8] sm:$0xff]  ;;  %vm523_vm1 = vcmask 523264   ;;  %vm1277_vm2 = vcmask 130048   ;;  %vm5281_vm3 = vmmov 0  }
 0x146   :  { %v4265_v7 = vpack.c.bf16 %v5645_v5, %v5641_v3  ;;  %4171 = vmatprep.mubr.msk.f32.mxu1 %vm290_vm0, %v286_v6  ;;  %v508_v8 = vld [vmem:[#allocation10 + $0x88] sm:$0xff]  ;;  %v510_v9 = vld [vmem:[#allocation10 + $0x98] sm:$0xff]  ;;  %v507_v10 = vld [vmem:[#allocation10 + $0x80] sm:$0xff]  ;;  %vm3694_vm4 = vcmask 123904   ;;  %s5282_s16 = smov [#allocation29]  }
 0x147   :  { %4262 = vmatprep.subr.bf16.mxu1 %v4261_v4  ;;  %v4277_v11 = vpack.c.bf16 %v510_v9, %v508_v8  ;;  %v509_v12 = vld [vmem:[#allocation10 + $0x90] sm:$0xff]  ;;  %v512_v13 = vld [vmem:[#allocation10 + $0xa8] sm:$0xff]  ;;  %v514_v14 = vld [vmem:[#allocation10 + $0xb8] sm:$0xff]  ;;  %s3705_s30 = sshll.u32 %s5282_s16, 4  ;;  %s3706_s30 = int_to_ptr.vmem [resolvable:$true] %s3705_s30 }
 0x148   :  { %4264 = vmatpush3.bf16.msra.mxu1 %v4261_v4  ;;  %v4279_v15 = vpack.c.bf16 %v509_v12, %v507_v10  ;;  %v4281_v16 = vpack.c.bf16 %v514_v14, %v512_v13  ;;  %v511_v17 = vld [vmem:[#allocation10 + $0xa0] sm:$0xff]  ;;  %v513_v18 = vld [vmem:[#allocation10 + $0xb0] sm:$0xff]  ;;  %v516_v19 = vld [vmem:[#allocation10 + $0xc8] sm:$0xff]  ;;  %s5192_s10 = scalar_lea.vmem %s3706_s30, 256  ;;  %p5197_p11 = scmp.lt.s32.totalorder %s3706_s30, %s3706_s30 }
 0x149   :  { %4266 = vmatprep.subr.bf16.mxu1 %v4265_v7  ;;  %4278 = vmatprep.subr.bf16.mxu0 %v4277_v11  ;;  %v518_v20 = vld [vmem:[#allocation10 + $0xd8] sm:$0xff]  ;;  %v287_v21 = vld [vmem:[#allocation8 + $0x8] sm:$0xff]  ;;  %v288_v22 = vld [vmem:[#allocation8 + $0x10] sm:$0xff]  ;;  %v4283_v23 = vpack.c.bf16 %v513_v18, %v511_v17  ;;  %p5193_p10 = scmp.ne.s32.totalorder %s3706_s30, %s5192_s10  ;;  %p5198_p12 = scmp.lt.s32.totalorder %s5192_s10, %s5192_s10 }
 0x14a   :  { %4280 = vmatpush1.bf16.msra.mxu0 %v4279_v15  ;;  %v4285_v24 = vpack.c.bf16 %v518_v20, %v516_v19  ;;  %v515_v25 = vld [vmem:[#allocation10 + $0xc0] sm:$0xff]  ;;  %v517_v26 = vld [vmem:[#allocation10 + $0xd0] sm:$0xff]  ;;  %v520_v27 = vld [vmem:[#allocation10 + $0xe8] sm:$0xff] }
 0x14b   :  { %4282 = vmatprep.subr.bf16.mxu0 %v4281_v16  ;;  %v522_v28 = vld [vmem:[#allocation10 + $0xf8] sm:$0xff]  ;;  %v389_v30 = vld [vmem:[#allocation8 + $0x20] sm:$0xff]  ;;  %v4287_v31 = vpack.c.bf16 %v517_v26, %v515_v25  ;;  %v521_v34 = vld [vmem:[#allocation10 + $0xf0] sm:$0xff]  ;;  %p5199_p13 = por %p5198_p12, %p5197_p11 }
 0x14c   :  { %4268 = vmatpush3.bf16.msra.mxu1 %v4265_v7  ;;  %v289_v29 = vld [vmem:[#allocation8 + $0x18] sm:$0xff]  ;;  %v4289_v32 = vpack.c.bf16 %v522_v28, %v520_v27  ;;  %v519_v33 = vld [vmem:[#allocation10 + $0xe0] sm:$0xff]  ;;  %v491_v35 = vld [vmem:[#allocation10 + $0x8] sm:$0xff] }
 0x14d   :  { %4270 = vmatprep.subr.bf16.mxu1 %v4261_v4  ;;  %v493_v36 = vld [vmem:[#allocation10 + $0x18] sm:$0xff]  ;;  %v390_v37 = vld [vmem:[#allocation8 + $0x28] sm:$0xff]  ;;  %v391_v38 = vld [vmem:[#allocation8 + $0x30] sm:$0xff]  ;;  %v4291_v39 = vpack.c.bf16 %v521_v34, %v519_v33  ;;  %p5200_p0 = pnand %p5199_p13, %p5193_p10 }
 0x14e   :  { %4284 = vmatpush1.bf16.msra.mxu0 %v4283_v23  ;;  %v4293_v40 = vpack.c.bf16 %v493_v36, %v491_v35  ;;  %v490_v41 = vld [vmem:[#allocation10] sm:$0xff]  ;;  %v492_v42 = vld [vmem:[#allocation10 + $0x10] sm:$0xff]  ;;  %v495_v43 = vld [vmem:[#allocation10 + $0x28] sm:$0xff] }
 0x14f   :  { %4172 = vmatmul.mubr.msk.f32.vlgmr.msra.gmra.mrb[0].mxu1 %vm290_vm0, %v287_v21  ;;  %4286 = vmatprep.subr.bf16.mxu0 %v4285_v24  ;;  %v497_v44 = vld [vmem:[#allocation10 + $0x38] sm:$0xff]  ;;  %v4295_v46 = vpack.c.bf16 %v492_v42, %v490_v41  ;;  %v494_v48 = vld [vmem:[#allocation10 + $0x20] sm:$0xff]  ;;  %v496_v49 = vld [vmem:[#allocation10 + $0x30] sm:$0xff] }
 0x150   :  { %4174 = vmatprep.mubr.msk.f32.mxu1 %vm290_vm0, %v288_v22  ;;  %4272 = vmatpush3.bf16.msra.mxu1 %v4261_v4  ;;  %v392_v45 = vld [vmem:[#allocation8 + $0x38] sm:$0xff]  ;;  %v4297_v47 = vpack.c.bf16 %v497_v44, %v495_v43  ;;  %v499_v50 = vld [vmem:[#allocation10 + $0x48] sm:$0xff]  ;;  %v4299_v52 = vpack.c.bf16 %v496_v49, %v494_v48  ;;  %v498_v54 = vld [vmem:[#allocation10 + $0x40] sm:$0xff] }
 0x151   :  { %4274 = vmatprep.subr.bf16.mxu1 %v4265_v7  ;;  %v501_v51 = vld [vmem:[#allocation10 + $0x58] sm:$0xff]  ;;  %v500_v55 = vld [vmem:[#allocation10 + $0x50] sm:$0xff]  ;;  %v503_v56 = vld [vmem:[#allocation10 + $0x68] sm:$0xff] }
 0x152   :  { %4288 = vmatpush1.bf16.msra.mxu0 %v4287_v31  ;;  %v4301_v53 = vpack.c.bf16 %v501_v51, %v499_v50  ;;  %v505_v57 = vld [vmem:[#allocation10 + $0x78] sm:$0xff]  ;;  %v4303_v58 = vpack.c.bf16 %v500_v55, %v498_v54  ;;  %v502_v60 = vld [vmem:[#allocation10 + $0x60] sm:$0xff]  ;;  %v504_v61 = vld [vmem:[#allocation10 + $0x70] sm:$0xff] }
 0x153   :  { %4175 = vmatmul.mubr.msk.f32.gmra.mrb[2].mxu1 %vm290_vm0, %v289_v29  ;;  %4290 = vmatprep.subr.bf16.mxu0 %v4289_v32  ;;  %v4305_v59 = vpack.c.bf16 %v505_v57, %v503_v56  ;;  %v4307_v62 = vpack.c.bf16 %v504_v61, %v502_v60  ;;  %v728_v63 = vld [vmem:[#allocation10 + $0x108] sm:$0xff]  ;;  %v727_v4 = vld [vmem:[#allocation10 + $0x100] sm:$0xff]  ;;  %v729_v6 = vld [vmem:[#allocation10 + $0x110] sm:$0xff] }
 0x154   :  { %4276 = vmatpush3.bf16.msra.mxu1 %v4265_v7  ;;  %4185 = vmatprep.mubr.msk.f32.mxu1 %vm290_vm0, %v389_v30  ;;  %v732_v7 = vld [vmem:[#allocation10 + $0x128] sm:$0xff]  ;;  %v734_v8 = vld [vmem:[#allocation10 + $0x138] sm:$0xff]  ;;  %v731_v11 = vld [vmem:[#allocation10 + $0x120] sm:$0xff] }
 0x155   :  { %v4313_v10 = vpack.c.bf16 %v734_v8, %v732_v7  ;;  %v733_v12 = vld [vmem:[#allocation10 + $0x130] sm:$0xff]  ;;  %v736_v14 = vld [vmem:[#allocation10 + $0x148] sm:$0xff]  ;;  %v738_v15 = vld [vmem:[#allocation10 + $0x158] sm:$0xff] }
 0x156   :  { %4292 = vmatpush1.bf16.msra.mxu0 %v4291_v39  ;;  %v4317_v17 = vpack.c.bf16 %v738_v15, %v736_v14  ;;  %v735_v18 = vld [vmem:[#allocation10 + $0x140] sm:$0xff]  ;;  %v737_v19 = vld [vmem:[#allocation10 + $0x150] sm:$0xff]  ;;  %v740_v21 = vld [vmem:[#allocation10 + $0x168] sm:$0xff]  ;;  %v854_v15 = vlaneseq }
 0x157   :  { %4186 = vmatmul.mubr.msk.f32.vlgmr.msra.gmra.mrb[4].mxu1 %vm290_vm0, %v390_v37  ;;  %4294 = vmatprep.subr.bf16.mxu0 %v4293_v40  ;;  %v742_v22 = vld [vmem:[#allocation10 + $0x178] sm:$0xff]  ;;  %v4319_v23 = vpack.c.bf16 %v737_v19, %v735_v18  ;;  %v739_v26 = vld [vmem:[#allocation10 + $0x160] sm:$0xff]  ;;  %v741_v27 = vld [vmem:[#allocation10 + $0x170] sm:$0xff] }
 0x158   :  { %4188 = vmatprep.mubr.msk.f32.mxu1 %vm290_vm0, %v391_v38  ;;  %v4321_v24 = vpack.c.bf16 %v742_v22, %v740_v21  ;;  %v4323_v29 = vpack.c.bf16 %v741_v27, %v739_v26  ;;  %v981_v32 = vld [vmem:[#allocation14 + $0x80] sm:$0xff]  ;;  %v982_v33 = vld [vmem:[#allocation14 + $0x88] sm:$0xff]  ;;  %v983_v37 = vld [vmem:[#allocation14 + $0x90] sm:$0xff] }
 0x159   :  { %3747 = vmatmul.mubr.msk.f32.vlgmr.msra.gmra.mrb[0].mxu0 %vm523_vm1, %v5637_v1  ;;  %v730_v1 = vld [vmem:[#allocation10 + $0x118] sm:$0xff]  ;;  %v965_v34 = vld [vmem:[#allocation14] sm:$0xff]  ;;  %v4373_v35 = vpack.c.bf16 %v982_v33, %v981_v32  ;;  %v966_v36 = vld [vmem:[#allocation14 + $0x8] sm:$0xff] }
 0x15a   :  { %4296 = vmatpush1.bf16.msra.mxu0 %v4295_v46  ;;  %606 = vmatprep.mubr.f32.mxu0 %v5279_v0  ;;  %v984_v38 = vld [vmem:[#allocation14 + $0x98] sm:$0xff]  ;;  %v4375_v39 = vpack.c.bf16 %v966_v36, %v965_v34  ;;  %v967_v41 = vld [vmem:[#allocation14 + $0x10] sm:$0xff]  ;;  %v985_v43 = vld [vmem:[#allocation14 + $0xa0] sm:$0xff] }
 0x15b   :  { %4189 = vmatmul.mubr.msk.f32.gmra.mrb[6].mxu1 %vm290_vm0, %v392_v45  ;;  %4298 = vmatprep.subr.bf16.mxu0 %v4297_v47  ;;  %v4377_v40 = vpack.c.bf16 %v984_v38, %v983_v37  ;;  %v968_v42 = vld [vmem:[#allocation14 + $0x18] sm:$0xff]  ;;  %v986_v44 = vld [vmem:[#allocation14 + $0xa8] sm:$0xff]  ;;  %v969_v47 = vld [vmem:[#allocation14 + $0x20] sm:$0xff] }
 0x15c   :  { %952 = vmatprep.mubr.f32.mxu1 %v5279_v0  ;;  %v4379_v45 = vpack.c.bf16 %v968_v42, %v967_v41  ;;  %v4381_v46 = vpack.c.bf16 %v986_v44, %v985_v43  ;;  %v970_v48 = vld [vmem:[#allocation14 + $0x28] sm:$0xff]  ;;  %v987_v49 = vld [vmem:[#allocation14 + $0xb0] sm:$0xff]  ;;  %v988_v50 = vld [vmem:[#allocation14 + $0xb8] sm:$0xff] }
 0x15d   :  { %3748 = vmatmul.mubr.msk.f32.gmra.mrb[2].mxu0 %vm523_vm1, %v5639_v2  ;;  %v4309_v2 = vpack.c.bf16 %v730_v1, %v728_v63  ;;  %v4383_v51 = vpack.c.bf16 %v970_v48, %v969_v47  ;;  %v972_v54 = vld [vmem:[#allocation14 + $0x38] sm:$0xff]  ;;  %v989_v55 = vld [vmem:[#allocation14 + $0xc0] sm:$0xff]  ;;  %v990_v56 = vld [vmem:[#allocation14 + $0xc8] sm:$0xff] }
 0x15e   :  { %4300 = vmatpush1.bf16.msra.mxu0 %v4299_v52  ;;  %612 = vmatprep.mubr.f32.mxu0 %v5279_v0  ;;  %v4385_v52 = vpack.c.bf16 %v988_v50, %v987_v49  ;;  %v974_v60 = vld [vmem:[#allocation14 + $0x48] sm:$0xff]  ;;  %v991_v61 = vld [vmem:[#allocation14 + $0xd0] sm:$0xff]  ;;  %v880_v49 = vld [vmem:[#allocation13] sm:$0xff] }
 0x15f   :  { %4302 = vmatprep.subr.bf16.mxu0 %v4301_v53  ;;  %v971_v53 = vld [vmem:[#allocation14 + $0x30] sm:$0xff]  ;;  %v994_v7 = vld [vmem:[#allocation14 + $0xe8] sm:$0xff]  ;;  %v1100_v50 = vld [vmem:[#allocation14 + $0x180] sm:$0xff] }
 0x160   :  { %v4387_v57 = vpack.c.bf16 %v972_v54, %v971_v53  ;;  %v1084_v54 = vld [vmem:[#allocation14 + $0x100] sm:$0xff] }
 0x161   :  { %3749 = vmatmul.mubr.msk.f32.gmra.mrb[4].mxu0 %vm523_vm1, %v5641_v3  ;;  %v4311_v3 = vpack.c.bf16 %v729_v6, %v727_v4  ;;  %v976_v4 = vld [vmem:[#allocation14 + $0x58] sm:$0xff]  ;;  %v993_v6 = vld [vmem:[#allocation14 + $0xe0] sm:$0xff] }
 0x162   :  { %4304 = vmatpush1.bf16.msra.mxu0 %v4303_v58  ;;  %618 = vmatprep.mubr.f32.mxu0 %v5279_v0  ;;  %v4389_v58 = vpack.c.bf16 %v990_v56, %v989_v55  ;;  %v1085_v55 = vld [vmem:[#allocation14 + $0x108] sm:$0xff]  ;;  %v1102_v56 = vld [vmem:[#allocation14 + $0x190] sm:$0xff] }
 0x163   :  { %4306 = vmatprep.subr.bf16.mxu0 %v4305_v59  ;;  %v973_v59 = vld [vmem:[#allocation14 + $0x40] sm:$0xff] }
 0x164   :  { %v4391_v63 = vpack.c.bf16 %v974_v60, %v973_v59  ;;  %v4343_v59 = vpack.c.bf16 %v1085_v55, %v1084_v54 }
 0x165   :  { %3750 = vmatmul.mubr.msk.f32.gmra.mrb[6].mxu0 %vm523_vm1, %v5645_v5  ;;  %v4315_v5 = vpack.c.bf16 %v733_v12, %v731_v11  ;;  %v995_v11 = vld [vmem:[#allocation14 + $0xf0] sm:$0xff]  ;;  %v996_v12 = vld [vmem:[#allocation14 + $0xf8] sm:$0xff] }
 0x166   :  { %4308 = vmatpush1.bf16.msra.mxu0 %v4307_v62  ;;  %701 = vmatprep.mubr.f32.mxu0 %v5279_v0  ;;  %v992_v62 = vld [vmem:[#allocation14 + $0xd8] sm:$0xff]  ;;  %v4401_v14 = vpack.c.bf16 %v996_v12, %v995_v11  ;;  %v1090_v12 = vld [vmem:[#allocation14 + $0x130] sm:$0xff] }
 0x167   :  { %4310 = vmatprep.subr.bf16.mxu0 %v4309_v2  ;;  %v4393_v1 = vpack.c.bf16 %v992_v62, %v991_v61  ;;  %v975_v2 = vld [vmem:[#allocation14 + $0x50] sm:$0xff]  ;;  %v1087_v62 = vld [vmem:[#allocation14 + $0x118] sm:$0xff] }
 0x168   :  { %v4395_v8 = vpack.c.bf16 %v976_v4, %v975_v2  ;;  %v1086_v61 = vld [vmem:[#allocation14 + $0x110] sm:$0xff]  ;;  %v999_v2 = vld [vmem:[#allocation13 + $0x18] sm:$0xff] }
 0x169   :  { %v4347_v4 = vpack.c.bf16 %v1087_v62, %v1086_v61 }
 0x222   :  { %v4173_v9 = vpop.f32.mrb[0].mxu1 }
 0x223   :  { %v369_v13 = vpop.f32.mrb[1].mxu1 }
 0x224   :  { %3751 = vmatmul.mubr.msk.f32.vlgmr.msra.gmra.mrb[0].mxu0 %vm523_vm1, %v369_v13 }
 0x225   :  { %4312 = vmatpush1.bf16.msra.mxu0 %v4311_v3  ;;  %707 = vmatprep.mubr.f32.mxu0 %v5279_v0  ;;  %v4397_v3 = vpack.c.bf16 %v994_v7, %v993_v6  ;;  %v1088_v7 = vld [vmem:[#allocation14 + $0x120] sm:$0xff] }
 0x226   :  { %4314 = vmatprep.subr.bf16.mxu0 %v4313_v10  ;;  %v4176_v16 = vpop.f32.mrb[2].mxu1  ;;  %v978_v10 = vld [vmem:[#allocation14 + $0x68] sm:$0xff] }
 0x227   :  { %v379_v20 = vpop.f32.mrb[3].mxu1 }
 0x228   :  { %3752 = vmatmul.mubr.msk.f32.gmra.mrb[2].mxu0 %vm523_vm1, %v4173_v9  ;;  %v977_v9 = vld [vmem:[#allocation14 + $0x60] sm:$0xff] }
 0x229   :  { %4316 = vmatpush1.bf16.msra.mxu0 %v4315_v5  ;;  %713 = vmatprep.mubr.f32.mxu0 %v5279_v0  ;;  %v4399_v13 = vpack.c.bf16 %v978_v10, %v977_v9  ;;  %v855_v5 = vshrl.u32 %v854_v15, 7  ;;  %v1107_v9 = vld [vmem:[#allocation14 + $0x1b8] sm:$0xff]  ;;  %v1109_v15 = vld [vmem:[#allocation14 + $0x1c8] sm:$0xff] }
 0x22a   :  { %4318 = vmatprep.subr.bf16.mxu0 %v4317_v17  ;;  %v4187_v25 = vpop.f32.mrb[4].mxu1  ;;  %v852_v17 = vld [vmem:[#allocation11] sm:$0x3] }
 0x22b   :  { %v471_v28 = vpop.f32.mrb[5].mxu1  ;;  %v5687_v18 = vsub.s32 1, %v855_v5 }
 0x22c   :  { %3753 = vmatmul.mubr.msk.f32.gmra.mrb[4].mxu0 %vm523_vm1, %v379_v20 }
 0x22d   :  { %4320 = vmatpush1.bf16.msra.mxu0 %v4319_v23  ;;  %719 = vmatprep.mubr.f32.mxu0 %v5279_v0  ;;  %v861_v21 = vrot.slane %v852_v17, %v5687_v18 }
 0x22e   :  { %4322 = vmatprep.subr.bf16.mxu0 %v4321_v24  ;;  %v4190_v30 = vpop.f32.mrb[6].mxu1 }
 0x22f   :  { %v481_v31 = vpop.f32.mrb[7].mxu1 }
 0x230   :  { %3754 = vmatmul.mubr.msk.f32.gmra.mrb[6].mxu0 %vm523_vm1, %v4176_v16  ;;  %v5685_v16 = vsub.s32 0, %v855_v5 }
 0x231   :  { %4324 = vmatpush1.bf16.msra.mxu0 %v4323_v29  ;;  %819 = vmatprep.mubr.f32.mxu0 %v5279_v0 }
 0x232   :  { %4374 = vmatprep.subr.bf16.mxu0 %v4373_v35  ;;  %v857_v19 = vrot.slane %v852_v17, %v5685_v16 }
 0x234   :  { %3755 = vmatmul.mubr.msk.f32.vlgmr.msra.gmra.mrb[0].mxu0 %vm523_vm1, %v471_v28 }
 0x235   :  { %825 = vmatprep.mubr.f32.mxu0 %v5279_v0  ;;  %4376 = vmatpush3.bf16.msra.mxu0 %v4375_v39 }
 0x236   :  { %4378 = vmatprep.subr.bf16.mxu0 %v4377_v40 }
 0x238   :  { %3756 = vmatmul.mubr.msk.f32.gmra.mrb[2].mxu0 %vm523_vm1, %v4187_v25 }
 0x239   :  { %831 = vmatprep.mubr.f32.mxu0 %v5279_v0  ;;  %4380 = vmatpush3.bf16.msra.mxu0 %v4379_v45 }
 0x23a   :  { %4382 = vmatprep.subr.bf16.mxu0 %v4381_v46 }
 0x23c   :  { %3757 = vmatmul.mubr.msk.f32.gmra.mrb[4].mxu0 %vm523_vm1, %v481_v31 }
 0x23d   :  { %837 = vmatprep.mubr.f32.mxu0 %v5279_v0  ;;  %4384 = vmatpush3.bf16.msra.mxu0 %v4383_v51  ;;  %v1101_v51 = vld [vmem:[#allocation14 + $0x188] sm:$0xff] }
 0x23e   :  { %4386 = vmatprep.subr.bf16.mxu0 %v4385_v52  ;;  %v881_v52 = vld [vmem:[#allocation13 + $0x8] sm:$0xff]  ;;  %v4341_v53 = vpack.c.bf16 %v1101_v51, %v1100_v50  ;;  %v5698_v51 = vld [vmem:[#allocation16] sm:$0xff] }
 0x240   :  { %3758 = vmatmul.mubr.msk.f32.gmra.mrb[6].mxu0 %vm523_vm1, %v4190_v30 }
 0x241   :  { %4388 = vmatpush3.bf16.msra.mxu0 %v4387_v57  ;;  %v1103_v57 = vld [vmem:[#allocation14 + $0x198] sm:$0xff] }
 0x242   :  { %4390 = vmatprep.subr.bf16.mxu0 %v4389_v58  ;;  %v998_v58 = vld [vmem:[#allocation13 + $0x10] sm:$0xff]  ;;  %v4345_v60 = vpack.c.bf16 %v1103_v57, %v1102_v56 }
 0x245   :  { %4392 = vmatpush3.bf16.msra.mxu0 %v4391_v63  ;;  %v1104_v63 = vld [vmem:[#allocation14 + $0x1a0] sm:$0xff] }
 0x246   :  { %4394 = vmatprep.subr.bf16.mxu0 %v4393_v1  ;;  %v1105_v1 = vld [vmem:[#allocation14 + $0x1a8] sm:$0xff] }
 0x247   :  { %v4349_v6 = vpack.c.bf16 %v1105_v1, %v1104_v63  ;;  %v3763_v63 = vld [vmem:[#allocation26] ss:$0 sm:$0xff] }
 0x249   :  { %4396 = vmatpush3.bf16.msra.mxu0 %v4395_v8  ;;  %v1089_v8 = vld [vmem:[#allocation14 + $0x128] sm:$0xff] }
 0x24a   :  { %4398 = vmatprep.subr.bf16.mxu0 %v4397_v3  ;;  %v1106_v3 = vld [vmem:[#allocation14 + $0x1b0] sm:$0xff]  ;;  %v4351_v10 = vpack.c.bf16 %v1089_v8, %v1088_v7 }
 0x24b   :  { %v4353_v11 = vpack.c.bf16 %v1107_v9, %v1106_v3 }
 0x24d   :  { %4400 = vmatpush3.bf16.msra.mxu0 %v4399_v13  ;;  %v1091_v13 = vld [vmem:[#allocation14 + $0x138] sm:$0xff] }
 0x24e   :  { %4402 = vmatprep.subr.bf16.mxu0 %v4401_v14  ;;  %v1108_v14 = vld [vmem:[#allocation14 + $0x1c0] sm:$0xff]  ;;  %v4355_v5 = vpack.c.bf16 %v1091_v13, %v1090_v12  ;;  %v5704_v12 = vld [vmem:[#allocation16 + $0x8] sm:$0xff]  ;;  %v5706_v13 = vld [vmem:[#allocation16 + $0x10] sm:$0xff] }
 0x24f   :  { %v4357_v17 = vpack.c.bf16 %v1109_v15, %v1108_v14  ;;  %v1443_v15 = vld [vmem:[#allocation17] sm:$0xff] }
 0x307   :  { %v821_v20 = vpop.f32.mrb[0].mxu0 }
 0x308   :  { %v823_v22 = vpop.f32.mrb[1].mxu0  ;;  %v864_v23 = vadd.f32 %v857_v19, %v821_v20  ;;  %v1093_v20 = vld [vmem:[#allocation14 + $0x148] sm:$0xff] }
 0x309   :  { %v865_v24 = vadd.f32 %v861_v21, %v823_v22  ;;  %v1111_v22 = vld [vmem:[#allocation14 + $0x1d8] sm:$0xff] }
 0x30a   :  { %v872_v29 = vmax.f32 %v864_v23, 0.0 }
 0x30b   :  { %v827_v25 = vpop.f32.mrb[2].mxu0  ;;  %v873_v31 = vmax.f32 %v865_v24, 0.0 }
 0x30c   :  { %v866_v26 = vadd.f32 %v857_v19, %v827_v25  ;;  %v829_v27 = vpop.f32.mrb[3].mxu0  ;;  %v1094_v25 = vld [vmem:[#allocation14 + $0x150] sm:$0xff] }
 0x30d   :  { %v867_v28 = vadd.f32 %v861_v21, %v829_v27  ;;  %v979_v27 = vld [vmem:[#allocation14 + $0x70] sm:$0xff] }
 0x30e   :  { %v874_v30 = vmax.f32 %v866_v26, 0.0  ;;  %v1095_v26 = vld [vmem:[#allocation14 + $0x158] sm:$0xff] }
 0x30f   :  { %v875_v32 = vmax.f32 %v867_v28, 0.0  ;;  %v833_v33 = vpop.f32.mrb[4].mxu0  ;;  %v4363_v28 = vpack.c.bf16 %v1095_v26, %v1094_v25 }
 0x310   :  { %v4327_v34 = vpack.c.bf16 %v874_v30, %v872_v29  ;;  %v835_v35 = vpop.f32.mrb[5].mxu0  ;;  %v868_v37 = vadd.f32 %v857_v19, %v833_v33  ;;  %v980_v29 = vld [vmem:[#allocation14 + $0x78] sm:$0xff] }
 0x311   :  { %v4325_v36 = vpack.c.bf16 %v875_v32, %v873_v31  ;;  %v869_v38 = vadd.f32 %v861_v21, %v835_v35  ;;  %v4403_v30 = vpack.c.bf16 %v980_v29, %v979_v27  ;;  %v1112_v31 = vld [vmem:[#allocation14 + $0x1e0] sm:$0xff]  ;;  %v1113_v32 = vld [vmem:[#allocation14 + $0x1e8] sm:$0xff] }
 0x312   :  { %v876_v43 = vmax.f32 %v868_v37, 0.0  ;;  %v4365_v33 = vpack.c.bf16 %v1113_v32, %v1112_v31  ;;  %v1097_v35 = vld [vmem:[#allocation14 + $0x168] sm:$0xff]  ;;  %v1114_v37 = vld [vmem:[#allocation14 + $0x1f0] sm:$0xff]  ;;  %v5724_v27 = vld [vmem:[#allocation5] sm:$0xff] }
 0x313   :  { %v839_v39 = vpop.f32.mrb[6].mxu0  ;;  %4326 = vmatprep.subr.bf16.mxu1 %v4325_v36  ;;  %v877_v45 = vmax.f32 %v869_v38, 0.0  ;;  %4404 = vmatpush3.bf16.msra.mxu0 %v4403_v30  ;;  %v1115_v38 = vld [vmem:[#allocation14 + $0x1f8] sm:$0xff] }
 0x314   :  { %v870_v40 = vadd.f32 %v857_v19, %v839_v39  ;;  %v841_v41 = vpop.f32.mrb[7].mxu0  ;;  %4328 = vmatpush1.bf16.msra.mxu1 %v4327_v34  ;;  %v1092_v19 = vld [vmem:[#allocation14 + $0x140] sm:$0xff]  ;;  %v4369_v39 = vpack.c.bf16 %v1115_v38, %v1114_v37  ;;  %v3774_v30 = vld [vmem:[#allocation26 + $0x1] ss:$0 sm:$0xff] }
 0x315   :  { %v871_v42 = vadd.f32 %v861_v21, %v841_v41  ;;  %v1110_v21 = vld [vmem:[#allocation14 + $0x1d0] sm:$0xff]  ;;  %v4359_v23 = vpack.c.bf16 %v1093_v20, %v1092_v19  ;;  %v1099_v41 = vld [vmem:[#allocation14 + $0x178] sm:$0xff]  ;;  %v1611_v20 = vld [vmem:[#allocation17 + $0x20] sm:$0xff] }
 0x316   :  { %v878_v44 = vmax.f32 %v870_v40, 0.0  ;;  %v4361_v24 = vpack.c.bf16 %v1111_v22, %v1110_v21  ;;  %v1098_v40 = vld [vmem:[#allocation14 + $0x170] sm:$0xff]  ;;  %v1612_v21 = vld [vmem:[#allocation17 + $0x28] sm:$0xff]  ;;  %v1863_v38 = vld [vmem:[#allocation19 + $0x28] sm:$0xff] }
 0x317   :  { %v879_v46 = vmax.f32 %v871_v42, 0.0  ;;  %v4371_v42 = vpack.c.bf16 %v1099_v41, %v1098_v40  ;;  %v4421_v22 = vpack.c.bf16 %v1612_v21, %v1611_v20  ;;  %v1862_v41 = vld [vmem:[#allocation19 + $0x20] sm:$0xff] }
 0x318   :  { %v4331_v47 = vpack.c.bf16 %v878_v44, %v876_v43  ;;  %v2594_v21 = vld [vmem:[#allocation22 + $0x60] sm:$0xff] }
 0x319   :  { %v4329_v48 = vpack.c.bf16 %v879_v46, %v877_v45 }
 0x31b   :  { %4330 = vmatprep.subr.bf16.mxu1 %v4329_v48 }
 0x31c   :  { %4332 = vmatpush1.bf16.msra.mxu1 %v4331_v47 }
 0x31d   :  { %4334 = vmatprep.subr.bf16.mxu1 %v4325_v36 }
 0x31f   :  { %3759 = vmatmul.mubr.msk.f32.vlgmr.msra.gmra.mrb[8].mxu1 %vm290_vm0, %v880_v49 }
 0x320   :  { %4336 = vmatpush1.bf16.msra.mxu1 %v4327_v34  ;;  %958 = vmatprep.mubr.f32.mxu1 %v5279_v0  ;;  %v1096_v34 = vld [vmem:[#allocation14 + $0x160] sm:$0xff] }
 0x321   :  { %4338 = vmatprep.subr.bf16.mxu1 %v4329_v48  ;;  %v4367_v36 = vpack.c.bf16 %v1097_v35, %v1096_v34 }
 0x323   :  { %3760 = vmatmul.mubr.msk.f32.gmra.mrb[10].mxu1 %vm290_vm0, %v881_v52 }
 0x324   :  { %4340 = vmatpush1.bf16.msra.mxu1 %v4331_v47  ;;  %1070 = vmatprep.mubr.f32.mxu1 %v5279_v0 }
 0x325   :  { %4342 = vmatprep.subr.bf16.mxu1 %v4341_v53 }
 0x327   :  { %3761 = vmatmul.mubr.msk.f32.vlgmr.msra.gmra.mrb[12].mxu1 %vm290_vm0, %v998_v58 }
 0x328   :  { %1076 = vmatprep.mubr.f32.mxu1 %v5279_v0  ;;  %4344 = vmatpush3.bf16.msra.mxu1 %v4343_v59 }
 0x329   :  { %4346 = vmatprep.subr.bf16.mxu1 %v4345_v60 }
 0x32b   :  { %3762 = vmatmul.mubr.msk.f32.gmra.mrb[14].mxu1 %vm290_vm0, %v999_v2 }
 0x32c   :  { %4348 = vmatpush3.bf16.msra.mxu1 %v4347_v4 }
 0x32d   :  { %4350 = vmatprep.subr.bf16.mxu1 %v4349_v6 }
 0x330   :  { %4352 = vmatpush3.bf16.msra.mxu1 %v4351_v10  ;;  %v1446_v10 = vld [vmem:[#allocation17 + $0x10] sm:$0xff] }
 0x331   :  { %4354 = vmatprep.subr.bf16.mxu1 %v4353_v11  ;;  %v1447_v11 = vld [vmem:[#allocation17 + $0x18] sm:$0xff] }
 0x332   :  { %v4413_v14 = vpack.c.bf16 %v1447_v11, %v1446_v10  ;;  %v2590_v11 = vld [vmem:[#allocation22 + $0x40] sm:$0xff] }
 0x334   :  { %4356 = vmatpush3.bf16.msra.mxu1 %v4355_v5  ;;  %v1444_v5 = vld [vmem:[#allocation17 + $0x8] sm:$0xff] }
 0x335   :  { %4358 = vmatprep.subr.bf16.mxu1 %v4357_v17  ;;  %v5712_v17 = vld [vmem:[#allocation16 + $0x18] sm:$0xff]  ;;  %v4417_v19 = vpack.c.bf16 %v1444_v5, %v1443_v15  ;;  %v2597_v5 = vld [vmem:[#allocation22 + $0x78] sm:$0xff] }
 0x336   :  { %v2595_v15 = vld [vmem:[#allocation22 + $0x68] sm:$0xff] }
 0x337   :  { %v4477_v20 = vpack.c.bf16 %v2597_v5, %v2595_v15  ;;  %v2626_v5 = vld [vmem:[#allocation22 + $0x160] sm:$0xff] }
 0x338   :  { %4360 = vmatpush3.bf16.msra.mxu1 %v4359_v23 }
 0x339   :  { %4362 = vmatprep.subr.bf16.mxu1 %v4361_v24 }
 0x33c   :  { %4364 = vmatpush3.bf16.msra.mxu1 %v4363_v28  ;;  %v5726_v28 = vld [vmem:[#allocation5 + $0x8] sm:$0xff] }
 0x33d   :  { %4366 = vmatprep.subr.bf16.mxu1 %v4365_v33  ;;  %v4445_v29 = vpack.c.bf16 %v5726_v28, %v5724_v27 }
 0x33f   :  { %4446 = vmatprep.subr.bf16.mxu0 %v4445_v29 }
 0x340   :  { %4368 = vmatpush3.bf16.msra.mxu1 %v4367_v36 }
 0x341   :  { %4370 = vmatprep.subr.bf16.mxu1 %v4369_v39  ;;  %v1865_v39 = vld [vmem:[#allocation19 + $0x38] sm:$0xff] }
 0x342   :  { %v4433_v40 = vpack.c.bf16 %v1865_v39, %v1863_v38  ;;  %v2609_v38 = vld [vmem:[#allocation22 + $0xd8] sm:$0xff] }
 0x344   :  { %4372 = vmatpush3.bf16.msra.mxu1 %v4371_v42  ;;  %v1864_v42 = vld [vmem:[#allocation19 + $0x30] sm:$0xff] }
 0x3f2   :  { %v954_v43 = vpop.f32.mrb[8].mxu1 }
 0x3f3   :  { %v956_v44 = vpop.f32.mrb[9].mxu1 }
 0x3f4   :  { %1255 = vmatprep.mubr.f32.mxu0 %v956_v44  ;;  %v1860_v44 = vld [vmem:[#allocation19 + $0x18] sm:$0xff] }
 0x3f5   :  { %1256 = vmatmul.mubr.f32.vlgmr.msra.gmra.mrb[8].mxu0 %v954_v43  ;;  %v1858_v43 = vld [vmem:[#allocation19 + $0x8] sm:$0xff] }
 0x3f6   :  { %v960_v45 = vpop.f32.mrb[10].mxu1  ;;  %4448 = vmatpush3.bf16.msra.mxu0 %v4445_v29 }
 0x3f7   :  { %v962_v46 = vpop.f32.mrb[11].mxu1  ;;  %4450 = vmatprep.subr.bf16.mxu0 %v4445_v29 }
 0x3f8   :  { %1260 = vmatprep.mubr.f32.mxu0 %v962_v46  ;;  %v4437_v46 = vpack.c.bf16 %v1860_v44, %v1858_v43  ;;  %v2611_v43 = vld [vmem:[#allocation22 + $0xe8] sm:$0xff]  ;;  %v2613_v44 = vld [vmem:[#allocation22 + $0xf8] sm:$0xff] }
 0x3f9   :  { %1261 = vmatmul.mubr.f32.gmra.mrb[10].mxu0 %v960_v45  ;;  %v4435_v45 = vpack.c.bf16 %v1864_v42, %v1862_v41  ;;  %v2606_v41 = vld [vmem:[#allocation22 + $0xc0] sm:$0xff]  ;;  %v2608_v42 = vld [vmem:[#allocation22 + $0xd0] sm:$0xff] }
 0x3fa   :  { %v1072_v47 = vpop.f32.mrb[12].mxu1  ;;  %4244 = vmatprep.mubr.msk.f32.mxu0 %vm1277_vm2, %v5698_v51 }
 0x3fb   :  { %v1074_v48 = vpop.f32.mrb[13].mxu1 }
 0x3fc   :  { %1180 = vmatprep.mubr.f32.mxu1 %v1074_v48  ;;  %v1859_v48 = vld [vmem:[#allocation19 + $0x10] sm:$0xff] }
 0x3fd   :  { %1181 = vmatmul.mubr.f32.vlgmr.msra.gmra.mrb[16].mxu1 %v1072_v47  ;;  %4245 = vmatmul.mubr.msk.f32.vlgmr.msra.gmra.mrb[12].mxu0 %vm1277_vm2, %v5704_v12  ;;  %v1857_v47 = vld [vmem:[#allocation19] sm:$0xff] }
 0x3fe   :  { %v1078_v49 = vpop.f32.mrb[14].mxu1  ;;  %4452 = vmatpush3.bf16.msra.mxu0 %v4445_v29  ;;  %4251 = vmatprep.mubr.msk.f32.mxu0 %vm1277_vm2, %v5706_v13  ;;  %v2598_v29 = vld [vmem:[#allocation22 + $0x80] sm:$0xff] }
 0x3ff   :  { %v1080_v50 = vpop.f32.mrb[15].mxu1 }
 0x400   :  { %1185 = vmatprep.mubr.f32.mxu1 %v1080_v50  ;;  %v2034_v50 = vld [vmem:[#allocation19 + $0x48] sm:$0xff] }
 0x401   :  { %1186 = vmatmul.mubr.f32.gmra.mrb[18].mxu1 %v1078_v49  ;;  %4252 = vmatmul.mubr.msk.f32.vlgmr.msra.gmra.mrb[14].mxu0 %vm1277_vm2, %v5712_v17  ;;  %v4439_v49 = vpack.c.bf16 %v1859_v48, %v1857_v47  ;;  %v2610_v47 = vld [vmem:[#allocation22 + $0xe0] sm:$0xff]  ;;  %v2612_v48 = vld [vmem:[#allocation22 + $0xf0] sm:$0xff] }
 0x402   :  { %4195 = vmatprep.mubr.msk.f32.mxu1 %vm1277_vm2, %v5698_v51 }
 0x4c8   :  { %v3890_v52 = vpop.f32.mrb[8].mxu0 }
 0x4c9   :  { %v3891_v53 = vpop.f32.mrb[9].mxu0 }
 0x4ca   :  { %v3892_v54 = vadd.f32 %v3891_v53, %v3890_v52  ;;  %v2036_v52 = vld [vmem:[#allocation19 + $0x58] sm:$0xff] }
 0x4cb   :  { %v4441_v53 = vpack.c.bf16 %v2036_v52, %v2034_v50  ;;  %v2617_v50 = vld [vmem:[#allocation22 + $0x118] sm:$0xff]  ;;  %v4495_v52 = vpack.c.bf16 %v2612_v48, %v2610_v47  ;;  %v2275_v47 = vld [vmem:[#allocation20 + $0x8] sm:$0xff] }
 0x4cc   :  { %v3893_v55 = vpop.f32.mrb[10].mxu0  ;;  %v2277_v48 = vld [vmem:[#allocation20 + $0x18] sm:$0xff] }
 0x4cd   :  { %v3894_v56 = vpop.f32.mrb[11].mxu0 }
 0x4ce   :  { %v3895_v57 = vadd.f32 %v3894_v56, %v3893_v55 }
 0x4d0   :  { %v3852_v58 = vpop.f32.mrb[16].mxu1 }
 0x4d1   :  { %v3853_v59 = vpop.f32.mrb[17].mxu1 }
 0x4d2   :  { %v3854_v60 = vadd.f32 %v3853_v59, %v3852_v58  ;;  %v2583_v58 = vld [vmem:[#allocation22 + $0x8] sm:$0xff]  ;;  %v2585_v59 = vld [vmem:[#allocation22 + $0x18] sm:$0xff] }
 0x4d4   :  { %v1258_v61 = vadd.f32 %v3892_v54, %v3854_v60  ;;  %v3855_v62 = vpop.f32.mrb[18].mxu1  ;;  %v5747_v54 = vpop.f32.mrb[12].mxu0  ;;  %v2582_v60 = vld [vmem:[#allocation22] sm:$0xff] }
 0x4d5   :  { %v3856_v1 = vpop.f32.mrb[19].mxu1  ;;  %v5749_v55 = vpop.f32.mrb[13].mxu0 }
 0x4d6   :  { %v3857_v2 = vadd.f32 %v3856_v1, %v3855_v62  ;;  %v1271_v4 = vadd.f32 %v3763_v63, %v1258_v61  ;;  %v5751_v56 = vpop.f32.mrb[14].mxu0  ;;  %v4465_v61 = vpack.c.bf16 %v2585_v59, %v2583_v58  ;;  %v2584_v62 = vld [vmem:[#allocation22 + $0x10] sm:$0xff]  ;;  %v2589_v1 = vld [vmem:[#allocation22 + $0x38] sm:$0xff]  ;;  %v2614_v58 = vld [vmem:[#allocation22 + $0x100] sm:$0xff] }
 0x4d7   :  { %v2616_v59 = vld [vmem:[#allocation22 + $0x110] sm:$0xff] }
 0x4d8   :  { %v1263_v6 = vadd.f32 %v3895_v57, %v3857_v2  ;;  %v1273_v8 = vmax.f32 %v1271_v4, 0.0  ;;  %v5753_v57 = vpop.f32.mrb[15].mxu0  ;;  %v4467_v2 = vpack.c.bf16 %v2584_v62, %v2582_v60  ;;  %4466 = vmatprep.subr.bf16.mxu0 %v4465_v61  ;;  %v2619_v60 = vld [vmem:[#allocation22 + $0x128] sm:$0xff]  ;;  %v2621_v61 = vld [vmem:[#allocation22 + $0x138] sm:$0xff]  ;;  %v4499_v62 = vpack.c.bf16 %v2616_v59, %v2614_v58 }
 0x4d9   :  { %v2451_v58 = vld [vmem:[#allocation20 + $0x48] sm:$0xff]  ;;  %v2453_v59 = vld [vmem:[#allocation20 + $0x58] sm:$0xff] }
 0x4da   :  { %v1272_v7 = vadd.f32 %v3763_v63, %v1263_v6  ;;  %v2587_v63 = vld [vmem:[#allocation22 + $0x28] sm:$0xff]  ;;  %v2586_v6 = vld [vmem:[#allocation22 + $0x20] sm:$0xff]  ;;  %4468 = vmatpush1.bf16.msra.mxu0 %v4467_v2  ;;  %v2620_v2 = vld [vmem:[#allocation22 + $0x130] sm:$0xff] }
 0x4db   :  { %v4469_v4 = vpack.c.bf16 %v2589_v1, %v2587_v63  ;;  %v4501_v63 = vpack.c.bf16 %v2621_v61, %v2619_v60  ;;  %v2618_v1 = vld [vmem:[#allocation22 + $0x120] sm:$0xff]  ;;  %v4461_v61 = vpack.c.bf16 %v2453_v59, %v2451_v58  ;;  %v2916_v58 = vld [vmem:[#allocation23 + $0x28] sm:$0xff]  ;;  %v2933_v59 = vld [vmem:[#allocation23 + $0xb0] sm:$0xff] }
 0x4dc   :  { %v1274_v3 = vmax.f32 %v1272_v7, 0.0  ;;  %v2588_v7 = vld [vmem:[#allocation22 + $0x30] sm:$0xff] }
 0x4dd   :  { %4470 = vmatprep.subr.bf16.mxu0 %v4469_v4  ;;  %v2623_v4 = vld [vmem:[#allocation22 + $0x148] sm:$0xff] }
 0x4de   :  { %v4405_v9 = vpack.c.bf16 %v1274_v3, %v1273_v8 }
 0x4e0   :  { %4406 = vmatprep.subr.bf16.mxu1 %v4405_v9 }
 0x4e1   :  { %4408 = vmatpush3.bf16.msra.mxu1 %v4405_v9 }
 0x4e2   :  { %4410 = vmatprep.subr.bf16.mxu1 %v4405_v9 }
 0x4e4   :  { %4196 = vmatmul.mubr.msk.f32.vlgmr.msra.gmra.mrb[20].mxu1 %vm1277_vm2, %v5704_v12 }
 0x4e5   :  { %4412 = vmatpush3.bf16.msra.mxu1 %v4405_v9  ;;  %4202 = vmatprep.mubr.msk.f32.mxu1 %vm1277_vm2, %v5706_v13  ;;  %v4471_v9 = vpack.c.bf16 %v2588_v7, %v2586_v6  ;;  %v2625_v6 = vld [vmem:[#allocation22 + $0x158] sm:$0xff]  ;;  %v4503_v7 = vpack.c.bf16 %v2620_v2, %v2618_v1  ;;  %v2638_v2 = vld [vmem:[#allocation22 + $0x1c0] sm:$0xff] }
 0x4e6   :  { %4414 = vmatprep.subr.bf16.mxu1 %v4413_v14 }
 0x4e7   :  { %4472 = vmatpush1.bf16.msra.mxu0 %v4471_v9  ;;  %v2624_v9 = vld [vmem:[#allocation22 + $0x150] sm:$0xff] }
 0x4e8   :  { %4203 = vmatmul.mubr.msk.f32.vlgmr.msra.gmra.mrb[22].mxu1 %vm1277_vm2, %v5712_v17 }
 0x4e9   :  { %4416 = vmatpush3.bf16.msra.mxu1 %v4413_v14  ;;  %4209 = vmatprep.mubr.msk.f32.mxu1 %vm1277_vm2, %v1273_v8  ;;  %v2591_v8 = vld [vmem:[#allocation22 + $0x48] sm:$0xff]  ;;  %v2592_v14 = vld [vmem:[#allocation22 + $0x50] sm:$0xff] }
 0x4ea   :  { %4418 = vmatprep.subr.bf16.mxu1 %v4417_v19 }
 0x4ec   :  { %4210 = vmatmul.mubr.msk.f32.vlgmr.msra.gmra.mrb[24].mxu1 %vm1277_vm2, %v1274_v3  ;;  %v2593_v3 = vld [vmem:[#allocation22 + $0x58] sm:$0xff] }
 0x4ed   :  { %4420 = vmatpush3.bf16.msra.mxu1 %v4417_v19  ;;  %v4473_v10 = vpack.c.bf16 %v2593_v3, %v2591_v8  ;;  %v4475_v19 = vpack.c.bf16 %v2592_v14, %v2590_v11  ;;  %v4505_v8 = vpack.c.bf16 %v2625_v6, %v2623_v4  ;;  %v2622_v3 = vld [vmem:[#allocation22 + $0x140] sm:$0xff]  ;;  %v2629_v11 = vld [vmem:[#allocation22 + $0x178] sm:$0xff]  ;;  %v2640_v4 = vld [vmem:[#allocation22 + $0x1d0] sm:$0xff] }
 0x4ee   :  { %4422 = vmatprep.subr.bf16.mxu1 %v4421_v22  ;;  %v4507_v14 = vpack.c.bf16 %v2624_v9, %v2622_v3  ;;  %v4523_v6 = vpack.c.bf16 %v2640_v4, %v2638_v2  ;;  %v2642_v3 = vld [vmem:[#allocation22 + $0x1e0] sm:$0xff] }
 0x4ef   :  { %4474 = vmatprep.subr.bf16.mxu0 %v4473_v10  ;;  %v2627_v10 = vld [vmem:[#allocation22 + $0x168] sm:$0xff]  ;;  %v2919_v4 = vld [vmem:[#allocation23 + $0x40] sm:$0xff] }
 0x4f0   :  { %4476 = vmatpush1.bf16.msra.mxu0 %v4475_v19  ;;  %v4509_v15 = vpack.c.bf16 %v2629_v11, %v2627_v10  ;;  %v2628_v19 = vld [vmem:[#allocation22 + $0x170] sm:$0xff]  ;;  %v2545_v10 = vld [vmem:[#allocation25] ss:$4 sm:$0x3] }
 0x4f1   :  { %4478 = vmatprep.subr.bf16.mxu0 %v4477_v20  ;;  %v2631_v20 = vld [vmem:[#allocation22 + $0x188] sm:$0xff]  ;;  %v2550_v11 = vrot.slane %v2545_v10, %v5685_v16 }
 0x5b7   :  { %v4197_v23 = vpop.f32.mrb[20].mxu1 }
 0x5b8   :  { %v1350_v24 = vpop.f32.mrb[21].mxu1 }
 0x5b9   :  { %4216 = vmatprep.mubr.msk.f32.mxu1 %vm1277_vm2, %v1350_v24  ;;  %v2601_v24 = vld [vmem:[#allocation22 + $0x98] sm:$0xff] }
 0x5ba   :  { %4217 = vmatmul.mubr.msk.f32.vlgmr.msra.gmra.mrb[24].mxu1 %vm1277_vm2, %v4197_v23  ;;  %v2599_v23 = vld [vmem:[#allocation22 + $0x88] sm:$0xff] }
 0x5bb   :  { %v4204_v25 = vpop.f32.mrb[22].mxu1  ;;  %4424 = vmatpush3.bf16.msra.mxu1 %v4421_v22  ;;  %v2596_v22 = vld [vmem:[#allocation22 + $0x70] sm:$0xff] }
 0x5bc   :  { %v1434_v26 = vpop.f32.mrb[23].mxu1 }
 0x5bd   :  { %4223 = vmatprep.mubr.msk.f32.mxu1 %vm1277_vm2, %v1434_v26  ;;  %v4481_v26 = vpack.c.bf16 %v2601_v24, %v2599_v23  ;;  %v2630_v24 = vld [vmem:[#allocation22 + $0x180] sm:$0xff] }
 0x5c2   :  { %4224 = vmatmul.mubr.msk.f32.vlgmr.msra.gmra.mrb[24].mxu1 %vm1277_vm2, %v4204_v25  ;;  %v4479_v25 = vpack.c.bf16 %v2596_v22, %v2594_v21  ;;  %v2633_v21 = vld [vmem:[#allocation22 + $0x198] sm:$0xff]  ;;  %v4511_v22 = vpack.c.bf16 %v2628_v19, %v2626_v5 }
 0x5c3   :  { %4230 = vmatprep.mubr.msk.f32.mxu1 %vm1277_vm2, %v5698_v51  ;;  %v4513_v23 = vpack.c.bf16 %v2633_v21, %v2631_v20 }
 0x5c4   :  { %4480 = vmatpush1.bf16.msra.mxu0 %v4479_v25  ;;  %v2632_v25 = vld [vmem:[#allocation22 + $0x190] sm:$0xff] }
 0x5c5   :  { %4482 = vmatprep.subr.bf16.mxu0 %v4481_v26  ;;  %v2635_v26 = vld [vmem:[#allocation22 + $0x1a8] sm:$0xff] }
 0x695   :  { %v4225_v31 = vpop.f32.mrb[24].mxu1 }
 0x696   :  { %v1702_v32 = vadd.f32 %v4225_v31, %v3774_v30  ;;  %v1685_v33 = vpop.f32.mrb[25].mxu1  ;;  %v2603_v31 = vld [vmem:[#allocation22 + $0xa8] sm:$0xff] }
 0x697   :  { %v1701_v34 = vadd.f32 %v3774_v30, %v1685_v33  ;;  %v2600_v30 = vld [vmem:[#allocation22 + $0x90] sm:$0xff] }
 0x698   :  { %v1704_v35 = vmax.f32 %v1702_v32, 0.0  ;;  %v2605_v32 = vld [vmem:[#allocation22 + $0xb8] sm:$0xff]  ;;  %v4483_v33 = vpack.c.bf16 %v2600_v30, %v2598_v29  ;;  %v4515_v30 = vpack.c.bf16 %v2632_v25, %v2630_v24 }
 0x699   :  { %v1703_v36 = vmax.f32 %v1701_v34, 0.0  ;;  %v4485_v34 = vpack.c.bf16 %v2605_v32, %v2603_v31  ;;  %v2637_v29 = vld [vmem:[#allocation22 + $0x1b8] sm:$0xff]  ;;  %v2634_v32 = vld [vmem:[#allocation22 + $0x1a0] sm:$0xff] }
 0x69a   :  { %4484 = vmatpush1.bf16.msra.mxu0 %v4483_v33  ;;  %v4517_v31 = vpack.c.bf16 %v2637_v29, %v2635_v26  ;;  %v2636_v33 = vld [vmem:[#allocation22 + $0x1b0] sm:$0xff] }
 0x69b   :  { %v4425_v37 = vpack.c.bf16 %v1704_v35, %v1703_v36  ;;  %4486 = vmatprep.subr.bf16.mxu0 %v4485_v34  ;;  %v4519_v34 = vpack.c.bf16 %v2636_v33, %v2634_v32 }
 0x69d   :  { %4426 = vmatprep.subr.bf16.mxu1 %v4425_v37 }
 0x69e   :  { %4428 = vmatpush3.bf16.msra.mxu1 %v4425_v37 }
 0x69f   :  { %4430 = vmatprep.subr.bf16.mxu1 %v4425_v37 }
 0x6a1   :  { %4231 = vmatmul.mubr.msk.f32.vlgmr.msra.gmra.mrb[26].mxu1 %vm1277_vm2, %v5704_v12 }
 0x6a2   :  { %4432 = vmatpush3.bf16.msra.mxu1 %v4425_v37  ;;  %4237 = vmatprep.mubr.msk.f32.mxu1 %vm1277_vm2, %v5706_v13  ;;  %v2607_v37 = vld [vmem:[#allocation22 + $0xc8] sm:$0xff] }
 0x6a3   :  { %4434 = vmatprep.subr.bf16.mxu1 %v4433_v40  ;;  %v4489_v40 = vpack.c.bf16 %v2609_v38, %v2607_v37  ;;  %v2280_v37 = vld [vmem:[#allocation20 + $0x28] sm:$0xff]  ;;  %v2282_v38 = vld [vmem:[#allocation20 + $0x38] sm:$0xff] }
 0x6a5   :  { %4238 = vmatmul.mubr.msk.f32.vlgmr.msra.gmra.mrb[28].mxu1 %vm1277_vm2, %v5712_v17 }
 0x6a6   :  { %4436 = vmatpush1.bf16.msra.mxu1 %v4435_v45  ;;  %1936 = vmatprep.mubr.f32.mxu1 %v5279_v0  ;;  %v4491_v45 = vpack.c.bf16 %v2608_v42, %v2606_v41  ;;  %v4453_v41 = vpack.c.bf16 %v2282_v38, %v2280_v37  ;;  %v2927_v37 = vld [vmem:[#allocation23 + $0x80] sm:$0xff]  ;;  %v2928_v38 = vld [vmem:[#allocation23 + $0x88] sm:$0xff] }
 0x6a7   :  { %4438 = vmatprep.subr.bf16.mxu1 %v4437_v46  ;;  %v4493_v46 = vpack.c.bf16 %v2613_v44, %v2611_v43  ;;  %v2279_v44 = vld [vmem:[#allocation20 + $0x20] sm:$0xff] }
 0x6a9   :  { %3779 = vmatmul.mubr.msk.f32.vlgmr.msra.gmra.mrb[30].mxu1 %vm1277_vm2, %v1703_v36  ;;  %v2604_v36 = vld [vmem:[#allocation22 + $0xb0] sm:$0xff] }
 0x6aa   :  { %1942 = vmatprep.mubr.f32.mxu1 %v5279_v0  ;;  %4440 = vmatpush1.bf16.msra.mxu1 %v4439_v49  ;;  %v2615_v49 = vld [vmem:[#allocation22 + $0x108] sm:$0xff] }
 0x6ab   :  { %4442 = vmatprep.subr.bf16.mxu1 %v4441_v53  ;;  %v4497_v53 = vpack.c.bf16 %v2617_v50, %v2615_v49  ;;  %v4457_v50 = vpack.c.bf16 %v2277_v48, %v2275_v47  ;;  %v2914_v47 = vld [vmem:[#allocation23 + $0x18] sm:$0xff]  ;;  %v2931_v48 = vld [vmem:[#allocation23 + $0xa0] sm:$0xff] }
 0x6ad   :  { %3780 = vmatmul.mubr.msk.f32.gmra.mrb[32].mxu1 %vm1277_vm2, %v1704_v35  ;;  %v2602_v35 = vld [vmem:[#allocation22 + $0xa0] sm:$0xff] }
 0x6ae   :  { %2019 = vmatprep.mubr.f32.mxu1 %v5279_v0  ;;  %v4487_v39 = vpack.c.bf16 %v2604_v36, %v2602_v35  ;;  %v2033_v35 = vld [vmem:[#allocation19 + $0x40] sm:$0xff]  ;;  %v2035_v36 = vld [vmem:[#allocation19 + $0x50] sm:$0xff] }
 0x6b0   :  { %4488 = vmatpush1.bf16.msra.mxu0 %v4487_v39  ;;  %v4443_v39 = vpack.c.bf16 %v2035_v36, %v2033_v35 }
 0x6b1   :  { %4490 = vmatprep.subr.bf16.mxu0 %v4489_v40 }
 0x6b4   :  { %4492 = vmatpush1.bf16.msra.mxu0 %v4491_v45  ;;  %v2281_v45 = vld [vmem:[#allocation20 + $0x30] sm:$0xff] }
 0x6b5   :  { %4494 = vmatprep.subr.bf16.mxu0 %v4493_v46  ;;  %v4455_v49 = vpack.c.bf16 %v2281_v45, %v2279_v44 }
 0x6b8   :  { %4496 = vmatpush1.bf16.msra.mxu0 %v4495_v52  ;;  %v2274_v52 = vld [vmem:[#allocation20] sm:$0xff] }
 0x6b9   :  { %4498 = vmatprep.subr.bf16.mxu0 %v4497_v53  ;;  %v2276_v53 = vld [vmem:[#allocation20 + $0x10] sm:$0xff] }
 0x6ba   :  { %v4459_v60 = vpack.c.bf16 %v2276_v53, %v2274_v52  ;;  %v2915_v53 = vld [vmem:[#allocation23 + $0x20] sm:$0xff] }
 0x6bc   :  { %4500 = vmatpush1.bf16.msra.mxu0 %v4499_v62  ;;  %v2450_v62 = vld [vmem:[#allocation20 + $0x40] sm:$0xff] }
 0x6bd   :  { %4502 = vmatprep.subr.bf16.mxu0 %v4501_v63  ;;  %v2452_v63 = vld [vmem:[#allocation20 + $0x50] sm:$0xff] }
 0x6be   :  { %v4463_v1 = vpack.c.bf16 %v2452_v63, %v2450_v62  ;;  %v2917_v63 = vld [vmem:[#allocation23 + $0x30] sm:$0xff] }
 0x6c0   :  { %4504 = vmatpush1.bf16.msra.mxu0 %v4503_v7  ;;  %v2645_v7 = vld [vmem:[#allocation22 + $0x1f8] sm:$0xff] }
 0x6c1   :  { %4506 = vmatprep.subr.bf16.mxu0 %v4505_v8 }
 0x6c4   :  { %4508 = vmatpush1.bf16.msra.mxu0 %v4507_v14  ;;  %v2554_v14 = vrot.slane %v2545_v10, %v5687_v18  ;;  %v2939_v10 = vld [vmem:[#allocation23 + $0xe0] sm:$0xff] }
 0x6c5   :  { %4510 = vmatprep.subr.bf16.mxu0 %v4509_v15 }
 0x6c8   :  { %4512 = vmatpush1.bf16.msra.mxu0 %v4511_v22 }
 0x6c9   :  { %4514 = vmatprep.subr.bf16.mxu0 %v4513_v23 }
 0x6cc   :  { %4516 = vmatpush1.bf16.msra.mxu0 %v4515_v30 }
 0x6cd   :  { %4518 = vmatprep.subr.bf16.mxu0 %v4517_v31 }
 0x6d0   :  { %4520 = vmatpush1.bf16.msra.mxu0 %v4519_v34 }
 0x774   :  { %v4232_v40 = vpop.f32.mrb[26].mxu1 }
 0x775   :  { %v1773_v42 = vpop.f32.mrb[27].mxu1 }
 0x776   :  { %3781 = vmatmul.mubr.msk.f32.vlgmr.msra.gmra.mrb[30].mxu1 %vm1277_vm2, %v1773_v42  ;;  %v2929_v42 = vld [vmem:[#allocation23 + $0x90] sm:$0xff] }
 0x777   :  { %2025 = vmatprep.mubr.f32.mxu1 %v5279_v0  ;;  %4444 = vmatpush1.bf16.msra.mxu1 %v4443_v39  ;;  %v2911_v39 = vld [vmem:[#allocation23] sm:$0xff] }
 0x778   :  { %v4239_v43 = vpop.f32.mrb[28].mxu1  ;;  %4454 = vmatprep.subr.bf16.mxu1 %v4453_v41  ;;  %v2912_v41 = vld [vmem:[#allocation23 + $0x8] sm:$0xff] }
 0x779   :  { %v1848_v46 = vpop.f32.mrb[29].mxu1  ;;  %v4571_v44 = vpack.c.bf16 %v2912_v41, %v2911_v39 }
 0x77a   :  { %3782 = vmatmul.mubr.msk.f32.gmra.mrb[32].mxu1 %vm1277_vm2, %v4232_v40  ;;  %v4569_v40 = vpack.c.bf16 %v2928_v38, %v2927_v37 }
 0x77b   :  { %2107 = vmatprep.mubr.f32.mxu1 %v5279_v0 }
 0x77e   :  { %3783 = vmatmul.mubr.msk.f32.vlgmr.msra.gmra.mrb[30].mxu1 %vm1277_vm2, %v1848_v46  ;;  %v2913_v46 = vld [vmem:[#allocation23 + $0x10] sm:$0xff] }
 0x77f   :  { %2113 = vmatprep.mubr.f32.mxu1 %v5279_v0  ;;  %4456 = vmatpush1.bf16.msra.mxu1 %v4455_v49  ;;  %v2932_v49 = vld [vmem:[#allocation23 + $0xa8] sm:$0xff] }
 0x780   :  { %4458 = vmatprep.subr.bf16.mxu1 %v4457_v50  ;;  %v4575_v50 = vpack.c.bf16 %v2914_v47, %v2913_v46  ;;  %v4577_v52 = vpack.c.bf16 %v2932_v49, %v2931_v48 }
 0x782   :  { %3784 = vmatmul.mubr.msk.f32.gmra.mrb[32].mxu1 %vm1277_vm2, %v4239_v43  ;;  %v2930_v43 = vld [vmem:[#allocation23 + $0x98] sm:$0xff] }
 0x783   :  { %2353 = vmatprep.mubr.f32.mxu1 %v5279_v0  ;;  %v4573_v45 = vpack.c.bf16 %v2930_v43, %v2929_v42 }
 0x786   :  { %3789 = vmatmul.mubr.msk.f32.vlgmr.msra.gmra.mrb[30].mxu1 %vm1277_vm2, %v5724_v27  ;;  %v2639_v27 = vld [vmem:[#allocation22 + $0x1c8] sm:$0xff] }
 0x787   :  { %2359 = vmatprep.mubr.f32.mxu1 %v5279_v0  ;;  %4460 = vmatpush1.bf16.msra.mxu1 %v4459_v60  ;;  %v2934_v60 = vld [vmem:[#allocation23 + $0xb8] sm:$0xff] }
 0x788   :  { %4462 = vmatprep.subr.bf16.mxu1 %v4461_v61  ;;  %v4579_v61 = vpack.c.bf16 %v2916_v58, %v2915_v53  ;;  %v4581_v62 = vpack.c.bf16 %v2934_v60, %v2933_v59  ;;  %v2944_v58 = vld [vmem:[#allocation23 + $0x100] sm:$0xff]  ;;  %v2945_v59 = vld [vmem:[#allocation23 + $0x108] sm:$0xff]  ;;  %v2962_v60 = vld [vmem:[#allocation23 + $0x190] sm:$0xff] }
 0x78a   :  { %3790 = vmatmul.mubr.msk.f32.gmra.mrb[32].mxu1 %vm1277_vm2, %v5726_v28  ;;  %v2641_v28 = vld [vmem:[#allocation22 + $0x1d8] sm:$0xff] }
 0x78b   :  { %2436 = vmatprep.mubr.f32.mxu1 %v5279_v0 }
 0x78e   :  { %3791 = vmatmul.mubr.msk.f32.vlgmr.msra.gmra.mrb[30].mxu1 %vm1277_vm2, %v5749_v55  ;;  %v4521_v55 = vpack.c.bf16 %v2641_v28, %v2639_v27  ;;  %v2935_v27 = vld [vmem:[#allocation23 + $0xc0] sm:$0xff]  ;;  %v2936_v28 = vld [vmem:[#allocation23 + $0xc8] sm:$0xff] }
 0x78f   :  { %2442 = vmatprep.mubr.f32.mxu1 %v5279_v0  ;;  %4464 = vmatpush1.bf16.msra.mxu1 %v4463_v1  ;;  %v2918_v1 = vld [vmem:[#allocation23 + $0x38] sm:$0xff]  ;;  %v4585_v2 = vpack.c.bf16 %v2936_v28, %v2935_v27  ;;  %v2964_v28 = vld [vmem:[#allocation23 + $0x1a0] sm:$0xff] }
 0x790   :  { %4522 = vmatprep.subr.bf16.mxu0 %v4521_v55  ;;  %v4583_v55 = vpack.c.bf16 %v2918_v1, %v2917_v63  ;;  %v2946_v1 = vld [vmem:[#allocation23 + $0x110] sm:$0xff]  ;;  %v2947_v27 = vld [vmem:[#allocation23 + $0x118] sm:$0xff] }
 0x791   :  { %4524 = vmatpush1.bf16.msra.mxu0 %v4523_v6  ;;  %v2920_v6 = vld [vmem:[#allocation23 + $0x48] sm:$0xff] }
 0x792   :  { %3792 = vmatmul.mubr.msk.f32.gmra.mrb[32].mxu1 %vm1277_vm2, %v5747_v54  ;;  %v2643_v54 = vld [vmem:[#allocation22 + $0x1e8] sm:$0xff] }
 0x793   :  { %2524 = vmatprep.mubr.f32.mxu1 %v5279_v0  ;;  %v4525_v8 = vpack.c.bf16 %v2645_v7, %v2643_v54  ;;  %v2937_v54 = vld [vmem:[#allocation23 + $0xd0] sm:$0xff]  ;;  %v2938_v7 = vld [vmem:[#allocation23 + $0xd8] sm:$0xff] }
 0x795   :  { %4526 = vmatprep.subr.bf16.mxu0 %v4525_v8  ;;  %v4587_v8 = vpack.c.bf16 %v2920_v6, %v2919_v4  ;;  %v2948_v4 = vld [vmem:[#allocation23 + $0x120] sm:$0xff]  ;;  %v2949_v6 = vld [vmem:[#allocation23 + $0x128] sm:$0xff] }
 0x796   :  { %3793 = vmatmul.mubr.msk.f32.vlgmr.msra.gmra.mrb[30].mxu1 %vm1277_vm2, %v5753_v57  ;;  %v2644_v57 = vld [vmem:[#allocation22 + $0x1f0] sm:$0xff] }
 0x797   :  { %2530 = vmatprep.mubr.f32.mxu1 %v5279_v0  ;;  %v4527_v9 = vpack.c.bf16 %v2644_v57, %v2642_v3  ;;  %v4589_v3 = vpack.c.bf16 %v2938_v7, %v2937_v54  ;;  %v2921_v57 = vld [vmem:[#allocation23 + $0x50] sm:$0xff]  ;;  %v2967_v54 = vld [vmem:[#allocation23 + $0x1b8] sm:$0xff]  ;;  %v4547_v7 = vpack.c.bf16 %v2949_v6, %v2948_v4  ;;  %v3135_v6 = vld [vmem:[#allocation23 + $0x240] sm:$0xff] }
 0x799   :  { %4528 = vmatpush1.bf16.msra.mxu0 %v4527_v9  ;;  %v2922_v9 = vld [vmem:[#allocation23 + $0x58] sm:$0xff] }
 0x79a   :  { %3794 = vmatmul.mubr.msk.f32.gmra.mrb[32].mxu1 %vm1277_vm2, %v5751_v56  ;;  %v2562_v56 = vld [vmem:[#allocation25 + $0x1] ss:$4 sm:$0x3]  ;;  %4570 = vmatprep.subr.bf16.mxu0 %v4569_v40 }
 0x79b   :  { %2821 = vmatprep.mubr.f32.mxu1 %v5279_v0  ;;  %v2567_v15 = vrot.slane %v2562_v56, %v5685_v16  ;;  %v2571_v19 = vrot.slane %v2562_v56, %v5687_v18  ;;  %v2940_v56 = vld [vmem:[#allocation23 + $0xe8] sm:$0xff] }
 0x869   :  { %v2526_v5 = vpop.f32.mrb[30].mxu1 }
 0x86a   :  { %v2557_v20 = vadd.f32 %v2550_v11, %v2526_v5  ;;  %v2528_v21 = vpop.f32.mrb[31].mxu1  ;;  %v2924_v5 = vld [vmem:[#allocation23 + $0x68] sm:$0xff] }
 0x86b   :  { %v2558_v22 = vadd.f32 %v2554_v14, %v2528_v21 }
 0x86c   :  { %v2574_v23 = vmul.f32 %v2567_v15, %v2557_v20  ;;  %v2942_v20 = vld [vmem:[#allocation23 + $0xf8] sm:$0xff] }
 0x86d   :  { %v2575_v24 = vmul.f32 %v2571_v19, %v2558_v22  ;;  %v2532_v25 = vpop.f32.mrb[32].mxu1 }
 0x86e   :  { %v2559_v26 = vadd.f32 %v2550_v11, %v2532_v25  ;;  %v2534_v29 = vpop.f32.mrb[33].mxu1  ;;  %v2578_v32 = vmax.f32 %v2574_v23, 0.0  ;;  %v4591_v11 = vpack.c.bf16 %v2922_v9, %v2921_v57  ;;  %v2925_v23 = vld [vmem:[#allocation23 + $0x70] sm:$0xff]  ;;  %v2968_v57 = vld [vmem:[#allocation23 + $0x1c0] sm:$0xff]  ;;  %v2969_v9 = vld [vmem:[#allocation23 + $0x1c8] sm:$0xff] }
 0x86f   :  { %v2579_v30 = vmax.f32 %v2575_v24, 0.0  ;;  %v2560_v31 = vadd.f32 %v2554_v14, %v2534_v29  ;;  %v4593_v14 = vpack.c.bf16 %v2940_v56, %v2939_v10  ;;  %v2926_v24 = vld [vmem:[#allocation23 + $0x78] sm:$0xff]  ;;  %v4553_v56 = vpack.c.bf16 %v2969_v9, %v2968_v57 }
 0x870   :  { %v2576_v33 = vmul.f32 %v2567_v15, %v2559_v26  ;;  %v2923_v15 = vld [vmem:[#allocation23 + $0x60] sm:$0xff]  ;;  %v4599_v25 = vpack.c.bf16 %v2926_v24, %v2925_v23  ;;  %v2973_v23 = vld [vmem:[#allocation23 + $0x1e8] sm:$0xff]  ;;  %v3138_v57 = vld [vmem:[#allocation23 + $0x258] sm:$0xff] }
 0x871   :  { %v2577_v34 = vmul.f32 %v2571_v19, %v2560_v31  ;;  %2723 = vmatprep.mubr.f32.mxu0 %v2579_v30  ;;  %v2941_v19 = vld [vmem:[#allocation23 + $0xf0] sm:$0xff]  ;;  %v4595_v21 = vpack.c.bf16 %v2924_v5, %v2923_v15  ;;  %v2647_v26 = vld [vmem:[#allocation25 + $0x2] ss:$4 sm:$0x3]  ;;  %v2971_v5 = vld [vmem:[#allocation23 + $0x1d8] sm:$0xff] }
 0x872   :  { %2724 = vmatmul.mubr.f32.vlgmr.msra.gmra.mrb[16].mxu0 %v2578_v32  ;;  %v2580_v36 = vmax.f32 %v2576_v33, 0.0  ;;  %v4597_v22 = vpack.c.bf16 %v2942_v20, %v2941_v19  ;;  %v2656_v29 = vrot.slane %v2647_v26, %v5687_v18  ;;  %v2652_v30 = vrot.slane %v2647_v26, %v5685_v16  ;;  %v2737_v31 = vld [vmem:[#allocation25 + $0x3] ss:$4 sm:$0x3]  ;;  %v2970_v15 = vld [vmem:[#allocation23 + $0x1d0] sm:$0xff] }
 0x873   :  { %v2581_v35 = vmax.f32 %v2577_v34, 0.0  ;;  %4572 = vmatpush3.bf16.msra.mxu0 %v4571_v44  ;;  %v2742_v37 = vrot.slane %v2737_v31, %v5685_v16  ;;  %v4557_v19 = vpack.c.bf16 %v2971_v5, %v2970_v15  ;;  %v2954_v20 = vld [vmem:[#allocation23 + $0x150] sm:$0xff]  ;;  %v2956_v26 = vld [vmem:[#allocation23 + $0x160] sm:$0xff]  ;;  %v3303_v15 = vld [vmem:[#allocation23 + $0x488] sm:$0xff] }
 0x874   :  { %4574 = vmatprep.subr.bf16.mxu0 %v4573_v45  ;;  %v3139_v5 = vld [vmem:[#allocation23 + $0x260] sm:$0xff] }
 0x875   :  { %2729 = vmatprep.mubr.f32.mxu0 %v2581_v35  ;;  %v2746_v35 = vrot.slane %v2737_v31, %v5687_v18  ;;  %v2975_v31 = vld [vmem:[#allocation23 + $0x1f8] sm:$0xff] }
 0x876   :  { %2730 = vmatmul.mubr.f32.gmra.mrb[18].mxu0 %v2580_v36 }
 0x877   :  { %4576 = vmatpush3.bf16.msra.mxu0 %v4575_v50  ;;  %v2960_v50 = vld [vmem:[#allocation23 + $0x180] sm:$0xff] }
 0x878   :  { %4578 = vmatprep.subr.bf16.mxu0 %v4577_v52  ;;  %v2961_v52 = vld [vmem:[#allocation23 + $0x188] sm:$0xff] }
 0x879   :  { %v4537_v53 = vpack.c.bf16 %v2961_v52, %v2960_v50  ;;  %v3147_v50 = vld [vmem:[#allocation23 + $0x2a0] sm:$0xff]  ;;  %v3148_v52 = vld [vmem:[#allocation23 + $0x2a8] sm:$0xff] }
 0x87b   :  { %4580 = vmatpush3.bf16.msra.mxu0 %v4579_v61  ;;  %v2963_v61 = vld [vmem:[#allocation23 + $0x198] sm:$0xff] }
 0x87c   :  { %4582 = vmatprep.subr.bf16.mxu0 %v4581_v62  ;;  %v4539_v62 = vpack.c.bf16 %v2945_v59, %v2944_v58  ;;  %v4541_v63 = vpack.c.bf16 %v2963_v61, %v2962_v60  ;;  %v4609_v58 = vpack.c.bf16 %v3148_v52, %v3147_v50  ;;  %v3131_v59 = vld [vmem:[#allocation23 + $0x220] sm:$0xff]  ;;  %v3132_v60 = vld [vmem:[#allocation23 + $0x228] sm:$0xff]  ;;  %v3149_v61 = vld [vmem:[#allocation23 + $0x2b0] sm:$0xff] }
 0x87f   :  { %4584 = vmatpush3.bf16.msra.mxu0 %v4583_v55  ;;  %v2965_v55 = vld [vmem:[#allocation23 + $0x1a8] sm:$0xff] }
 0x880   :  { %4586 = vmatprep.subr.bf16.mxu0 %v4585_v2  ;;  %v4545_v2 = vpack.c.bf16 %v2965_v55, %v2964_v28  ;;  %v3134_v28 = vld [vmem:[#allocation23 + $0x238] sm:$0xff]  ;;  %v3151_v55 = vld [vmem:[#allocation23 + $0x2c0] sm:$0xff] }
 0x883   :  { %4588 = vmatpush3.bf16.msra.mxu0 %v4587_v8 }
 0x884   :  { %4590 = vmatprep.subr.bf16.mxu0 %v4589_v3  ;;  %v2951_v3 = vld [vmem:[#allocation23 + $0x138] sm:$0xff] }
 0x887   :  { %4592 = vmatpush3.bf16.msra.mxu0 %v4591_v11  ;;  %v2952_v11 = vld [vmem:[#allocation23 + $0x140] sm:$0xff] }
 0x888   :  { %4594 = vmatprep.subr.bf16.mxu0 %v4593_v14  ;;  %v2953_v14 = vld [vmem:[#allocation23 + $0x148] sm:$0xff] }
 0x88b   :  { %4596 = vmatpush3.bf16.msra.mxu0 %v4595_v21  ;;  %v2955_v21 = vld [vmem:[#allocation23 + $0x158] sm:$0xff] }
 0x88c   :  { %4598 = vmatprep.subr.bf16.mxu0 %v4597_v22  ;;  %v2972_v22 = vld [vmem:[#allocation23 + $0x1e0] sm:$0xff]  ;;  %v4559_v24 = vpack.c.bf16 %v2955_v21, %v2954_v20  ;;  %v3157_v21 = vld [vmem:[#allocation23 + $0x2f0] sm:$0xff] }
 0x88f   :  { %4600 = vmatpush3.bf16.msra.mxu0 %v4599_v25  ;;  %v4561_v25 = vpack.c.bf16 %v2973_v23, %v2972_v22  ;;  %v3158_v22 = vld [vmem:[#allocation23 + $0x2f8] sm:$0xff] }
 0x890   :  { %v4629_v23 = vpack.c.bf16 %v3158_v22, %v3157_v21  ;;  %v3276_v21 = vld [vmem:[#allocation23 + $0x3b8] sm:$0xff] }
 0x945   :  { %v2725_v32 = vpop.f32.mrb[16].mxu0 }
 0x946   :  { %v2727_v33 = vpop.f32.mrb[17].mxu0  ;;  %v2726_v36 = vadd.f32 %v2725_v32, %v2652_v30 }
 0x947   :  { %v2728_v34 = vadd.f32 %v2727_v33, %v2656_v29 }
 0x948   :  { %v2749_v43 = vmul.f32 %v2742_v37, %v2726_v36  ;;  %v3143_v36 = vld [vmem:[#allocation23 + $0x280] sm:$0xff] }
 0x949   :  { %v2731_v38 = vpop.f32.mrb[18].mxu0  ;;  %v2750_v41 = vmul.f32 %v2746_v35, %v2728_v34  ;;  %v2958_v34 = vld [vmem:[#allocation23 + $0x170] sm:$0xff] }
 0x94a   :  { %v2732_v39 = vadd.f32 %v2731_v38, %v2652_v30  ;;  %v2733_v40 = vpop.f32.mrb[19].mxu0  ;;  %v5795_v49 = vmax.f32 %v2749_v43, 0.0  ;;  %v2974_v30 = vld [vmem:[#allocation23 + $0x1f0] sm:$0xff]  ;;  %v3146_v43 = vld [vmem:[#allocation23 + $0x298] sm:$0xff] }
 0x94b   :  { %v2734_v42 = vadd.f32 %v2733_v40, %v2656_v29  ;;  %v5791_v47 = vmax.f32 %v2750_v41, 0.0  ;;  %v2957_v29 = vld [vmem:[#allocation23 + $0x168] sm:$0xff]  ;;  %v4565_v33 = vpack.c.bf16 %v2975_v31, %v2974_v30  ;;  %v3127_v40 = vld [vmem:[#allocation23 + $0x200] sm:$0xff] }
 0x94c   :  { %v2751_v44 = vmul.f32 %v2742_v37, %v2732_v39  ;;  %v4563_v32 = vpack.c.bf16 %v2957_v29, %v2956_v26  ;;  %v3144_v37 = vld [vmem:[#allocation23 + $0x288] sm:$0xff]  ;;  %v3269_v29 = vld [vmem:[#allocation23 + $0x380] sm:$0xff] }
 0x94d   :  { %v2752_v45 = vmul.f32 %v2746_v35, %v2734_v42  ;;  %v2959_v35 = vld [vmem:[#allocation23 + $0x178] sm:$0xff]  ;;  %v4601_v39 = vpack.c.bf16 %v3144_v37, %v3143_v36  ;;  %v3128_v41 = vld [vmem:[#allocation23 + $0x208] sm:$0xff]  ;;  %v3145_v42 = vld [vmem:[#allocation23 + $0x290] sm:$0xff] }
 0x94e   :  { %v5789_v46 = vmax.f32 %v2751_v44, 0.0  ;;  %v4567_v38 = vpack.c.bf16 %v2959_v35, %v2958_v34  ;;  %v4603_v44 = vpack.c.bf16 %v3128_v41, %v3127_v40  ;;  %v3270_v30 = vld [vmem:[#allocation23 + $0x388] sm:$0xff]  ;;  %v3304_v34 = vld [vmem:[#allocation23 + $0x490] sm:$0xff]  ;;  %v3305_v35 = vld [vmem:[#allocation23 + $0x498] sm:$0xff] }
 0x94f   :  { %v5793_v48 = vmax.f32 %v2752_v45, 0.0  ;;  %v4605_v45 = vpack.c.bf16 %v3146_v43, %v3145_v42  ;;  %v4665_v31 = vpack.c.bf16 %v3270_v30, %v3269_v29  ;;  %v3288_v40 = vld [vmem:[#allocation23 + $0x410] sm:$0xff]  ;;  %v3289_v41 = vld [vmem:[#allocation23 + $0x418] sm:$0xff]  ;;  %v3306_v42 = vld [vmem:[#allocation23 + $0x4a0] sm:$0xff] }
 0x950   :  { %v4531_v16 = vpack.c.bf16 %v5789_v46, %v5795_v49  ;;  %v3307_v43 = vld [vmem:[#allocation23 + $0x4a8] sm:$0xff]  ;;  %v3259_v30 = vld [vmem:[#allocation23 + $0x330] sm:$0xff] }
 0x951   :  { %v4529_v18 = vpack.c.bf16 %v5793_v48, %v5791_v47  ;;  %v4641_v52 = vpack.c.bf16 %v3307_v43, %v3306_v42  ;;  %v3261_v43 = vld [vmem:[#allocation23 + $0x340] sm:$0xff] }
 0x953   :  { %4530 = vmatprep.subr.bf16.mxu1 %v4529_v18 }
 0x954   :  { %4532 = vmatpush1.bf16.msra.mxu1 %v4531_v16 }
 0x955   :  { %4534 = vmatprep.subr.bf16.mxu1 %v4529_v18  ;;  %v3129_v18 = vld [vmem:[#allocation23 + $0x210] sm:$0xff] }
 0x957   :  { %3795 = vmatmul.mubr.msk.f32.vlgmr.msra.gmra.mrb[34].mxu1 %vm1277_vm2, %v5698_v51  ;;  %v4543_v51 = vpack.c.bf16 %v2947_v27, %v2946_v1  ;;  %v3133_v27 = vld [vmem:[#allocation23 + $0x230] sm:$0xff] }
 0x958   :  { %4536 = vmatpush1.bf16.msra.mxu1 %v4531_v16  ;;  %2827 = vmatprep.mubr.f32.mxu1 %v5279_v0  ;;  %v3130_v16 = vld [vmem:[#allocation23 + $0x218] sm:$0xff] }
 0x959   :  { %4538 = vmatprep.subr.bf16.mxu1 %v4537_v53  ;;  %v4607_v53 = vpack.c.bf16 %v3130_v16, %v3129_v18  ;;  %v3290_v18 = vld [vmem:[#allocation23 + $0x420] sm:$0xff]  ;;  %v3291_v16 = vld [vmem:[#allocation23 + $0x428] sm:$0xff] }
 0x95b   :  { %3796 = vmatmul.mubr.msk.f32.gmra.mrb[36].mxu1 %vm1277_vm2, %v5704_v12  ;;  %v2966_v12 = vld [vmem:[#allocation23 + $0x1b0] sm:$0xff] }
 0x95c   :  { %2898 = vmatprep.mubr.f32.mxu1 %v5279_v0  ;;  %v4549_v8 = vpack.c.bf16 %v2967_v54, %v2966_v12  ;;  %v3136_v12 = vld [vmem:[#allocation23 + $0x248] sm:$0xff]  ;;  %v3153_v54 = vld [vmem:[#allocation23 + $0x2d0] sm:$0xff] }
 0x95f   :  { %3797 = vmatmul.mubr.msk.f32.vlgmr.msra.gmra.mrb[38].mxu1 %vm1277_vm2, %v5706_v13  ;;  %v2950_v13 = vld [vmem:[#allocation23 + $0x130] sm:$0xff] }
 0x960   :  { %4540 = vmatpush3.bf16.msra.mxu1 %v4539_v62  ;;  %2904 = vmatprep.mubr.f32.mxu1 %v5279_v0  ;;  %v4551_v10 = vpack.c.bf16 %v2951_v3, %v2950_v13  ;;  %v3150_v62 = vld [vmem:[#allocation23 + $0x2b8] sm:$0xff]  ;;  %v3137_v3 = vld [vmem:[#allocation23 + $0x250] sm:$0xff] }
 0x961   :  { %4542 = vmatprep.subr.bf16.mxu1 %v4541_v63  ;;  %v4611_v63 = vpack.c.bf16 %v3132_v60, %v3131_v59  ;;  %v4613_v1 = vpack.c.bf16 %v3150_v62, %v3149_v61  ;;  %v4623_v9 = vpack.c.bf16 %v3138_v57, %v3137_v3  ;;  %v3308_v59 = vld [vmem:[#allocation23 + $0x4b0] sm:$0xff]  ;;  %v3309_v60 = vld [vmem:[#allocation23 + $0x4b8] sm:$0xff] }
 0x962   :  { %v3271_v61 = vld [vmem:[#allocation23 + $0x390] sm:$0xff]  ;;  %v3272_v62 = vld [vmem:[#allocation23 + $0x398] sm:$0xff] }
 0x963   :  { %3798 = vmatmul.mubr.msk.f32.gmra.mrb[40].mxu1 %vm1277_vm2, %v5712_v17  ;;  %v4555_v17 = vpack.c.bf16 %v2953_v14, %v2952_v11  ;;  %v3302_v11 = vld [vmem:[#allocation23 + $0x480] sm:$0xff] }
 0x964   :  { %4544 = vmatpush3.bf16.msra.mxu1 %v4543_v51  ;;  %3040 = vmatprep.mubr.f32.mxu1 %v5791_v47  ;;  %v3152_v51 = vld [vmem:[#allocation23 + $0x2c8] sm:$0xff] }
 0x965   :  { %4546 = vmatprep.subr.bf16.mxu1 %v4545_v2  ;;  %v4615_v2 = vpack.c.bf16 %v3134_v28, %v3133_v27  ;;  %v4617_v4 = vpack.c.bf16 %v3152_v51, %v3151_v55  ;;  %v3292_v28 = vld [vmem:[#allocation23 + $0x430] sm:$0xff]  ;;  %v4645_v51 = vpack.c.bf16 %v3309_v60, %v3308_v59 }
 0x966   :  { %v3300_v60 = vld [vmem:[#allocation23 + $0x470] sm:$0xff] }
 0x968   :  { %4548 = vmatpush3.bf16.msra.mxu1 %v4547_v7  ;;  %v3154_v7 = vld [vmem:[#allocation23 + $0x2d8] sm:$0xff] }
 0x969   :  { %4550 = vmatprep.subr.bf16.mxu1 %v4549_v8  ;;  %v4619_v8 = vpack.c.bf16 %v3136_v12, %v3135_v6  ;;  %v4621_v13 = vpack.c.bf16 %v3154_v7, %v3153_v54  ;;  %v3255_v6 = vld [vmem:[#allocation23 + $0x310] sm:$0xff]  ;;  %v3256_v12 = vld [vmem:[#allocation23 + $0x318] sm:$0xff]  ;;  %v3310_v54 = vld [vmem:[#allocation23 + $0x4c0] sm:$0xff] }
 0x96a   :  { %v3311_v7 = vld [vmem:[#allocation23 + $0x4c8] sm:$0xff]  ;;  %v4671_v57 = vpack.c.bf16 %v3256_v12, %v3255_v6 }
 0x96b   :  { %v3486_v6 = vld [vmem:[#allocation23 + $0x588] sm:$0xff] }
 0x96c   :  { %4552 = vmatpush3.bf16.msra.mxu1 %v4551_v10  ;;  %v3155_v10 = vld [vmem:[#allocation23 + $0x2e0] sm:$0xff] }
 0x96d   :  { %4554 = vmatprep.subr.bf16.mxu1 %v4553_v56  ;;  %v3156_v56 = vld [vmem:[#allocation23 + $0x2e8] sm:$0xff] }
 0x96e   :  { %v4625_v14 = vpack.c.bf16 %v3156_v56, %v3155_v10  ;;  %v3295_v10 = vld [vmem:[#allocation23 + $0x448] sm:$0xff] }
 0x970   :  { %4556 = vmatpush3.bf16.msra.mxu1 %v4555_v17  ;;  %v3140_v17 = vld [vmem:[#allocation23 + $0x268] sm:$0xff] }
 0x971   :  { %4558 = vmatprep.subr.bf16.mxu1 %v4557_v19  ;;  %v4633_v19 = vpack.c.bf16 %v3303_v15, %v3302_v11  ;;  %v4627_v20 = vpack.c.bf16 %v3140_v17, %v3139_v5  ;;  %v4649_v11 = vpack.c.bf16 %v3311_v7, %v3310_v54  ;;  %v3258_v15 = vld [vmem:[#allocation23 + $0x328] sm:$0xff]  ;;  %v3312_v5 = vld [vmem:[#allocation23 + $0x4d0] sm:$0xff] }
 0x973   :  { %4634 = vmatprep.subr.bf16.mxu0 %v4633_v19  ;;  %v3313_v19 = vld [vmem:[#allocation23 + $0x4d8] sm:$0xff] }
 0x974   :  { %4560 = vmatpush3.bf16.msra.mxu1 %v4559_v24  ;;  %v3141_v24 = vld [vmem:[#allocation23 + $0x270] sm:$0xff] }
 0x975   :  { %4562 = vmatprep.subr.bf16.mxu1 %v4561_v25  ;;  %v3142_v25 = vld [vmem:[#allocation23 + $0x278] sm:$0xff] }
 0x976   :  { %v4631_v26 = vpack.c.bf16 %v3142_v25, %v3141_v24  ;;  %v3296_v24 = vld [vmem:[#allocation23 + $0x450] sm:$0xff]  ;;  %v3297_v25 = vld [vmem:[#allocation23 + $0x458] sm:$0xff] }
 0x978   :  { %4564 = vmatpush3.bf16.msra.mxu1 %v4563_v32  ;;  %v3286_v32 = vld [vmem:[#allocation23 + $0x400] sm:$0xff] }
 0x979   :  { %4566 = vmatprep.subr.bf16.mxu1 %v4565_v33  ;;  %v3287_v33 = vld [vmem:[#allocation23 + $0x408] sm:$0xff] }
 0x97a   :  { %v4635_v37 = vpack.c.bf16 %v3287_v33, %v3286_v32  ;;  %v3314_v32 = vld [vmem:[#allocation23 + $0x4e0] sm:$0xff]  ;;  %v3315_v33 = vld [vmem:[#allocation23 + $0x4e8] sm:$0xff] }
 0x97b   :  { %v4657_v42 = vpack.c.bf16 %v3315_v33, %v3314_v32  ;;  %v3473_v32 = vld [vmem:[#allocation23 + $0x520] sm:$0xff]  ;;  %v3474_v33 = vld [vmem:[#allocation23 + $0x528] sm:$0xff] }
 0x97c   :  { %4568 = vmatpush3.bf16.msra.mxu1 %v4567_v38 }
 0x97d   :  { %4602 = vmatprep.subr.bf16.mxu1 %v4601_v39  ;;  %v4637_v39 = vpack.c.bf16 %v3305_v35, %v3304_v34  ;;  %v3277_v34 = vld [vmem:[#allocation23 + $0x3c0] sm:$0xff]  ;;  %v3278_v35 = vld [vmem:[#allocation23 + $0x3c8] sm:$0xff] }
 0x97f   :  { %3041 = vmatmul.mubr.f32.vlgmr.msra.gmra.mrb[42].mxu1 %v5795_v49 }
 0x980   :  { %3045 = vmatprep.mubr.f32.mxu1 %v5793_v48  ;;  %4604 = vmatpush3.bf16.msra.mxu1 %v4603_v44 }
 0x981   :  { %4606 = vmatprep.subr.bf16.mxu1 %v4605_v45  ;;  %v4639_v45 = vpack.c.bf16 %v3289_v41, %v3288_v40  ;;  %v3298_v40 = vld [vmem:[#allocation23 + $0x460] sm:$0xff]  ;;  %v3299_v41 = vld [vmem:[#allocation23 + $0x468] sm:$0xff] }
 0x983   :  { %3046 = vmatmul.mubr.f32.gmra.mrb[44].mxu1 %v5789_v46 }
 0x984   :  { %4608 = vmatpush3.bf16.msra.mxu1 %v4607_v53  ;;  %v3253_v53 = vld [vmem:[#allocation23 + $0x300] sm:$0xff] }
 0x985   :  { %4610 = vmatprep.subr.bf16.mxu1 %v4609_v58  ;;  %v3254_v58 = vld [vmem:[#allocation23 + $0x308] sm:$0xff] }
 0x986   :  { %v4667_v27 = vpack.c.bf16 %v3254_v58, %v3253_v53  ;;  %v3280_v53 = vld [vmem:[#allocation23 + $0x3d8] sm:$0xff]  ;;  %v4659_v58 = vpack.c.bf16 %v3299_v41, %v3298_v40  ;;  %v3475_v41 = vld [vmem:[#allocation23 + $0x530] sm:$0xff] }
 0x988   :  { %4612 = vmatpush3.bf16.msra.mxu1 %v4611_v63 }
 0x989   :  { %4614 = vmatprep.subr.bf16.mxu1 %v4613_v1  ;;  %v4643_v1 = vpack.c.bf16 %v3291_v16, %v3290_v18  ;;  %v3316_v18 = vld [vmem:[#allocation23 + $0x4f0] sm:$0xff]  ;;  %v3317_v16 = vld [vmem:[#allocation23 + $0x4f8] sm:$0xff] }
 0x98c   :  { %4616 = vmatpush3.bf16.msra.mxu1 %v4615_v2  ;;  %v4669_v2 = vpack.c.bf16 %v3272_v62, %v3271_v61  ;;  %v3301_v61 = vld [vmem:[#allocation23 + $0x478] sm:$0xff]  ;;  %v4661_v62 = vpack.c.bf16 %v3317_v16, %v3316_v18 }
 0x98d   :  { %4618 = vmatprep.subr.bf16.mxu1 %v4617_v4  ;;  %v3293_v4 = vld [vmem:[#allocation23 + $0x438] sm:$0xff]  ;;  %v4663_v12 = vpack.c.bf16 %v3301_v61, %v3300_v60  ;;  %v3479_v61 = vld [vmem:[#allocation23 + $0x550] sm:$0xff] }
 0x98e   :  { %v4647_v3 = vpack.c.bf16 %v3293_v4, %v3292_v28  ;;  %v3264_v28 = vld [vmem:[#allocation23 + $0x358] sm:$0xff]  ;;  %v3485_v4 = vld [vmem:[#allocation23 + $0x580] sm:$0xff] }
 0x990   :  { %4620 = vmatpush3.bf16.msra.mxu1 %v4619_v8  ;;  %v3273_v8 = vld [vmem:[#allocation23 + $0x3a0] sm:$0xff] }
 0x991   :  { %4622 = vmatprep.subr.bf16.mxu1 %v4621_v13  ;;  %v3274_v13 = vld [vmem:[#allocation23 + $0x3a8] sm:$0xff] }
 0x992   :  { %v4673_v17 = vpack.c.bf16 %v3274_v13, %v3273_v8  ;;  %v4697_v8 = vpack.c.bf16 %v3486_v6, %v3485_v4  ;;  %v3265_v13 = vld [vmem:[#allocation23 + $0x360] sm:$0xff]  ;;  %v3499_v4 = vld [vmem:[#allocation23 + $0x5f0] sm:$0xff]  ;;  %v3500_v6 = vld [vmem:[#allocation23 + $0x5f8] sm:$0xff] }
 0x994   :  { %4624 = vmatpush3.bf16.msra.mxu1 %v4623_v9  ;;  %v3294_v9 = vld [vmem:[#allocation23 + $0x440] sm:$0xff] }
 0x995   :  { %4626 = vmatprep.subr.bf16.mxu1 %v4625_v14  ;;  %v3257_v14 = vld [vmem:[#allocation23 + $0x320] sm:$0xff]  ;;  %v4651_v22 = vpack.c.bf16 %v3295_v10, %v3294_v9  ;;  %v3470_v9 = vld [vmem:[#allocation23 + $0x508] sm:$0xff]  ;;  %v3283_v10 = vld [vmem:[#allocation23 + $0x3f0] sm:$0xff] }
 0x998   :  { %4628 = vmatpush3.bf16.msra.mxu1 %v4627_v20  ;;  %v3275_v20 = vld [vmem:[#allocation23 + $0x3b0] sm:$0xff] }
 0x999   :  { %4630 = vmatprep.subr.bf16.mxu1 %v4629_v23  ;;  %v4675_v23 = vpack.c.bf16 %v3258_v15, %v3257_v14  ;;  %v4677_v29 = vpack.c.bf16 %v3276_v21, %v3275_v20  ;;  %v3487_v14 = vld [vmem:[#allocation23 + $0x590] sm:$0xff]  ;;  %v3488_v15 = vld [vmem:[#allocation23 + $0x598] sm:$0xff] }
 0x99a   :  { %v3267_v20 = vld [vmem:[#allocation23 + $0x370] sm:$0xff]  ;;  %v3268_v21 = vld [vmem:[#allocation23 + $0x378] sm:$0xff] }
 0x99c   :  { %4632 = vmatpush3.bf16.msra.mxu1 %v4631_v26  ;;  %v4653_v26 = vpack.c.bf16 %v3313_v19, %v3312_v5 }
 0x99d   :  { %4666 = vmatprep.subr.bf16.mxu1 %v4665_v31  ;;  %v3260_v31 = vld [vmem:[#allocation23 + $0x338] sm:$0xff] }
 0xa2a   :  { %v5816_v36 = vpop.f32.mrb[34].mxu1 }
 0xa2b   :  { %v5818_v38 = vpop.f32.mrb[35].mxu1 }
 0xa2c   :  { %3115 = vmatprep.mubr.f32.mxu0 %v5818_v38 }
 0xa2d   :  { %3116 = vmatmul.mubr.f32.vlgmr.msra.gmra.mrb[20].mxu0 %v5816_v36 }
 0xa2e   :  { %4636 = vmatpush3.bf16.msra.mxu0 %v4635_v37  ;;  %v5822_v44 = vpop.f32.mrb[36].mxu1  ;;  %v4655_v37 = vpack.c.bf16 %v3297_v25, %v3296_v24  ;;  %v3472_v24 = vld [vmem:[#allocation23 + $0x518] sm:$0xff]  ;;  %v3489_v25 = vld [vmem:[#allocation23 + $0x5a0] sm:$0xff] }
 0xa2f   :  { %v5824_v50 = vpop.f32.mrb[37].mxu1  ;;  %4638 = vmatprep.subr.bf16.mxu0 %v4637_v39  ;;  %v4679_v39 = vpack.c.bf16 %v3260_v31, %v3259_v30 }
 0xa30   :  { %3120 = vmatprep.mubr.f32.mxu0 %v5824_v50 }
 0xa31   :  { %3121 = vmatmul.mubr.f32.gmra.mrb[22].mxu0 %v5822_v44 }
 0xa32   :  { %4640 = vmatpush3.bf16.msra.mxu0 %v4639_v45  ;;  %v5828_v63 = vpop.f32.mrb[38].mxu1  ;;  %3382 = vmatprep.mubr.f32.mxu0 %v5791_v47  ;;  %v3262_v45 = vld [vmem:[#allocation23 + $0x348] sm:$0xff] }
 0xa33   :  { %v5831_v55 = vpop.f32.mrb[39].mxu1  ;;  %4642 = vmatprep.subr.bf16.mxu0 %v4641_v52  ;;  %v3279_v52 = vld [vmem:[#allocation23 + $0x3d0] sm:$0xff]  ;;  %v4683_v59 = vpack.c.bf16 %v3262_v45, %v3261_v43  ;;  %v3494_v43 = vld [vmem:[#allocation23 + $0x5c8] sm:$0xff] }
 0xa34   :  { %3223 = vmatprep.mubr.f32.mxu1 %v5831_v55 }
 0xa35   :  { %3224 = vmatmul.mubr.f32.vlgmr.msra.gmra.mrb[46].mxu1 %v5828_v63 }
 0xa36   :  { %4644 = vmatpush3.bf16.msra.mxu0 %v4643_v1  ;;  %4668 = vmatpush3.bf16.msra.mxu1 %v4667_v27  ;;  %v5835_v47 = vpop.f32.mrb[40].mxu1  ;;  %v4685_v1 = vpack.c.bf16 %v3280_v53, %v3279_v52  ;;  %v3263_v27 = vld [vmem:[#allocation23 + $0x350] sm:$0xff]  ;;  %v3477_v52 = vld [vmem:[#allocation23 + $0x540] sm:$0xff]  ;;  %v3478_v53 = vld [vmem:[#allocation23 + $0x548] sm:$0xff] }
 0xa37   :  { %v5837_v56 = vpop.f32.mrb[41].mxu1  ;;  %4646 = vmatprep.subr.bf16.mxu0 %v4645_v51  ;;  %4670 = vmatprep.subr.bf16.mxu1 %v4669_v2  ;;  %v3281_v51 = vld [vmem:[#allocation23 + $0x3e0] sm:$0xff]  ;;  %v3282_v2 = vld [vmem:[#allocation23 + $0x3e8] sm:$0xff]  ;;  %v4687_v54 = vpack.c.bf16 %v3264_v28, %v3263_v27  ;;  %v4715_v60 = vpack.c.bf16 %v3478_v53, %v3477_v52 }
 0xa38   :  { %3228 = vmatprep.mubr.f32.mxu1 %v5837_v56  ;;  %v4689_v7 = vpack.c.bf16 %v3282_v2, %v3281_v51  ;;  %v3481_v51 = vld [vmem:[#allocation23 + $0x560] sm:$0xff]  ;;  %v3482_v2 = vld [vmem:[#allocation23 + $0x568] sm:$0xff] }
 0xa39   :  { %3229 = vmatmul.mubr.f32.gmra.mrb[48].mxu1 %v5835_v47 }
 0xa3a   :  { %4648 = vmatpush3.bf16.msra.mxu0 %v4647_v3  ;;  %4672 = vmatpush3.bf16.msra.mxu1 %v4671_v57  ;;  %v3266_v3 = vld [vmem:[#allocation23 + $0x368] sm:$0xff]  ;;  %v3469_v57 = vld [vmem:[#allocation23 + $0x500] sm:$0xff] }
 0xa3b   :  { %3457 = vmatprep.mubr.f32.mxu1 %v5818_v38  ;;  %4650 = vmatprep.subr.bf16.mxu0 %v4649_v11  ;;  %v4681_v38 = vpack.c.bf16 %v3278_v35, %v3277_v34  ;;  %v3284_v11 = vld [vmem:[#allocation23 + $0x3f8] sm:$0xff]  ;;  %v4691_v5 = vpack.c.bf16 %v3266_v3, %v3265_v13  ;;  %v3491_v34 = vld [vmem:[#allocation23 + $0x5b0] sm:$0xff]  ;;  %v5280_v13 = vmov 0.0|0.0  }
 0xa3c   :  { %4674 = vmatprep.subr.bf16.mxu1 %v4673_v17  ;;  %v4699_v17 = vpack.c.bf16 %v3470_v9, %v3469_v57  ;;  %v4693_v19 = vpack.c.bf16 %v3284_v11, %v3283_v10  ;;  %v3492_v35 = vld [vmem:[#allocation23 + $0x5b8] sm:$0xff] }
 0xa3d   :  { %v4709_v40 = vpack.c.bf16 %v3492_v35, %v3491_v34 }
 0xa3e   :  { %4652 = vmatpush3.bf16.msra.mxu0 %v4651_v22  ;;  %4676 = vmatpush3.bf16.msra.mxu1 %v4675_v23  ;;  %v4701_v22 = vpack.c.bf16 %v3488_v15, %v3487_v14  ;;  %v3471_v23 = vld [vmem:[#allocation23 + $0x510] sm:$0xff] }
 0xa3f   :  { %4654 = vmatprep.subr.bf16.mxu0 %v4653_v26  ;;  %4678 = vmatprep.subr.bf16.mxu1 %v4677_v29  ;;  %v3490_v26 = vld [vmem:[#allocation23 + $0x5a8] sm:$0xff]  ;;  %v4695_v29 = vpack.c.bf16 %v3268_v21, %v3267_v20  ;;  %v4703_v30 = vpack.c.bf16 %v3472_v24, %v3471_v23 }
 0xa40   :  { %v4705_v31 = vpack.c.bf16 %v3490_v26, %v3489_v25 }
 0xa42   :  { %4656 = vmatpush3.bf16.msra.mxu0 %v4655_v37  ;;  %4680 = vmatpush3.bf16.msra.mxu1 %v4679_v39 }
 0xa43   :  { %4658 = vmatprep.subr.bf16.mxu0 %v4657_v42  ;;  %4682 = vmatprep.subr.bf16.mxu1 %v4681_v38  ;;  %v3476_v42 = vld [vmem:[#allocation23 + $0x538] sm:$0xff]  ;;  %v3493_v38 = vld [vmem:[#allocation23 + $0x5c0] sm:$0xff] }
 0xa44   :  { %v4711_v18 = vpack.c.bf16 %v3476_v42, %v3475_v41  ;;  %v3801_v41 = vld [vmem:[#allocation26 + $0x4] ss:$0 sm:$0xff] }
 0xa46   :  { %4660 = vmatpush3.bf16.msra.mxu0 %v4659_v58  ;;  %4684 = vmatpush3.bf16.msra.mxu1 %v4683_v59  ;;  %v3495_v58 = vld [vmem:[#allocation23 + $0x5d0] sm:$0xff]  ;;  %v3496_v59 = vld [vmem:[#allocation23 + $0x5d8] sm:$0xff] }
 0xa47   :  { %4662 = vmatprep.subr.bf16.mxu0 %v4661_v62  ;;  %4686 = vmatprep.subr.bf16.mxu1 %v4685_v1  ;;  %v3480_v62 = vld [vmem:[#allocation23 + $0x558] sm:$0xff]  ;;  %v3497_v1 = vld [vmem:[#allocation23 + $0x5e0] sm:$0xff] }
 0xa48   :  { %v4719_v27 = vpack.c.bf16 %v3480_v62, %v3479_v61  ;;  %v3799_v61 = vld [vmem:[#allocation26 + $0x2] ss:$0 sm:$0xff] }
 0xa4a   :  { %4664 = vmatpush3.bf16.msra.mxu0 %v4663_v12  ;;  %4688 = vmatpush3.bf16.msra.mxu1 %v4687_v54  ;;  %v4725_v12 = vpack.c.bf16 %v3500_v6, %v3499_v4  ;;  %v3483_v54 = vld [vmem:[#allocation23 + $0x570] sm:$0xff] }
 0xa4b   :  { %4690 = vmatprep.subr.bf16.mxu1 %v4689_v7  ;;  %4698 = vmatprep.subr.bf16.mxu0 %v4697_v8  ;;  %v3484_v7 = vld [vmem:[#allocation23 + $0x578] sm:$0xff] }
 0xa4c   :  { %v4727_v8 = vpack.c.bf16 %v3484_v7, %v3483_v54 }
 0xa4d   :  { %3383 = vmatmul.mubr.f32.vlgmr.msra.gmra.mrb[24].mxu0 %v5795_v49 }
 0xa4e   :  { %3387 = vmatprep.mubr.f32.mxu0 %v5793_v48  ;;  %4692 = vmatpush3.bf16.msra.mxu1 %v4691_v5  ;;  %v4707_v48 = vpack.c.bf16 %v3474_v33, %v3473_v32 }
 0xa4f   :  { %4700 = vmatpush3.bf16.msra.mxu0 %v4699_v17  ;;  %4694 = vmatprep.subr.bf16.mxu1 %v4693_v19 }
 0xa50   :  { %4702 = vmatprep.subr.bf16.mxu0 %v4701_v22 }
 0xa51   :  { %3388 = vmatmul.mubr.f32.gmra.mrb[26].mxu0 %v5789_v46 }
 0xa52   :  { %v3964_v37 = vpop.f32.mrb[42].mxu1  ;;  %4696 = vmatpush3.bf16.msra.mxu1 %v4695_v29  ;;  %3565 = vmatprep.mubr.f32.mxu0 %v5831_v55  ;;  %v4713_v55 = vpack.c.bf16 %v3494_v43, %v3493_v38  ;;  %v3802_v43 = vld [vmem:[#allocation26 + $0x5] ss:$0 sm:$0xff] }
 0xa53   :  { %4704 = vmatpush3.bf16.msra.mxu0 %v4703_v30  ;;  %v3965_v49 = vpop.f32.mrb[43].mxu1  ;;  %4729 = vmatprep.subr.bf16.mxu1 %v5280_v13  ;;  %v3608_v13 = vld [vmem:[#allocation7] sm:$0xff] }
 0xa54   :  { %v3966_v39 = vadd.f32 %v3965_v49, %v3964_v37  ;;  %4706 = vmatprep.subr.bf16.mxu0 %v4705_v31 }
 0xa55   :  { %3458 = vmatmul.mubr.f32.vlgmr.msra.gmra.mrb[50].mxu1 %v5816_v36  ;;  %v4717_v36 = vpack.c.bf16 %v3496_v59, %v3495_v58 }
 0xa56   :  { %v3967_v45 = vpop.f32.mrb[44].mxu1  ;;  %3462 = vmatprep.mubr.f32.mxu1 %v5824_v50  ;;  %v3498_v50 = vld [vmem:[#allocation23 + $0x5e8] sm:$0xff] }
 0xa57   :  { %4708 = vmatpush3.bf16.msra.mxu0 %v4707_v48  ;;  %v3968_v46 = vpop.f32.mrb[45].mxu1  ;;  %v4721_v28 = vpack.c.bf16 %v3498_v50, %v3497_v1 }
 0xa58   :  { %v3969_v16 = vadd.f32 %v3968_v46, %v3967_v45  ;;  %4710 = vmatprep.subr.bf16.mxu0 %v4709_v40 }
 0xa59   :  { %3463 = vmatmul.mubr.f32.gmra.mrb[52].mxu1 %v5822_v44  ;;  %v4723_v44 = vpack.c.bf16 %v3482_v2, %v3481_v51 }
 0xa5a   :  { %4258 = vmatprep.mubr.msk.f32.mxu1 %vm5281_vm3, %v5279_v0 }
 0xa5b   :  { %4712 = vmatpush3.bf16.msra.mxu0 %v4711_v18 }
 0xa5c   :  { %4714 = vmatprep.subr.bf16.mxu0 %v4713_v55 }
 0xa5f   :  { %4716 = vmatpush3.bf16.msra.mxu0 %v4715_v60 }
 0xa60   :  { %4718 = vmatprep.subr.bf16.mxu0 %v4717_v36 }
 0xa63   :  { %4720 = vmatpush3.bf16.msra.mxu0 %v4719_v27 }
 0xa64   :  { %4722 = vmatprep.subr.bf16.mxu0 %v4721_v28  ;;  %v3800_v28 = vld [vmem:[#allocation26 + $0x3] ss:$0 sm:$0xff] }
 0xa67   :  { %4724 = vmatpush3.bf16.msra.mxu0 %v4723_v44 }
 0xa68   :  { %4726 = vmatprep.subr.bf16.mxu0 %v4725_v12 }
 0xa6b   :  { %4728 = vmatpush3.bf16.msra.mxu0 %v4727_v8 }
 0xa6e   :  { %3566 = vmatmul.mubr.f32.vlgmr.msra.gmra.mrb[28].mxu0 %v5828_v63 }
 0xa6f   :  { %3570 = vmatprep.mubr.f32.mxu0 %v5837_v56 }
 0xa72   :  { %3571 = vmatmul.mubr.f32.gmra.mrb[30].mxu0 %v5835_v47 }
 0xb00   :  { %v4002_v3 = vpop.f32.mrb[20].mxu0 }
 0xb01   :  { %v4003_v57 = vpop.f32.mrb[21].mxu0 }
 0xb02   :  { %v4004_v9 = vadd.f32 %v4003_v57, %v4002_v3 }
 0xb04   :  { %v3118_v10 = vadd.f32 %v4004_v9, %v3966_v39  ;;  %v4005_v11 = vpop.f32.mrb[22].mxu0 }
 0xb05   :  { %v4006_v14 = vpop.f32.mrb[23].mxu0 }
 0xb06   :  { %v4007_v15 = vadd.f32 %v4006_v14, %v4005_v11 }
 0xb08   :  { %v3123_v5 = vadd.f32 %v4007_v15, %v3969_v16  ;;  %v4040_v17 = vpop.f32.mrb[46].mxu1 }
 0xb09   :  { %v4041_v19 = vpop.f32.mrb[47].mxu1 }
 0xb0a   :  { %v4042_v63 = vadd.f32 %v4041_v19, %v4040_v17 }
 0xb0c   :  { %v3234_v20 = vadd.f32 %v4042_v63, %v3118_v10  ;;  %v4043_v56 = vpop.f32.mrb[48].mxu1  ;;  %v3609_v10 = vld [vmem:[#allocation7 + $0x8] sm:$0xff] }
 0xb0d   :  { %v4044_v21 = vpop.f32.mrb[49].mxu1 }
 0xb0e   :  { %v4045_v47 = vadd.f32 %v4044_v21, %v4043_v56  ;;  %v3241_v27 = vadd.f32 %v3799_v61, %v3234_v20  ;;  %v3616_v21 = vld [vmem:[#allocation28] sm:$0x3] }
 0xb10   :  { %v3235_v22 = vadd.f32 %v4045_v47, %v3123_v5  ;;  %v3248_v4 = vmul.f32 %v3800_v28, %v3241_v27 }
 0xb12   :  { %v3242_v2 = vadd.f32 %v3799_v61, %v3235_v22 }
 0xb14   :  { %v3249_v6 = vmul.f32 %v3800_v28, %v3242_v2 }
 0xb20   :  { %v4078_v23 = vpop.f32.mrb[24].mxu0 }
 0xb21   :  { %v4079_v24 = vpop.f32.mrb[25].mxu0 }
 0xb22   :  { %v4080_v25 = vadd.f32 %v4079_v24, %v4078_v23 }
 0xb24   :  { %v4081_v26 = vpop.f32.mrb[26].mxu0 }
 0xb25   :  { %v4082_v29 = vpop.f32.mrb[27].mxu0 }
 0xb26   :  { %v4083_v30 = vadd.f32 %v4082_v29, %v4081_v26 }
 0xb28   :  { %v4116_v31 = vpop.f32.mrb[50].mxu1 }
 0xb29   :  { %v4117_v32 = vpop.f32.mrb[51].mxu1 }
 0xb2a   :  { %v4118_v33 = vadd.f32 %v4117_v32, %v4116_v31 }
 0xb2c   :  { %v3460_v34 = vadd.f32 %v4118_v33, %v4080_v25  ;;  %v4119_v35 = vpop.f32.mrb[52].mxu1 }
 0xb2d   :  { %v4120_v37 = vpop.f32.mrb[53].mxu1 }
 0xb2e   :  { %v4121_v0 = vadd.f32 %v4120_v37, %v4119_v35 }
 0xb30   :  { %v3465_v49 = vadd.f32 %v4121_v0, %v4083_v30 }
 0xb41   :  { %v4154_v48 = vpop.f32.mrb[28].mxu0 }
 0xb42   :  { %v4155_v39 = vpop.f32.mrb[29].mxu0 }
 0xb43   :  { %v4156_v40 = vadd.f32 %v4155_v39, %v4154_v48 }
 0xb45   :  { %v3576_v42 = vadd.f32 %v4156_v40, %v3460_v34  ;;  %v4157_v38 = vpop.f32.mrb[30].mxu0 }
 0xb46   :  { %v4158_v45 = vpop.f32.mrb[31].mxu0 }
 0xb47   :  { %v3583_v46 = vadd.f32 %v3801_v41, %v3576_v42  ;;  %v4159_v18 = vadd.f32 %v4158_v45, %v4157_v38 }
 0xb49   :  { %v3590_v16 = vmul.f32 %v3802_v43, %v3583_v46  ;;  %v3577_v55 = vadd.f32 %v4159_v18, %v3465_v49 }
 0xb4b   :  { %4798 = vtanh.f32 %v3590_v16  ;;  %v3584_v52 = vadd.f32 %v3801_v41, %v3577_v55 }
 0xb4d   :  { %v3591_v53 = vmul.f32 %v3802_v43, %v3584_v52 }
 0xb4f   :  { %4800 = vtanh.f32 %v3591_v53 }
 0xb55   :  { %v4799_v58 = vpop.eup %4798 }
 0xb56   :  { %v3594_v59 = vadd.f32 2.0, %v4799_v58 }
 0xb58   :  { %v3596_v60 = vsub.f32 0.0, %v3594_v59 }
 0xb59   :  { %v4801_v36 = vpop.eup %4800 }
 0xb5a   :  { %v3598_v62 = vmul.f32 1.442695, %v3596_v60  ;;  %v3595_v1 = vadd.f32 2.0, %v4801_v36 }
 0xb5c   :  { %4802 = vpow2.f32 %v3598_v62  ;;  %v3597_v50 = vsub.f32 0.0, %v3595_v1 }
 0xb5e   :  { %v3600_v51 = vmul.f32 1.442695, %v3597_v50 }
 0xb60   :  { %4804 = vpow2.f32 %v3600_v51 }
 0xb61   :  { %4806 = vtanh.f32 %v3248_v4 }
 0xb62   :  { %4808 = vtanh.f32 %v3249_v6 }
 0xb66   :  { %v4803_v44 = vpop.eup %4802 }
 0xb67   :  { %v3602_v12 = vadd.f32 1.0, %v4803_v44 }
 0xb69   :  { %4810 = vrcp.f32 %v3602_v12 }
 0xb6a   :  { %v4805_v54 = vpop.eup %4804 }
 0xb6b   :  { %v3603_v7 = vadd.f32 1.0, %v4805_v54  ;;  %v4807_v8 = vpop.eup %4806 }
 0xb6c   :  { %v4809_v3 = vpop.eup %4808  ;;  %v3610_v57 = vadd.f32 %v4807_v8, %v3608_v13 }
 0xb6d   :  { %4812 = vrcp.f32 %v3603_v7  ;;  %v3611_v14 = vadd.f32 %v4809_v3, %v3609_v10 }
 0xb73   :  { %v4811_v9 = vpop.eup %4810 }
 0xb74   :  { %v3612_v11 = vmul.f32 %v4811_v9, %v3610_v57  ;;  %4814 = vlog2.f32 %v4811_v9 }
 0xb76   :  { %3614 = vst.msk [vmem:[#allocation29] sm:$0xff] %vm1277_vm2, %v3612_v11 }
 0xb77   :  { %v4813_v15 = vpop.eup %4812 }
 0xb78   :  { %4816 = vlog2.f32 %v4813_v15  ;;  %v3613_v5 = vmul.f32 %v4813_v15, %v3611_v14 }
 0xb7a   :  { %3615 = vst.msk [vmem:[#allocation29 + $0x8] sm:$0xff] %vm1277_vm2, %v3613_v5 }
 0xb7e   :  { %v4815_v17 = vpop.eup %4814 }
 0xb7f   :  { %v3618_v63 = vmul.f32 0.6931472, %v4815_v17 }
 0xb82   :  { %v4817_v19 = vpop.eup %4816 }
 0xb83   :  { %v3620_v20 = vmul.f32 0.6931472, %v4817_v19 }
 0xb85   :  { %v4730_v56 = vpack.c.bf16 %v3620_v20, %v3618_v63 }
 0xb87   :  { %4731 = vmatpush3.bf16.msra.mxu1 %v4730_v56 }
 0xb8a   :  { %4259 = vmatmul.mubr.msk.f32.vlgmr.msra.gmra.mrb[54].mxu1 %vm1277_vm2, %v3616_v21 }
 0xc5d   :  { %v3690_v47 = vpop.f32.mrb[54].mxu1 }
 0xc5e   :  { %v4260_v22 = vpop.f32.mrb[55].mxu1  ;;  %v3695_v23 = vsel %vm3694_vm4, %v3690_v47, 0.0 }
 0xc5f   :  { %3696 = vadd.xlane.f32.xlu0 %v3695_v23 }
 0xc60   :  { %5203 = shalt.err (!%p5200_p0)
}
 0xc61   :  { %s5204_s11 = scalar_lea.hbm %s5900_s17, 256 }
 0xc62   :  { %p5205_p1 = scmp.ne.s32.totalorder %s5900_s17, %s5204_s11  ;;  %p5208_p2 = scmp.lt.u32.totalorder %s5204_s11, %s5900_s17 }
 0xc64   :  { %p5210_p3 = pnand %p5208_p2, %p5205_p1 }
 0xc66   :  { %5213 = shalt.err (!%p5210_p3)
}
 0xc67   :  { %3711 = dma.vmem_to_hbm [thread:$0]  %s3706_s30, 256, %s5900_s17, [#allocation4], %s5260_s25, %s5260_s25, %s5261_s26   ;;  %vm3698_vm5 = vcmask 1024  }
 0xc68   :  { %s5283_s19 = smov [#allocation30]  }
 0xc69   :  { %s3718_s8 = sshll.u32 %s5283_s19, 4  ;;  %s3719_s8 = int_to_ptr.vmem [resolvable:$true] %s3718_s8 }
 0xc6a   :  { %s5214_s28 = scalar_lea.vmem %s3719_s8, 32  ;;  %p5219_p5 = scmp.lt.s32.totalorder %s3719_s8, %s3719_s8 }
 0xc6b   :  { %p5215_p4 = scmp.ne.s32.totalorder %s3719_s8, %s5214_s28  ;;  %p5220_p6 = scmp.lt.s32.totalorder %s5214_s28, %s5214_s28 }
 0xc6d   :  { %p5221_p7 = por %p5220_p6, %p5219_p5 }
 0xc6f   :  { %p5222_p8 = pnand %p5221_p7, %p5215_p4 }
 0xcec   :  { %v3697_v24 = vpop.xlane.xlu0 %3696 }
 0xced   :  { %3699 = vst.msk [vmem:[#allocation30] sm:$0x3] %vm3698_vm5, %v3697_v24 }
 0xcee   :  { %5225 = shalt.err (!%p5222_p8)
}
 0xcef   :  { %s5913_s0 = sld [smem:[#allocation46_spill]] }
 0xcf5   :  { %s5226_s20 = scalar_lea.hbm %s5913_s0, 32 }
 0xcf6   :  { %p5227_p9 = scmp.ne.s32.totalorder %s5913_s0, %s5226_s20  ;;  %p5230_p10 = scmp.lt.u32.totalorder %s5226_s20, %s5913_s0 }
 0xcf8   :  { %p5232_p11 = pnand %p5230_p10, %p5227_p9 }
 0xcfa   :  { %5235 = shalt.err (!%p5232_p11)
}
 0xcfb   :  { %3721 = dma.vmem_to_hbm [thread:$0]  %s3719_s8, 32, %s5913_s0, [#allocation31]  }
 0xcfc   :  { %5254 = dma.done.wait [#allocation4], 256  }
 0xcfd   :  { %5255 = vsyncadd [#allocation4], 4294967040 }
 0xcfe   :  { %5256 = dma.done.wait [#allocation31], 32  }
 0xcff   :  { %5257 = vsyncadd [#allocation31], 4294967264 }
 0xd00   :  { %3728 = vsyncpa [#allocation3], 1 }
 0xd01   :  { %3729 = vsyncpa [#allocation6], 1 }
 0xd02   :  { %3730 = vsyncpa [#allocation9], 1 }
 0xd03   :  { %3731 = vsyncpa [#allocation12], 1 }
 0xd04   :  { %3732 = vsyncpa [#allocation15], 1 }
 0xd05   :  { %3733 = vsyncpa [#allocation18], 1 }
 0xd06   :  { %3734 = vsyncpa [#allocation21], 1 }
 0xd07   :  { %3735 = vsyncpa [#allocation24], 1 }
 0xd08   :  { %3736 = vsyncpa [#allocation27], 1 }
 0xd09   :  { %3737 = vsyncpa [#allocation4], 1 }
 0xd0a   :  { %3738 = vsyncpa [#allocation31], 1 }

</bundles_post_ra>
